<compile_context>
chip_gen: v7x
topology: tpu7x:2x2x1
jax: 0.10.0
libtpu: 0.0.40
codegen_flags: <defaults>
</compile_context>

<pallas_src>
import jax
import jax.numpy as jnp
import numpy as np
from jax.experimental import pallas as pl
from jax.experimental.pallas import tpu as pltpu

# ---------------- small config (config.* of the PyTorch module) ----------------
B, S, W = 2, 4, 8          # batch, sentences per doc, words per sentence
VOCAB = 50                 # config.n_vocab
E = 16                     # config.embed_size
HW = 16                    # config.word_gru_hidden_size
HS = 16                    # config.sentence_gru_hidden_size
NCLS = 5                   # config.n_classes
OUT_PAD = 128              # lane-dense padded logits width (sliced back to NCLS outside)
# config.bidirectional = True


# ====================== fused Pallas kernel ======================

def _bigru_attn_level(x_flat, T, N, H, wih, gi_bias, whh_bd, bhh_n,
                      wlin, blin, ctx, h_seq):
    """One HAN level: bidirectional GRU over time + tanh/linear attention pooling.

    x_flat : (T*N, Din) value, rows ordered t*N + n (time-major flatten).
    wih    : (Din, 6H)  [fwd r,z,n | bwd r,z,n] input-projection weights.
    gi_bias: (1, 6H)    b_ih, with b_hh folded in for the r/z gates (they commute).
    whh_bd : (2H, 6H)   block-diagonal [whh_f 0; 0 whh_b] -> one hh matmul per step.
    bhh_n  : (1, 2H)    [b_hn fwd | b_hn bwd] (must stay inside the r* term).
    h_seq  : VMEM scratch ref (N, T, 2H) — fwd half written at t, bwd half at T-1-t.
    Returns pooled (N, 2H).  GRU gate order follows torch.nn.GRU: [r, z, n].
    """
    H2, H3 = 2 * H, 3 * H

    # (1) Input projections for ALL timesteps and BOTH directions in ONE matmul.
    gi = (jnp.dot(x_flat, wih, preferred_element_type=jnp.float32)
          + gi_bias).reshape(T, N, 6 * H)

    # Broadcast the n-gate recurrent bias once (JAX does not CSE broadcast_in_dim).
    bhh_n_b = jnp.broadcast_to(bhh_n, (N, H2))

    # (2) Both directions in the same fully-unrolled loop (T is small and static).
    h_cat = jnp.zeros((N, H2), jnp.float32)              # [h_fwd | h_bwd]
    for t in range(T):
        gh = jnp.dot(h_cat, whh_bd, preferred_element_type=jnp.float32)   # (N, 6H)
        gi_f = gi[t, :, :H3]
        gi_b = gi[T - 1 - t, :, H3:]
        gh_f = gh[:, :H3]
        gh_b = gh[:, H3:]

        rz_f = jax.nn.sigmoid(gi_f[:, :H2] + gh_f[:, :H2])
        rz_b = jax.nn.sigmoid(gi_b[:, :H2] + gh_b[:, :H2])
        n_f = jnp.tanh(gi_f[:, H2:] + rz_f[:, :H] * (gh_f[:, H2:] + bhh_n_b[:, :H]))
        n_b = jnp.tanh(gi_b[:, H2:] + rz_b[:, :H] * (gh_b[:, H2:] + bhh_n_b[:, H:]))
        h_f = (1.0 - rz_f[:, H:]) * n_f + rz_f[:, H:] * h_cat[:, :H]
        h_b = (1.0 - rz_b[:, H:]) * n_b + rz_b[:, H:] * h_cat[:, H:]

        h_seq[:, t, 0:H] = h_f                           # fwd output at original index t
        h_seq[:, T - 1 - t, H:H2] = h_b                  # bwd output at original index
        h_cat = jnp.concatenate([h_f, h_b], axis=1)

    # (3) Attention: u = tanh(hW+b); scores = u@ctx; softmax over time (last axis);
    #     pooled = (e @ h) * 1/sum(e)  — the T-reduction goes through the MXU, and the
    #     divide becomes one EUP reciprocal per row.
    h_nt = h_seq[...]                                    # (N, T, 2H)
    h_2d = h_nt.reshape(N * T, H2)
    u = jnp.tanh(jnp.dot(h_2d, wlin, preferred_element_type=jnp.float32) + blin)
    scores = jnp.dot(u, ctx, preferred_element_type=jnp.float32).reshape(N, T)
    m = jnp.max(scores, axis=1, keepdims=True)
    e = jnp.exp(scores - m)                              # (N, T)
    inv_den = pl.reciprocal(jnp.sum(e, axis=1, keepdims=True), approx=True)   # (N, 1)
    num = jnp.einsum('nqt,ntd->nqd', e[:, None, :], h_nt,
                     preferred_element_type=jnp.float32).reshape(N, H2)
    return num * inv_den


def _han_kernel(xw_ref,
                w_wih, w_gib, w_whh, w_bhn, w_wlin, w_blin, w_ctx,
                s_wih, s_gib, s_whh, s_bhn, s_wlin, s_blin, s_ctx,
                fcw_ref, fcb_ref,
                out_ref,
                wh_seq, sh_seq):
    Tw, Nw, Ew = xw_ref.shape            # (W, S*B, E)
    Hw = w_bhn.shape[1] // 2
    Hs = s_bhn.shape[1] // 2
    Ns, Ts, _ = sh_seq.shape             # (B, S, 2*HS)

    # word level over all S*B sentences at once
    x_words = xw_ref[...].reshape(Tw * Nw, Ew)
    word_pooled = _bigru_attn_level(
        x_words, Tw, Nw, Hw,
        w_wih[...], w_gib[...], w_whh[...], w_bhn[...],
        w_wlin[...], w_blin[...], w_ctx[...], wh_seq)    # (S*B, 2*HW)

    # rows of word_pooled are ordered s*B + b == time-major flatten of (S, B):
    # feed them directly as the sentence-level (T*N, Din) slab (no reshape needed).
    sent_pooled = _bigru_attn_level(
        word_pooled, Ts, Ns, Hs,
        s_wih[...], s_gib[...], s_whh[...], s_bhn[...],
        s_wlin[...], s_blin[...], s_ctx[...], sh_seq)    # (B, 2*HS)

    # final FC into a lane-dense padded slab (cols >= NCLS are zero weights)
    out_ref[...] = (jnp.dot(sent_pooled, fcw_ref[...],
                            preferred_element_type=jnp.float32)
                    + fcb_ref[...]).astype(out_ref.dtype)


# ====================== wrapper ======================

_VMEM = pl.BlockSpec(memory_space=pltpu.MemorySpace.VMEM)


def _pack_level(p, h):
    """Repack per-direction GRU/attention params for the fused kernel."""
    z1 = jnp.zeros((1, h), jnp.float32)
    wih = jnp.concatenate([p["wih_f"], p["wih_b"]], axis=1)                 # (Din, 6H)
    gi_bias = jnp.concatenate(
        [p["bih_f"] + jnp.concatenate([p["bhh_f"][:, :2 * h], z1], axis=1),
         p["bih_b"] + jnp.concatenate([p["bhh_b"][:, :2 * h], z1], axis=1)],
        axis=1)                                                             # (1, 6H)
    zh = jnp.zeros((h, 3 * h), jnp.float32)
    whh_bd = jnp.concatenate(
        [jnp.concatenate([p["whh_f"], zh], axis=1),
         jnp.concatenate([zh, p["whh_b"]], axis=1)], axis=0)                # (2H, 6H)
    bhh_n = jnp.concatenate([p["bhh_f"][:, 2 * h:], p["bhh_b"][:, 2 * h:]],
                            axis=1)                                         # (1, 2H)
    return wih, gi_bias, whh_bd, bhh_n, p["wlin"], p["blin"], p["ctx"]


def han_forward(tokens, params):
    """tokens: (B, S, W) int32 -> logits (B, NCLS) f32, one fused Pallas kernel."""
    # Embedding gather stays in plain JAX (table gather has no clean tiled Pallas form
    # here); transpose the *int32 tokens* (cheap) so the gathered activations land
    # directly in (T=W, N=S*B, E) time-major layout with n = s*B + b.
    xw = params["embedding"][jnp.transpose(tokens, (2, 1, 0))].reshape(W, S * B, E)

    word_p = _pack_level(params["word"], HW)
    sent_p = _pack_level(params["sent"], HS)
    fc_w = jnp.zeros((2 * HS, OUT_PAD), jnp.float32).at[:, :NCLS].set(params["fc_w"])
    fc_b = jnp.zeros((1, OUT_PAD), jnp.float32).at[:, :NCLS].set(params["fc_b"])

    ins = [xw, *word_p, *sent_p, fc_w, fc_b]

    def _lvl_flops(t, n, din, h):
        return 2 * t * n * (din * 6 * h      # hoisted input projections
                            + 2 * h * 6 * h  # per-step block-diag hh matmul
                            + 2 * h * 2 * h  # attention linear
                            + 2 * h          # context scores
                            + 2 * h)         # attention-weighted pooling
    flops = (_lvl_flops(W, S * B, E, HW) + _lvl_flops(S, B, 2 * HW, HS)
             + 2 * B * 2 * HS * OUT_PAD)
    transcendentals = (W * S * B * (8 * HW + 1) + S * B * (8 * HS + 1) + S * B + B)
    bytes_accessed = 4 * (sum(int(a.size) for a in ins) + B * OUT_PAD)

    out_pad = pl.pallas_call(
        _han_kernel,
        out_shape=jax.ShapeDtypeStruct((B, OUT_PAD), jnp.float32),
        in_specs=[_VMEM] * len(ins),
        out_specs=_VMEM,
        scratch_shapes=[pltpu.VMEM((S * B, W, 2 * HW), jnp.float32),   # word-level h
                        pltpu.VMEM((B, S, 2 * HS), jnp.float32)],      # sentence-level h
        cost_estimate=pl.CostEstimate(flops=flops,
                                      transcendentals=transcendentals,
                                      bytes_accessed=bytes_accessed),
        # TODO(synk): if S*B grows beyond toy size, add a ('parallel',) grid axis over the
        # folded batch (uses v7x's second TensorCore) and pad gate widths toward 128.
    )(*ins)
    return out_pad[:, :NCLS]


# ====================== deterministic parameter init ======================

def _uniform(key, shape, lo, hi):
    return jax.random.uniform(key, shape, jnp.float32, lo, hi)


def _gru_level_params(key, din, h, d2, ctx_range, lin_fanin):
    ks = jax.random.split(key, 14)
    s = 1.0 / np.sqrt(h)
    sl = 1.0 / np.sqrt(lin_fanin)
    return {
        # forward direction (transposed vs. torch: stored as (Din,3H)/(H,3H), gates [r,z,n])
        "wih_f": _uniform(ks[0], (din, 3 * h), -s, s),
        "whh_f": _uniform(ks[1], (h, 3 * h), -s, s),
        "bih_f": _uniform(ks[2], (1, 3 * h), -s, s),
        "bhh_f": _uniform(ks[3], (1, 3 * h), -s, s),
        # reverse direction
        "wih_b": _uniform(ks[4], (din, 3 * h), -s, s),
        "whh_b": _uniform(ks[5], (h, 3 * h), -s, s),
        "bih_b": _uniform(ks[6], (1, 3 * h), -s, s),
        "bhh_b": _uniform(ks[7], (1, 3 * h), -s, s),
        # attention projection + context vector
        "wlin": _uniform(ks[8], (d2, d2), -sl, sl),
        "blin": _uniform(ks[9], (1, d2), -sl, sl),
        "ctx": _uniform(ks[10], (d2, 1), -ctx_range, ctx_range),
    }


def make_params(key):
    k_emb, k_word, k_sent, k_fcw, k_fcb = jax.random.split(key, 5)
    sfc = 1.0 / np.sqrt(2 * HS)
    return {
        "embedding": _uniform(k_emb, (VOCAB, E), -0.25, 0.25),
        "word": _gru_level_params(k_word, E, HW, 2 * HW, 0.25, 2 * HW),
        "sent": _gru_level_params(k_sent, 2 * HW, HS, 2 * HS, 0.10, 2 * HS),
        "fc_w": _uniform(k_fcw, (2 * HS, NCLS), -sfc, sfc),
        "fc_b": _uniform(k_fcb, (1, NCLS), -sfc, sfc),
    }


# ====================== pure-JAX reference (mirrors the PyTorch forward) ======================

def _ref_bigru(x, p):
    H = p["whh_f"].shape[0]

    def run(wih, whh, bih, bhh, xs):
        N = xs.shape[1]

        def step(h, x_t):
            gi = x_t @ wih + bih[0]
            gh = h @ whh + bhh[0]
            r = jax.nn.sigmoid(gi[:, :H] + gh[:, :H])
            z = jax.nn.sigmoid(gi[:, H:2 * H] + gh[:, H:2 * H])
            n = jnp.tanh(gi[:, 2 * H:] + r * gh[:, 2 * H:])
            hn = (1.0 - z) * n + z * h
            return hn, hn

        _, hs = jax.lax.scan(step, jnp.zeros((N, H), jnp.float32), xs)
        return hs

    hf = run(p["wih_f"], p["whh_f"], p["bih_f"], p["bhh_f"], x)
    hb = run(p["wih_b"], p["whh_b"], p["bih_b"], p["bhh_b"], x[::-1])[::-1]
    return jnp.concatenate([hf, hb], axis=-1)


def _ref_attn_pool(h, p):
    u = jnp.tanh(h @ p["wlin"] + p["blin"][0])
    scores = (u @ p["ctx"])[..., 0]                 # (T, N)
    alpha = jax.nn.softmax(scores, axis=0)
    return jnp.sum(h * alpha[:, :, None], axis=0)   # (N, 2H)


def ref_forward(tokens, params):
    x_perm = jnp.transpose(tokens, (1, 2, 0))       # (S, W, B)  == x.permute(1,2,0)
    word_outs = []
    for i in range(S):                              # per-sentence word RNN, like the torch loop
        emb = params["embedding"][x_perm[i]]        # (W, B, E)
        h = _ref_bigru(emb, params["word"])
        word_outs.append(_ref_attn_pool(h, params["word"])[None])
    sent_in = jnp.concatenate(word_outs, axis=0)    # (S, B, 2*HW)
    h = _ref_bigru(sent_in, params["sent"])
    pooled = _ref_attn_pool(h, params["sent"])      # (B, 2*HS)
    return pooled @ params["fc_w"] + params["fc_b"][0]


# ====================== main ======================

if __name__ == "__main__":
    key = jax.random.PRNGKey(0)
    k_params, k_tokens = jax.random.split(key)
    params = make_params(k_params)
    tokens = jax.random.randint(k_tokens, (B, S, W), 0, VOCAB, dtype=jnp.int32)

    out = jax.jit(lambda t: han_forward(t, params))(tokens)
    out = jax.block_until_ready(out)
    assert out.shape == (B, NCLS), out.shape

    ref = jax.block_until_ready(ref_forward(tokens, params))
    # tolerance covers the in-kernel EUP approximate reciprocal in the two softmaxes
    np.testing.assert_allclose(np.asarray(out), np.asarray(ref), rtol=2e-3, atol=2e-3)

    print("KERNEL_OK")
</pallas_src>

<mosaic_0001>
module attributes {stable_mosaic.version = 11 : i64} {
  func.func @_han_kernel(%arg0: memref<8x8x16xf32, #tpu.memory_space<vmem>>, %arg1: memref<16x96xf32, #tpu.memory_space<vmem>>, %arg2: memref<1x96xf32, #tpu.memory_space<vmem>>, %arg3: memref<32x96xf32, #tpu.memory_space<vmem>>, %arg4: memref<1x32xf32, #tpu.memory_space<vmem>>, %arg5: memref<32x32xf32, #tpu.memory_space<vmem>>, %arg6: memref<1x32xf32, #tpu.memory_space<vmem>>, %arg7: memref<32x1xf32, #tpu.memory_space<vmem>>, %arg8: memref<32x96xf32, #tpu.memory_space<vmem>>, %arg9: memref<1x96xf32, #tpu.memory_space<vmem>>, %arg10: memref<32x96xf32, #tpu.memory_space<vmem>>, %arg11: memref<1x32xf32, #tpu.memory_space<vmem>>, %arg12: memref<32x32xf32, #tpu.memory_space<vmem>>, %arg13: memref<1x32xf32, #tpu.memory_space<vmem>>, %arg14: memref<32x1xf32, #tpu.memory_space<vmem>>, %arg15: memref<32x128xf32, #tpu.memory_space<vmem>>, %arg16: memref<1x128xf32, #tpu.memory_space<vmem>>, %arg17: memref<2x128xf32, #tpu.memory_space<vmem>>, %arg18: memref<8x8x32xf32, #tpu.memory_space<vmem>>, %arg19: memref<2x4x32xf32, #tpu.memory_space<vmem>>) attributes {dimension_semantics = [], scalar_prefetch = 0 : i64, scratch_operands = 2 : i64, tpu.core_type = #tpu.core_type<tc>} {
    %c0 = arith.constant 0 : index
    %c0_0 = arith.constant 0 : index
    %c0_1 = arith.constant 0 : index
    %0 = vector.load %arg0[%c0, %c0_0, %c0_1] : memref<8x8x16xf32, #tpu.memory_space<vmem>>, vector<8x8x16xf32>
    %1 = vector.shape_cast %0 : vector<8x8x16xf32> to vector<64x16xf32>
    %c0_2 = arith.constant 0 : index
    %c0_3 = arith.constant 0 : index
    %2 = vector.load %arg1[%c0_2, %c0_3] : memref<16x96xf32, #tpu.memory_space<vmem>>, vector<16x96xf32>
    %c0_4 = arith.constant 0 : index
    %c0_5 = arith.constant 0 : index
    %3 = vector.load %arg2[%c0_4, %c0_5] : memref<1x96xf32, #tpu.memory_space<vmem>>, vector<1x96xf32>
    %c0_6 = arith.constant 0 : index
    %c0_7 = arith.constant 0 : index
    %4 = vector.load %arg3[%c0_6, %c0_7] : memref<32x96xf32, #tpu.memory_space<vmem>>, vector<32x96xf32>
    %c0_8 = arith.constant 0 : index
    %c0_9 = arith.constant 0 : index
    %5 = vector.load %arg4[%c0_8, %c0_9] : memref<1x32xf32, #tpu.memory_space<vmem>>, vector<1x32xf32>
    %c0_10 = arith.constant 0 : index
    %c0_11 = arith.constant 0 : index
    %6 = vector.load %arg5[%c0_10, %c0_11] : memref<32x32xf32, #tpu.memory_space<vmem>>, vector<32x32xf32>
    %c0_12 = arith.constant 0 : index
    %c0_13 = arith.constant 0 : index
    %7 = vector.load %arg6[%c0_12, %c0_13] : memref<1x32xf32, #tpu.memory_space<vmem>>, vector<1x32xf32>
    %c0_14 = arith.constant 0 : index
    %c0_15 = arith.constant 0 : index
    %8 = vector.load %arg7[%c0_14, %c0_15] : memref<32x1xf32, #tpu.memory_space<vmem>>, vector<32x1xf32>
    %cst = arith.constant dense<0.000000e+00> : vector<64x96xf32>
    %9 = tpu.matmul %1, %2, %cst {dimension_numbers = #tpu.dot_dimension_numbers<[1], [0], [0], [1], [0, 0, 1, 1], [], []>} : vector<64x16xf32>, vector<16x96xf32>, vector<64x96xf32> -> vector<64x96xf32>
    %10 = vector.broadcast %3 : vector<1x96xf32> to vector<64x96xf32>
    %11 = arith.addf %9, %10 : vector<64x96xf32>
    %12 = vector.shape_cast %11 : vector<64x96xf32> to vector<8x8x96xf32>
    %13 = vector.shape_cast %5 : vector<1x32xf32> to vector<1x32xf32>
    %14 = vector.broadcast %13 : vector<1x32xf32> to vector<8x32xf32>
    %cst_16 = arith.constant 0.000000e+00 : f32
    %15 = vector.broadcast %cst_16 : f32 to vector<8x32xf32>
    %cst_17 = arith.constant dense<0.000000e+00> : vector<8x96xf32>
    %16 = tpu.matmul %15, %4, %cst_17 {dimension_numbers = #tpu.dot_dimension_numbers<[1], [0], [0], [1], [0, 0, 1, 1], [], []>} : vector<8x32xf32>, vector<32x96xf32>, vector<8x96xf32> -> vector<8x96xf32>
    %17 = vector.extract_strided_slice %12 {offsets = [0, 0, 0], sizes = [1, 8, 48], strides = [1, 1, 1]} : vector<8x8x96xf32> to vector<1x8x48xf32>
    %18 = vector.shape_cast %17 : vector<1x8x48xf32> to vector<8x48xf32>
    %19 = vector.extract_strided_slice %12 {offsets = [7, 0, 48], sizes = [1, 8, 48], strides = [1, 1, 1]} : vector<8x8x96xf32> to vector<1x8x48xf32>
    %20 = vector.shape_cast %19 : vector<1x8x48xf32> to vector<8x48xf32>
    %21 = vector.extract_strided_slice %16 {offsets = [0, 0], sizes = [8, 48], strides = [1, 1]} : vector<8x96xf32> to vector<8x48xf32>
    %22 = vector.extract_strided_slice %16 {offsets = [0, 48], sizes = [8, 48], strides = [1, 1]} : vector<8x96xf32> to vector<8x48xf32>
    %23 = vector.extract_strided_slice %18 {offsets = [0, 0], sizes = [8, 32], strides = [1, 1]} : vector<8x48xf32> to vector<8x32xf32>
    %24 = vector.extract_strided_slice %21 {offsets = [0, 0], sizes = [8, 32], strides = [1, 1]} : vector<8x48xf32> to vector<8x32xf32>
    %25 = arith.addf %23, %24 : vector<8x32xf32>
    %26 = arith.negf %25 : vector<8x32xf32>
    %27 = math.exp %26 : vector<8x32xf32>
    %cst_18 = arith.constant 1.000000e+00 : f32
    %28 = vector.broadcast %cst_18 : f32 to vector<8x32xf32>
    %29 = arith.addf %28, %27 : vector<8x32xf32>
    %30 = arith.divf %28, %29 : vector<8x32xf32>
    %31 = vector.extract_strided_slice %20 {offsets = [0, 0], sizes = [8, 32], strides = [1, 1]} : vector<8x48xf32> to vector<8x32xf32>
    %32 = vector.extract_strided_slice %22 {offsets = [0, 0], sizes = [8, 32], strides = [1, 1]} : vector<8x48xf32> to vector<8x32xf32>
    %33 = arith.addf %31, %32 : vector<8x32xf32>
    %34 = arith.negf %33 : vector<8x32xf32>
    %35 = math.exp %34 : vector<8x32xf32>
    %cst_19 = arith.constant 1.000000e+00 : f32
    %36 = vector.broadcast %cst_19 : f32 to vector<8x32xf32>
    %37 = arith.addf %36, %35 : vector<8x32xf32>
    %38 = arith.divf %36, %37 : vector<8x32xf32>
    %39 = vector.extract_strided_slice %18 {offsets = [0, 32], sizes = [8, 16], strides = [1, 1]} : vector<8x48xf32> to vector<8x16xf32>
    %40 = vector.extract_strided_slice %30 {offsets = [0, 0], sizes = [8, 16], strides = [1, 1]} : vector<8x32xf32> to vector<8x16xf32>
    %41 = vector.extract_strided_slice %21 {offsets = [0, 32], sizes = [8, 16], strides = [1, 1]} : vector<8x48xf32> to vector<8x16xf32>
    %42 = vector.extract_strided_slice %14 {offsets = [0, 0], sizes = [8, 16], strides = [1, 1]} : vector<8x32xf32> to vector<8x16xf32>
    %43 = arith.addf %41, %42 : vector<8x16xf32>
    %44 = arith.mulf %40, %43 : vector<8x16xf32>
    %45 = arith.addf %39, %44 : vector<8x16xf32>
    %46 = math.tanh %45 : vector<8x16xf32>
    %47 = vector.extract_strided_slice %20 {offsets = [0, 32], sizes = [8, 16], strides = [1, 1]} : vector<8x48xf32> to vector<8x16xf32>
    %48 = vector.extract_strided_slice %38 {offsets = [0, 0], sizes = [8, 16], strides = [1, 1]} : vector<8x32xf32> to vector<8x16xf32>
    %49 = vector.extract_strided_slice %22 {offsets = [0, 32], sizes = [8, 16], strides = [1, 1]} : vector<8x48xf32> to vector<8x16xf32>
    %50 = vector.extract_strided_slice %14 {offsets = [0, 16], sizes = [8, 16], strides = [1, 1]} : vector<8x32xf32> to vector<8x16xf32>
    %51 = arith.addf %49, %50 : vector<8x16xf32>
    %52 = arith.mulf %48, %51 : vector<8x16xf32>
    %53 = arith.addf %47, %52 : vector<8x16xf32>
    %54 = math.tanh %53 : vector<8x16xf32>
    %55 = vector.extract_strided_slice %30 {offsets = [0, 16], sizes = [8, 16], strides = [1, 1]} : vector<8x32xf32> to vector<8x16xf32>
    %cst_20 = arith.constant 1.000000e+00 : f32
    %56 = vector.broadcast %cst_20 : f32 to vector<8x16xf32>
    %57 = arith.subf %56, %55 : vector<8x16xf32>
    %58 = arith.mulf %57, %46 : vector<8x16xf32>
    %59 = vector.extract_strided_slice %30 {offsets = [0, 16], sizes = [8, 16], strides = [1, 1]} : vector<8x32xf32> to vector<8x16xf32>
    %60 = vector.extract_strided_slice %15 {offsets = [0, 0], sizes = [8, 16], strides = [1, 1]} : vector<8x32xf32> to vector<8x16xf32>
    %61 = arith.mulf %59, %60 : vector<8x16xf32>
    %62 = arith.addf %58, %61 : vector<8x16xf32>
    %63 = vector.extract_strided_slice %38 {offsets = [0, 16], sizes = [8, 16], strides = [1, 1]} : vector<8x32xf32> to vector<8x16xf32>
    %cst_21 = arith.constant 1.000000e+00 : f32
    %64 = vector.broadcast %cst_21 : f32 to vector<8x16xf32>
    %65 = arith.subf %64, %63 : vector<8x16xf32>
    %66 = arith.mulf %65, %54 : vector<8x16xf32>
    %67 = vector.extract_strided_slice %38 {offsets = [0, 16], sizes = [8, 16], strides = [1, 1]} : vector<8x32xf32> to vector<8x16xf32>
    %68 = vector.extract_strided_slice %15 {offsets = [0, 16], sizes = [8, 16], strides = [1, 1]} : vector<8x32xf32> to vector<8x16xf32>
    %69 = arith.mulf %67, %68 : vector<8x16xf32>
    %70 = arith.addf %66, %69 : vector<8x16xf32>
    %c0_22 = arith.constant 0 : index
    %c0_23 = arith.constant 0 : index
    %c0_24 = arith.constant 0 : index
    %71 = vector.load %arg18[%c0_22, %c0_23, %c0_24] : memref<8x8x32xf32, #tpu.memory_space<vmem>>, vector<8x1x16xf32>
    %72 = vector.shape_cast %71 : vector<8x1x16xf32> to vector<8x16xf32>
    %73 = vector.shape_cast %62 : vector<8x16xf32> to vector<8x1x16xf32>
    tpu.vector_store %arg18[%c0_22, %c0_23, %c0_24], %73 {strides = array<i32>} : memref<8x8x32xf32, #tpu.memory_space<vmem>>, vector<8x1x16xf32>,
    %c0_25 = arith.constant 0 : index
    %c7 = arith.constant 7 : index
    %c16 = arith.constant 16 : index
    %74 = vector.load %arg18[%c0_25, %c7, %c16] : memref<8x8x32xf32, #tpu.memory_space<vmem>>, vector<8x1x16xf32>
    %75 = vector.shape_cast %74 : vector<8x1x16xf32> to vector<8x16xf32>
    %76 = vector.shape_cast %70 : vector<8x16xf32> to vector<8x1x16xf32>
    tpu.vector_store %arg18[%c0_25, %c7, %c16], %76 {strides = array<i32>} : memref<8x8x32xf32, #tpu.memory_space<vmem>>, vector<8x1x16xf32>,
    %77 = tpu.concatenate %62, %70 in 1 : vector<8x16xf32>, vector<8x16xf32> -> vector<8x32xf32>
    %cst_26 = arith.constant dense<0.000000e+00> : vector<8x96xf32>
    %78 = tpu.matmul %77, %4, %cst_26 {dimension_numbers = #tpu.dot_dimension_numbers<[1], [0], [0], [1], [0, 0, 1, 1], [], []>} : vector<8x32xf32>, vector<32x96xf32>, vector<8x96xf32> -> vector<8x96xf32>
    %79 = vector.extract_strided_slice %12 {offsets = [1, 0, 0], sizes = [1, 8, 48], strides = [1, 1, 1]} : vector<8x8x96xf32> to vector<1x8x48xf32>
    %80 = vector.shape_cast %79 : vector<1x8x48xf32> to vector<8x48xf32>
    %81 = vector.extract_strided_slice %12 {offsets = [6, 0, 48], sizes = [1, 8, 48], strides = [1, 1, 1]} : vector<8x8x96xf32> to vector<1x8x48xf32>
    %82 = vector.shape_cast %81 : vector<1x8x48xf32> to vector<8x48xf32>
    %83 = vector.extract_strided_slice %78 {offsets = [0, 0], sizes = [8, 48], strides = [1, 1]} : vector<8x96xf32> to vector<8x48xf32>
    %84 = vector.extract_strided_slice %78 {offsets = [0, 48], sizes = [8, 48], strides = [1, 1]} : vector<8x96xf32> to vector<8x48xf32>
    %85 = vector.extract_strided_slice %80 {offsets = [0, 0], sizes = [8, 32], strides = [1, 1]} : vector<8x48xf32> to vector<8x32xf32>
    %86 = vector.extract_strided_slice %83 {offsets = [0, 0], sizes = [8, 32], strides = [1, 1]} : vector<8x48xf32> to vector<8x32xf32>
    %87 = arith.addf %85, %86 : vector<8x32xf32>
    %88 = arith.negf %87 : vector<8x32xf32>
    %89 = math.exp %88 : vector<8x32xf32>
    %cst_27 = arith.constant 1.000000e+00 : f32
    %90 = vector.broadcast %cst_27 : f32 to vector<8x32xf32>
    %91 = arith.addf %90, %89 : vector<8x32xf32>
    %92 = arith.divf %90, %91 : vector<8x32xf32>
    %93 = vector.extract_strided_slice %82 {offsets = [0, 0], sizes = [8, 32], strides = [1, 1]} : vector<8x48xf32> to vector<8x32xf32>
    %94 = vector.extract_strided_slice %84 {offsets = [0, 0], sizes = [8, 32], strides = [1, 1]} : vector<8x48xf32> to vector<8x32xf32>
    %95 = arith.addf %93, %94 : vector<8x32xf32>
    %96 = arith.negf %95 : vector<8x32xf32>
    %97 = math.exp %96 : vector<8x32xf32>
    %cst_28 = arith.constant 1.000000e+00 : f32
    %98 = vector.broadcast %cst_28 : f32 to vector<8x32xf32>
    %99 = arith.addf %98, %97 : vector<8x32xf32>
    %100 = arith.divf %98, %99 : vector<8x32xf32>
    %101 = vector.extract_strided_slice %80 {offsets = [0, 32], sizes = [8, 16], strides = [1, 1]} : vector<8x48xf32> to vector<8x16xf32>
    %102 = vector.extract_strided_slice %92 {offsets = [0, 0], sizes = [8, 16], strides = [1, 1]} : vector<8x32xf32> to vector<8x16xf32>
    %103 = vector.extract_strided_slice %83 {offsets = [0, 32], sizes = [8, 16], strides = [1, 1]} : vector<8x48xf32> to vector<8x16xf32>
    %104 = vector.extract_strided_slice %14 {offsets = [0, 0], sizes = [8, 16], strides = [1, 1]} : vector<8x32xf32> to vector<8x16xf32>
    %105 = arith.addf %103, %104 : vector<8x16xf32>
    %106 = arith.mulf %102, %105 : vector<8x16xf32>
    %107 = arith.addf %101, %106 : vector<8x16xf32>
    %108 = math.tanh %107 : vector<8x16xf32>
    %109 = vector.extract_strided_slice %82 {offsets = [0, 32], sizes = [8, 16], strides = [1, 1]} : vector<8x48xf32> to vector<8x16xf32>
    %110 = vector.extract_strided_slice %100 {offsets = [0, 0], sizes = [8, 16], strides = [1, 1]} : vector<8x32xf32> to vector<8x16xf32>
    %111 = vector.extract_strided_slice %84 {offsets = [0, 32], sizes = [8, 16], strides = [1, 1]} : vector<8x48xf32> to vector<8x16xf32>
    %112 = vector.extract_strided_slice %14 {offsets = [0, 16], sizes = [8, 16], strides = [1, 1]} : vector<8x32xf32> to vector<8x16xf32>
    %113 = arith.addf %111, %112 : vector<8x16xf32>
    %114 = arith.mulf %110, %113 : vector<8x16xf32>
    %115 = arith.addf %109, %114 : vector<8x16xf32>
    %116 = math.tanh %115 : vector<8x16xf32>
    %117 = vector.extract_strided_slice %92 {offsets = [0, 16], sizes = [8, 16], strides = [1, 1]} : vector<8x32xf32> to vector<8x16xf32>
    %cst_29 = arith.constant 1.000000e+00 : f32
    %118 = vector.broadcast %cst_29 : f32 to vector<8x16xf32>
    %119 = arith.subf %118, %117 : vector<8x16xf32>
    %120 = arith.mulf %119, %108 : vector<8x16xf32>
    %121 = vector.extract_strided_slice %92 {offsets = [0, 16], sizes = [8, 16], strides = [1, 1]} : vector<8x32xf32> to vector<8x16xf32>
    %122 = vector.extract_strided_slice %77 {offsets = [0, 0], sizes = [8, 16], strides = [1, 1]} : vector<8x32xf32> to vector<8x16xf32>
    %123 = arith.mulf %121, %122 : vector<8x16xf32>
    %124 = arith.addf %120, %123 : vector<8x16xf32>
    %125 = vector.extract_strided_slice %100 {offsets = [0, 16], sizes = [8, 16], strides = [1, 1]} : vector<8x32xf32> to vector<8x16xf32>
    %cst_30 = arith.constant 1.000000e+00 : f32
    %126 = vector.broadcast %cst_30 : f32 to vector<8x16xf32>
    %127 = arith.subf %126, %125 : vector<8x16xf32>
    %128 = arith.mulf %127, %116 : vector<8x16xf32>
    %129 = vector.extract_strided_slice %100 {offsets = [0, 16], sizes = [8, 16], strides = [1, 1]} : vector<8x32xf32> to vector<8x16xf32>
    %130 = vector.extract_strided_slice %77 {offsets = [0, 16], sizes = [8, 16], strides = [1, 1]} : vector<8x32xf32> to vector<8x16xf32>
    %131 = arith.mulf %129, %130 : vector<8x16xf32>
    %132 = arith.addf %128, %131 : vector<8x16xf32>
    %c0_31 = arith.constant 0 : index
    %c1 = arith.constant 1 : index
    %c0_32 = arith.constant 0 : index
    %133 = vector.load %arg18[%c0_31, %c1, %c0_32] : memref<8x8x32xf32, #tpu.memory_space<vmem>>, vector<8x1x16xf32>
    %134 = vector.shape_cast %133 : vector<8x1x16xf32> to vector<8x16xf32>
    %135 = vector.shape_cast %124 : vector<8x16xf32> to vector<8x1x16xf32>
    tpu.vector_store %arg18[%c0_31, %c1, %c0_32], %135 {strides = array<i32>} : memref<8x8x32xf32, #tpu.memory_space<vmem>>, vector<8x1x16xf32>,
    %c0_33 = arith.constant 0 : index
    %c6 = arith.constant 6 : index
    %c16_34 = arith.constant 16 : index
    %136 = vector.load %arg18[%c0_33, %c6, %c16_34] : memref<8x8x32xf32, #tpu.memory_space<vmem>>, vector<8x1x16xf32>
    %137 = vector.shape_cast %136 : vector<8x1x16xf32> to vector<8x16xf32>
    %138 = vector.shape_cast %132 : vector<8x16xf32> to vector<8x1x16xf32>
    tpu.vector_store %arg18[%c0_33, %c6, %c16_34], %138 {strides = array<i32>} : memref<8x8x32xf32, #tpu.memory_space<vmem>>, vector<8x1x16xf32>,
    %139 = tpu.concatenate %124, %132 in 1 : vector<8x16xf32>, vector<8x16xf32> -> vector<8x32xf32>
    %cst_35 = arith.constant dense<0.000000e+00> : vector<8x96xf32>
    %140 = tpu.matmul %139, %4, %cst_35 {dimension_numbers = #tpu.dot_dimension_numbers<[1], [0], [0], [1], [0, 0, 1, 1], [], []>} : vector<8x32xf32>, vector<32x96xf32>, vector<8x96xf32> -> vector<8x96xf32>
    %141 = vector.extract_strided_slice %12 {offsets = [2, 0, 0], sizes = [1, 8, 48], strides = [1, 1, 1]} : vector<8x8x96xf32> to vector<1x8x48xf32>
    %142 = vector.shape_cast %141 : vector<1x8x48xf32> to vector<8x48xf32>
    %143 = vector.extract_strided_slice %12 {offsets = [5, 0, 48], sizes = [1, 8, 48], strides = [1, 1, 1]} : vector<8x8x96xf32> to vector<1x8x48xf32>
    %144 = vector.shape_cast %143 : vector<1x8x48xf32> to vector<8x48xf32>
    %145 = vector.extract_strided_slice %140 {offsets = [0, 0], sizes = [8, 48], strides = [1, 1]} : vector<8x96xf32> to vector<8x48xf32>
    %146 = vector.extract_strided_slice %140 {offsets = [0, 48], sizes = [8, 48], strides = [1, 1]} : vector<8x96xf32> to vector<8x48xf32>
    %147 = vector.extract_strided_slice %142 {offsets = [0, 0], sizes = [8, 32], strides = [1, 1]} : vector<8x48xf32> to vector<8x32xf32>
    %148 = vector.extract_strided_slice %145 {offsets = [0, 0], sizes = [8, 32], strides = [1, 1]} : vector<8x48xf32> to vector<8x32xf32>
    %149 = arith.addf %147, %148 : vector<8x32xf32>
    %150 = arith.negf %149 : vector<8x32xf32>
    %151 = math.exp %150 : vector<8x32xf32>
    %cst_36 = arith.constant 1.000000e+00 : f32
    %152 = vector.broadcast %cst_36 : f32 to vector<8x32xf32>
    %153 = arith.addf %152, %151 : vector<8x32xf32>
    %154 = arith.divf %152, %153 : vector<8x32xf32>
    %155 = vector.extract_strided_slice %144 {offsets = [0, 0], sizes = [8, 32], strides = [1, 1]} : vector<8x48xf32> to vector<8x32xf32>
    %156 = vector.extract_strided_slice %146 {offsets = [0, 0], sizes = [8, 32], strides = [1, 1]} : vector<8x48xf32> to vector<8x32xf32>
    %157 = arith.addf %155, %156 : vector<8x32xf32>
    %158 = arith.negf %157 : vector<8x32xf32>
    %159 = math.exp %158 : vector<8x32xf32>
    %cst_37 = arith.constant 1.000000e+00 : f32
    %160 = vector.broadcast %cst_37 : f32 to vector<8x32xf32>
    %161 = arith.addf %160, %159 : vector<8x32xf32>
    %162 = arith.divf %160, %161 : vector<8x32xf32>
    %163 = vector.extract_strided_slice %142 {offsets = [0, 32], sizes = [8, 16], strides = [1, 1]} : vector<8x48xf32> to vector<8x16xf32>
    %164 = vector.extract_strided_slice %154 {offsets = [0, 0], sizes = [8, 16], strides = [1, 1]} : vector<8x32xf32> to vector<8x16xf32>
    %165 = vector.extract_strided_slice %145 {offsets = [0, 32], sizes = [8, 16], strides = [1, 1]} : vector<8x48xf32> to vector<8x16xf32>
    %166 = vector.extract_strided_slice %14 {offsets = [0, 0], sizes = [8, 16], strides = [1, 1]} : vector<8x32xf32> to vector<8x16xf32>
    %167 = arith.addf %165, %166 : vector<8x16xf32>
    %168 = arith.mulf %164, %167 : vector<8x16xf32>
    %169 = arith.addf %163, %168 : vector<8x16xf32>
    %170 = math.tanh %169 : vector<8x16xf32>
    %171 = vector.extract_strided_slice %144 {offsets = [0, 32], sizes = [8, 16], strides = [1, 1]} : vector<8x48xf32> to vector<8x16xf32>
    %172 = vector.extract_strided_slice %162 {offsets = [0, 0], sizes = [8, 16], strides = [1, 1]} : vector<8x32xf32> to vector<8x16xf32>
    %173 = vector.extract_strided_slice %146 {offsets = [0, 32], sizes = [8, 16], strides = [1, 1]} : vector<8x48xf32> to vector<8x16xf32>
    %174 = vector.extract_strided_slice %14 {offsets = [0, 16], sizes = [8, 16], strides = [1, 1]} : vector<8x32xf32> to vector<8x16xf32>
    %175 = arith.addf %173, %174 : vector<8x16xf32>
    %176 = arith.mulf %172, %175 : vector<8x16xf32>
    %177 = arith.addf %171, %176 : vector<8x16xf32>
    %178 = math.tanh %177 : vector<8x16xf32>
    %179 = vector.extract_strided_slice %154 {offsets = [0, 16], sizes = [8, 16], strides = [1, 1]} : vector<8x32xf32> to vector<8x16xf32>
    %cst_38 = arith.constant 1.000000e+00 : f32
    %180 = vector.broadcast %cst_38 : f32 to vector<8x16xf32>
    %181 = arith.subf %180, %179 : vector<8x16xf32>
    %182 = arith.mulf %181, %170 : vector<8x16xf32>
    %183 = vector.extract_strided_slice %154 {offsets = [0, 16], sizes = [8, 16], strides = [1, 1]} : vector<8x32xf32> to vector<8x16xf32>
    %184 = vector.extract_strided_slice %139 {offsets = [0, 0], sizes = [8, 16], strides = [1, 1]} : vector<8x32xf32> to vector<8x16xf32>
    %185 = arith.mulf %183, %184 : vector<8x16xf32>
    %186 = arith.addf %182, %185 : vector<8x16xf32>
    %187 = vector.extract_strided_slice %162 {offsets = [0, 16], sizes = [8, 16], strides = [1, 1]} : vector<8x32xf32> to vector<8x16xf32>
    %cst_39 = arith.constant 1.000000e+00 : f32
    %188 = vector.broadcast %cst_39 : f32 to vector<8x16xf32>
    %189 = arith.subf %188, %187 : vector<8x16xf32>
    %190 = arith.mulf %189, %178 : vector<8x16xf32>
    %191 = vector.extract_strided_slice %162 {offsets = [0, 16], sizes = [8, 16], strides = [1, 1]} : vector<8x32xf32> to vector<8x16xf32>
    %192 = vector.extract_strided_slice %139 {offsets = [0, 16], sizes = [8, 16], strides = [1, 1]} : vector<8x32xf32> to vector<8x16xf32>
    %193 = arith.mulf %191, %192 : vector<8x16xf32>
    %194 = arith.addf %190, %193 : vector<8x16xf32>
    %c0_40 = arith.constant 0 : index
    %c2 = arith.constant 2 : index
    %c0_41 = arith.constant 0 : index
    %195 = vector.load %arg18[%c0_40, %c2, %c0_41] : memref<8x8x32xf32, #tpu.memory_space<vmem>>, vector<8x1x16xf32>
    %196 = vector.shape_cast %195 : vector<8x1x16xf32> to vector<8x16xf32>
    %197 = vector.shape_cast %186 : vector<8x16xf32> to vector<8x1x16xf32>
    tpu.vector_store %arg18[%c0_40, %c2, %c0_41], %197 {strides = array<i32>} : memref<8x8x32xf32, #tpu.memory_space<vmem>>, vector<8x1x16xf32>,
    %c0_42 = arith.constant 0 : index
    %c5 = arith.constant 5 : index
    %c16_43 = arith.constant 16 : index
    %198 = vector.load %arg18[%c0_42, %c5, %c16_43] : memref<8x8x32xf32, #tpu.memory_space<vmem>>, vector<8x1x16xf32>
    %199 = vector.shape_cast %198 : vector<8x1x16xf32> to vector<8x16xf32>
    %200 = vector.shape_cast %194 : vector<8x16xf32> to vector<8x1x16xf32>
    tpu.vector_store %arg18[%c0_42, %c5, %c16_43], %200 {strides = array<i32>} : memref<8x8x32xf32, #tpu.memory_space<vmem>>, vector<8x1x16xf32>,
    %201 = tpu.concatenate %186, %194 in 1 : vector<8x16xf32>, vector<8x16xf32> -> vector<8x32xf32>
    %cst_44 = arith.constant dense<0.000000e+00> : vector<8x96xf32>
    %202 = tpu.matmul %201, %4, %cst_44 {dimension_numbers = #tpu.dot_dimension_numbers<[1], [0], [0], [1], [0, 0, 1, 1], [], []>} : vector<8x32xf32>, vector<32x96xf32>, vector<8x96xf32> -> vector<8x96xf32>
    %203 = vector.extract_strided_slice %12 {offsets = [3, 0, 0], sizes = [1, 8, 48], strides = [1, 1, 1]} : vector<8x8x96xf32> to vector<1x8x48xf32>
    %204 = vector.shape_cast %203 : vector<1x8x48xf32> to vector<8x48xf32>
    %205 = vector.extract_strided_slice %12 {offsets = [4, 0, 48], sizes = [1, 8, 48], strides = [1, 1, 1]} : vector<8x8x96xf32> to vector<1x8x48xf32>
    %206 = vector.shape_cast %205 : vector<1x8x48xf32> to vector<8x48xf32>
    %207 = vector.extract_strided_slice %202 {offsets = [0, 0], sizes = [8, 48], strides = [1, 1]} : vector<8x96xf32> to vector<8x48xf32>
    %208 = vector.extract_strided_slice %202 {offsets = [0, 48], sizes = [8, 48], strides = [1, 1]} : vector<8x96xf32> to vector<8x48xf32>
    %209 = vector.extract_strided_slice %204 {offsets = [0, 0], sizes = [8, 32], strides = [1, 1]} : vector<8x48xf32> to vector<8x32xf32>
    %210 = vector.extract_strided_slice %207 {offsets = [0, 0], sizes = [8, 32], strides = [1, 1]} : vector<8x48xf32> to vector<8x32xf32>
    %211 = arith.addf %209, %210 : vector<8x32xf32>
    %212 = arith.negf %211 : vector<8x32xf32>
    %213 = math.exp %212 : vector<8x32xf32>
    %cst_45 = arith.constant 1.000000e+00 : f32
    %214 = vector.broadcast %cst_45 : f32 to vector<8x32xf32>
    %215 = arith.addf %214, %213 : vector<8x32xf32>
    %216 = arith.divf %214, %215 : vector<8x32xf32>
    %217 = vector.extract_strided_slice %206 {offsets = [0, 0], sizes = [8, 32], strides = [1, 1]} : vector<8x48xf32> to vector<8x32xf32>
    %218 = vector.extract_strided_slice %208 {offsets = [0, 0], sizes = [8, 32], strides = [1, 1]} : vector<8x48xf32> to vector<8x32xf32>
    %219 = arith.addf %217, %218 : vector<8x32xf32>
    %220 = arith.negf %219 : vector<8x32xf32>
    %221 = math.exp %220 : vector<8x32xf32>
    %cst_46 = arith.constant 1.000000e+00 : f32
    %222 = vector.broadcast %cst_46 : f32 to vector<8x32xf32>
    %223 = arith.addf %222, %221 : vector<8x32xf32>
    %224 = arith.divf %222, %223 : vector<8x32xf32>
    %225 = vector.extract_strided_slice %204 {offsets = [0, 32], sizes = [8, 16], strides = [1, 1]} : vector<8x48xf32> to vector<8x16xf32>
    %226 = vector.extract_strided_slice %216 {offsets = [0, 0], sizes = [8, 16], strides = [1, 1]} : vector<8x32xf32> to vector<8x16xf32>
    %227 = vector.extract_strided_slice %207 {offsets = [0, 32], sizes = [8, 16], strides = [1, 1]} : vector<8x48xf32> to vector<8x16xf32>
    %228 = vector.extract_strided_slice %14 {offsets = [0, 0], sizes = [8, 16], strides = [1, 1]} : vector<8x32xf32> to vector<8x16xf32>
    %229 = arith.addf %227, %228 : vector<8x16xf32>
    %230 = arith.mulf %226, %229 : vector<8x16xf32>
    %231 = arith.addf %225, %230 : vector<8x16xf32>
    %232 = math.tanh %231 : vector<8x16xf32>
    %233 = vector.extract_strided_slice %206 {offsets = [0, 32], sizes = [8, 16], strides = [1, 1]} : vector<8x48xf32> to vector<8x16xf32>
    %234 = vector.extract_strided_slice %224 {offsets = [0, 0], sizes = [8, 16], strides = [1, 1]} : vector<8x32xf32> to vector<8x16xf32>
    %235 = vector.extract_strided_slice %208 {offsets = [0, 32], sizes = [8, 16], strides = [1, 1]} : vector<8x48xf32> to vector<8x16xf32>
    %236 = vector.extract_strided_slice %14 {offsets = [0, 16], sizes = [8, 16], strides = [1, 1]} : vector<8x32xf32> to vector<8x16xf32>
    %237 = arith.addf %235, %236 : vector<8x16xf32>
    %238 = arith.mulf %234, %237 : vector<8x16xf32>
    %239 = arith.addf %233, %238 : vector<8x16xf32>
    %240 = math.tanh %239 : vector<8x16xf32>
    %241 = vector.extract_strided_slice %216 {offsets = [0, 16], sizes = [8, 16], strides = [1, 1]} : vector<8x32xf32> to vector<8x16xf32>
    %cst_47 = arith.constant 1.000000e+00 : f32
    %242 = vector.broadcast %cst_47 : f32 to vector<8x16xf32>
    %243 = arith.subf %242, %241 : vector<8x16xf32>
    %244 = arith.mulf %243, %232 : vector<8x16xf32>
    %245 = vector.extract_strided_slice %216 {offsets = [0, 16], sizes = [8, 16], strides = [1, 1]} : vector<8x32xf32> to vector<8x16xf32>
    %246 = vector.extract_strided_slice %201 {offsets = [0, 0], sizes = [8, 16], strides = [1, 1]} : vector<8x32xf32> to vector<8x16xf32>
    %247 = arith.mulf %245, %246 : vector<8x16xf32>
    %248 = arith.addf %244, %247 : vector<8x16xf32>
    %249 = vector.extract_strided_slice %224 {offsets = [0, 16], sizes = [8, 16], strides = [1, 1]} : vector<8x32xf32> to vector<8x16xf32>
    %cst_48 = arith.constant 1.000000e+00 : f32
    %250 = vector.broadcast %cst_48 : f32 to vector<8x16xf32>
    %251 = arith.subf %250, %249 : vector<8x16xf32>
    %252 = arith.mulf %251, %240 : vector<8x16xf32>
    %253 = vector.extract_strided_slice %224 {offsets = [0, 16], sizes = [8, 16], strides = [1, 1]} : vector<8x32xf32> to vector<8x16xf32>
    %254 = vector.extract_strided_slice %201 {offsets = [0, 16], sizes = [8, 16], strides = [1, 1]} : vector<8x32xf32> to vector<8x16xf32>
    %255 = arith.mulf %253, %254 : vector<8x16xf32>
    %256 = arith.addf %252, %255 : vector<8x16xf32>
    %c0_49 = arith.constant 0 : index
    %c3 = arith.constant 3 : index
    %c0_50 = arith.constant 0 : index
    %257 = vector.load %arg18[%c0_49, %c3, %c0_50] : memref<8x8x32xf32, #tpu.memory_space<vmem>>, vector<8x1x16xf32>
    %258 = vector.shape_cast %257 : vector<8x1x16xf32> to vector<8x16xf32>
    %259 = vector.shape_cast %248 : vector<8x16xf32> to vector<8x1x16xf32>
    tpu.vector_store %arg18[%c0_49, %c3, %c0_50], %259 {strides = array<i32>} : memref<8x8x32xf32, #tpu.memory_space<vmem>>, vector<8x1x16xf32>,
    %c0_51 = arith.constant 0 : index
    %c4 = arith.constant 4 : index
    %c16_52 = arith.constant 16 : index
    %260 = vector.load %arg18[%c0_51, %c4, %c16_52] : memref<8x8x32xf32, #tpu.memory_space<vmem>>, vector<8x1x16xf32>
    %261 = vector.shape_cast %260 : vector<8x1x16xf32> to vector<8x16xf32>
    %262 = vector.shape_cast %256 : vector<8x16xf32> to vector<8x1x16xf32>
    tpu.vector_store %arg18[%c0_51, %c4, %c16_52], %262 {strides = array<i32>} : memref<8x8x32xf32, #tpu.memory_space<vmem>>, vector<8x1x16xf32>,
    %263 = tpu.concatenate %248, %256 in 1 : vector<8x16xf32>, vector<8x16xf32> -> vector<8x32xf32>
    %cst_53 = arith.constant dense<0.000000e+00> : vector<8x96xf32>
    %264 = tpu.matmul %263, %4, %cst_53 {dimension_numbers = #tpu.dot_dimension_numbers<[1], [0], [0], [1], [0, 0, 1, 1], [], []>} : vector<8x32xf32>, vector<32x96xf32>, vector<8x96xf32> -> vector<8x96xf32>
    %265 = vector.extract_strided_slice %12 {offsets = [4, 0, 0], sizes = [1, 8, 48], strides = [1, 1, 1]} : vector<8x8x96xf32> to vector<1x8x48xf32>
    %266 = vector.shape_cast %265 : vector<1x8x48xf32> to vector<8x48xf32>
    %267 = vector.extract_strided_slice %12 {offsets = [3, 0, 48], sizes = [1, 8, 48], strides = [1, 1, 1]} : vector<8x8x96xf32> to vector<1x8x48xf32>
    %268 = vector.shape_cast %267 : vector<1x8x48xf32> to vector<8x48xf32>
    %269 = vector.extract_strided_slice %264 {offsets = [0, 0], sizes = [8, 48], strides = [1, 1]} : vector<8x96xf32> to vector<8x48xf32>
    %270 = vector.extract_strided_slice %264 {offsets = [0, 48], sizes = [8, 48], strides = [1, 1]} : vector<8x96xf32> to vector<8x48xf32>
    %271 = vector.extract_strided_slice %266 {offsets = [0, 0], sizes = [8, 32], strides = [1, 1]} : vector<8x48xf32> to vector<8x32xf32>
    %272 = vector.extract_strided_slice %269 {offsets = [0, 0], sizes = [8, 32], strides = [1, 1]} : vector<8x48xf32> to vector<8x32xf32>
    %273 = arith.addf %271, %272 : vector<8x32xf32>
    %274 = arith.negf %273 : vector<8x32xf32>
    %275 = math.exp %274 : vector<8x32xf32>
    %cst_54 = arith.constant 1.000000e+00 : f32
    %276 = vector.broadcast %cst_54 : f32 to vector<8x32xf32>
    %277 = arith.addf %276, %275 : vector<8x32xf32>
    %278 = arith.divf %276, %277 : vector<8x32xf32>
    %279 = vector.extract_strided_slice %268 {offsets = [0, 0], sizes = [8, 32], strides = [1, 1]} : vector<8x48xf32> to vector<8x32xf32>
    %280 = vector.extract_strided_slice %270 {offsets = [0, 0], sizes = [8, 32], strides = [1, 1]} : vector<8x48xf32> to vector<8x32xf32>
    %281 = arith.addf %279, %280 : vector<8x32xf32>
    %282 = arith.negf %281 : vector<8x32xf32>
    %283 = math.exp %282 : vector<8x32xf32>
    %cst_55 = arith.constant 1.000000e+00 : f32
    %284 = vector.broadcast %cst_55 : f32 to vector<8x32xf32>
    %285 = arith.addf %284, %283 : vector<8x32xf32>
    %286 = arith.divf %284, %285 : vector<8x32xf32>
    %287 = vector.extract_strided_slice %266 {offsets = [0, 32], sizes = [8, 16], strides = [1, 1]} : vector<8x48xf32> to vector<8x16xf32>
    %288 = vector.extract_strided_slice %278 {offsets = [0, 0], sizes = [8, 16], strides = [1, 1]} : vector<8x32xf32> to vector<8x16xf32>
    %289 = vector.extract_strided_slice %269 {offsets = [0, 32], sizes = [8, 16], strides = [1, 1]} : vector<8x48xf32> to vector<8x16xf32>
    %290 = vector.extract_strided_slice %14 {offsets = [0, 0], sizes = [8, 16], strides = [1, 1]} : vector<8x32xf32> to vector<8x16xf32>
    %291 = arith.addf %289, %290 : vector<8x16xf32>
    %292 = arith.mulf %288, %291 : vector<8x16xf32>
    %293 = arith.addf %287, %292 : vector<8x16xf32>
    %294 = math.tanh %293 : vector<8x16xf32>
    %295 = vector.extract_strided_slice %268 {offsets = [0, 32], sizes = [8, 16], strides = [1, 1]} : vector<8x48xf32> to vector<8x16xf32>
    %296 = vector.extract_strided_slice %286 {offsets = [0, 0], sizes = [8, 16], strides = [1, 1]} : vector<8x32xf32> to vector<8x16xf32>
    %297 = vector.extract_strided_slice %270 {offsets = [0, 32], sizes = [8, 16], strides = [1, 1]} : vector<8x48xf32> to vector<8x16xf32>
    %298 = vector.extract_strided_slice %14 {offsets = [0, 16], sizes = [8, 16], strides = [1, 1]} : vector<8x32xf32> to vector<8x16xf32>
    %299 = arith.addf %297, %298 : vector<8x16xf32>
    %300 = arith.mulf %296, %299 : vector<8x16xf32>
    %301 = arith.addf %295, %300 : vector<8x16xf32>
    %302 = math.tanh %301 : vector<8x16xf32>
    %303 = vector.extract_strided_slice %278 {offsets = [0, 16], sizes = [8, 16], strides = [1, 1]} : vector<8x32xf32> to vector<8x16xf32>
    %cst_56 = arith.constant 1.000000e+00 : f32
    %304 = vector.broadcast %cst_56 : f32 to vector<8x16xf32>
    %305 = arith.subf %304, %303 : vector<8x16xf32>
    %306 = arith.mulf %305, %294 : vector<8x16xf32>
    %307 = vector.extract_strided_slice %278 {offsets = [0, 16], sizes = [8, 16], strides = [1, 1]} : vector<8x32xf32> to vector<8x16xf32>
    %308 = vector.extract_strided_slice %263 {offsets = [0, 0], sizes = [8, 16], strides = [1, 1]} : vector<8x32xf32> to vector<8x16xf32>
    %309 = arith.mulf %307, %308 : vector<8x16xf32>
    %310 = arith.addf %306, %309 : vector<8x16xf32>
    %311 = vector.extract_strided_slice %286 {offsets = [0, 16], sizes = [8, 16], strides = [1, 1]} : vector<8x32xf32> to vector<8x16xf32>
    %cst_57 = arith.constant 1.000000e+00 : f32
    %312 = vector.broadcast %cst_57 : f32 to vector<8x16xf32>
    %313 = arith.subf %312, %311 : vector<8x16xf32>
    %314 = arith.mulf %313, %302 : vector<8x16xf32>
    %315 = vector.extract_strided_slice %286 {offsets = [0, 16], sizes = [8, 16], strides = [1, 1]} : vector<8x32xf32> to vector<8x16xf32>
    %316 = vector.extract_strided_slice %263 {offsets = [0, 16], sizes = [8, 16], strides = [1, 1]} : vector<8x32xf32> to vector<8x16xf32>
    %317 = arith.mulf %315, %316 : vector<8x16xf32>
    %318 = arith.addf %314, %317 : vector<8x16xf32>
    %c0_58 = arith.constant 0 : index
    %c4_59 = arith.constant 4 : index
    %c0_60 = arith.constant 0 : index
    %319 = vector.load %arg18[%c0_58, %c4_59, %c0_60] : memref<8x8x32xf32, #tpu.memory_space<vmem>>, vector<8x1x16xf32>
    %320 = vector.shape_cast %319 : vector<8x1x16xf32> to vector<8x16xf32>
    %321 = vector.shape_cast %310 : vector<8x16xf32> to vector<8x1x16xf32>
    tpu.vector_store %arg18[%c0_58, %c4_59, %c0_60], %321 {strides = array<i32>} : memref<8x8x32xf32, #tpu.memory_space<vmem>>, vector<8x1x16xf32>,
    %c0_61 = arith.constant 0 : index
    %c3_62 = arith.constant 3 : index
    %c16_63 = arith.constant 16 : index
    %322 = vector.load %arg18[%c0_61, %c3_62, %c16_63] : memref<8x8x32xf32, #tpu.memory_space<vmem>>, vector<8x1x16xf32>
    %323 = vector.shape_cast %322 : vector<8x1x16xf32> to vector<8x16xf32>
    %324 = vector.shape_cast %318 : vector<8x16xf32> to vector<8x1x16xf32>
    tpu.vector_store %arg18[%c0_61, %c3_62, %c16_63], %324 {strides = array<i32>} : memref<8x8x32xf32, #tpu.memory_space<vmem>>, vector<8x1x16xf32>,
    %325 = tpu.concatenate %310, %318 in 1 : vector<8x16xf32>, vector<8x16xf32> -> vector<8x32xf32>
    %cst_64 = arith.constant dense<0.000000e+00> : vector<8x96xf32>
    %326 = tpu.matmul %325, %4, %cst_64 {dimension_numbers = #tpu.dot_dimension_numbers<[1], [0], [0], [1], [0, 0, 1, 1], [], []>} : vector<8x32xf32>, vector<32x96xf32>, vector<8x96xf32> -> vector<8x96xf32>
    %327 = vector.extract_strided_slice %12 {offsets = [5, 0, 0], sizes = [1, 8, 48], strides = [1, 1, 1]} : vector<8x8x96xf32> to vector<1x8x48xf32>
    %328 = vector.shape_cast %327 : vector<1x8x48xf32> to vector<8x48xf32>
    %329 = vector.extract_strided_slice %12 {offsets = [2, 0, 48], sizes = [1, 8, 48], strides = [1, 1, 1]} : vector<8x8x96xf32> to vector<1x8x48xf32>
    %330 = vector.shape_cast %329 : vector<1x8x48xf32> to vector<8x48xf32>
    %331 = vector.extract_strided_slice %326 {offsets = [0, 0], sizes = [8, 48], strides = [1, 1]} : vector<8x96xf32> to vector<8x48xf32>
    %332 = vector.extract_strided_slice %326 {offsets = [0, 48], sizes = [8, 48], strides = [1, 1]} : vector<8x96xf32> to vector<8x48xf32>
    %333 = vector.extract_strided_slice %328 {offsets = [0, 0], sizes = [8, 32], strides = [1, 1]} : vector<8x48xf32> to vector<8x32xf32>
    %334 = vector.extract_strided_slice %331 {offsets = [0, 0], sizes = [8, 32], strides = [1, 1]} : vector<8x48xf32> to vector<8x32xf32>
    %335 = arith.addf %333, %334 : vector<8x32xf32>
    %336 = arith.negf %335 : vector<8x32xf32>
    %337 = math.exp %336 : vector<8x32xf32>
    %cst_65 = arith.constant 1.000000e+00 : f32
    %338 = vector.broadcast %cst_65 : f32 to vector<8x32xf32>
    %339 = arith.addf %338, %337 : vector<8x32xf32>
    %340 = arith.divf %338, %339 : vector<8x32xf32>
    %341 = vector.extract_strided_slice %330 {offsets = [0, 0], sizes = [8, 32], strides = [1, 1]} : vector<8x48xf32> to vector<8x32xf32>
    %342 = vector.extract_strided_slice %332 {offsets = [0, 0], sizes = [8, 32], strides = [1, 1]} : vector<8x48xf32> to vector<8x32xf32>
    %343 = arith.addf %341, %342 : vector<8x32xf32>
    %344 = arith.negf %343 : vector<8x32xf32>
    %345 = math.exp %344 : vector<8x32xf32>
    %cst_66 = arith.constant 1.000000e+00 : f32
    %346 = vector.broadcast %cst_66 : f32 to vector<8x32xf32>
    %347 = arith.addf %346, %345 : vector<8x32xf32>
    %348 = arith.divf %346, %347 : vector<8x32xf32>
    %349 = vector.extract_strided_slice %328 {offsets = [0, 32], sizes = [8, 16], strides = [1, 1]} : vector<8x48xf32> to vector<8x16xf32>
    %350 = vector.extract_strided_slice %340 {offsets = [0, 0], sizes = [8, 16], strides = [1, 1]} : vector<8x32xf32> to vector<8x16xf32>
    %351 = vector.extract_strided_slice %331 {offsets = [0, 32], sizes = [8, 16], strides = [1, 1]} : vector<8x48xf32> to vector<8x16xf32>
    %352 = vector.extract_strided_slice %14 {offsets = [0, 0], sizes = [8, 16], strides = [1, 1]} : vector<8x32xf32> to vector<8x16xf32>
    %353 = arith.addf %351, %352 : vector<8x16xf32>
    %354 = arith.mulf %350, %353 : vector<8x16xf32>
    %355 = arith.addf %349, %354 : vector<8x16xf32>
    %356 = math.tanh %355 : vector<8x16xf32>
    %357 = vector.extract_strided_slice %330 {offsets = [0, 32], sizes = [8, 16], strides = [1, 1]} : vector<8x48xf32> to vector<8x16xf32>
    %358 = vector.extract_strided_slice %348 {offsets = [0, 0], sizes = [8, 16], strides = [1, 1]} : vector<8x32xf32> to vector<8x16xf32>
    %359 = vector.extract_strided_slice %332 {offsets = [0, 32], sizes = [8, 16], strides = [1, 1]} : vector<8x48xf32> to vector<8x16xf32>
    %360 = vector.extract_strided_slice %14 {offsets = [0, 16], sizes = [8, 16], strides = [1, 1]} : vector<8x32xf32> to vector<8x16xf32>
    %361 = arith.addf %359, %360 : vector<8x16xf32>
    %362 = arith.mulf %358, %361 : vector<8x16xf32>
    %363 = arith.addf %357, %362 : vector<8x16xf32>
    %364 = math.tanh %363 : vector<8x16xf32>
    %365 = vector.extract_strided_slice %340 {offsets = [0, 16], sizes = [8, 16], strides = [1, 1]} : vector<8x32xf32> to vector<8x16xf32>
    %cst_67 = arith.constant 1.000000e+00 : f32
    %366 = vector.broadcast %cst_67 : f32 to vector<8x16xf32>
    %367 = arith.subf %366, %365 : vector<8x16xf32>
    %368 = arith.mulf %367, %356 : vector<8x16xf32>
    %369 = vector.extract_strided_slice %340 {offsets = [0, 16], sizes = [8, 16], strides = [1, 1]} : vector<8x32xf32> to vector<8x16xf32>
    %370 = vector.extract_strided_slice %325 {offsets = [0, 0], sizes = [8, 16], strides = [1, 1]} : vector<8x32xf32> to vector<8x16xf32>
    %371 = arith.mulf %369, %370 : vector<8x16xf32>
    %372 = arith.addf %368, %371 : vector<8x16xf32>
    %373 = vector.extract_strided_slice %348 {offsets = [0, 16], sizes = [8, 16], strides = [1, 1]} : vector<8x32xf32> to vector<8x16xf32>
    %cst_68 = arith.constant 1.000000e+00 : f32
    %374 = vector.broadcast %cst_68 : f32 to vector<8x16xf32>
    %375 = arith.subf %374, %373 : vector<8x16xf32>
    %376 = arith.mulf %375, %364 : vector<8x16xf32>
    %377 = vector.extract_strided_slice %348 {offsets = [0, 16], sizes = [8, 16], strides = [1, 1]} : vector<8x32xf32> to vector<8x16xf32>
    %378 = vector.extract_strided_slice %325 {offsets = [0, 16], sizes = [8, 16], strides = [1, 1]} : vector<8x32xf32> to vector<8x16xf32>
    %379 = arith.mulf %377, %378 : vector<8x16xf32>
    %380 = arith.addf %376, %379 : vector<8x16xf32>
    %c0_69 = arith.constant 0 : index
    %c5_70 = arith.constant 5 : index
    %c0_71 = arith.constant 0 : index
    %381 = vector.load %arg18[%c0_69, %c5_70, %c0_71] : memref<8x8x32xf32, #tpu.memory_space<vmem>>, vector<8x1x16xf32>
    %382 = vector.shape_cast %381 : vector<8x1x16xf32> to vector<8x16xf32>
    %383 = vector.shape_cast %372 : vector<8x16xf32> to vector<8x1x16xf32>
    tpu.vector_store %arg18[%c0_69, %c5_70, %c0_71], %383 {strides = array<i32>} : memref<8x8x32xf32, #tpu.memory_space<vmem>>, vector<8x1x16xf32>,
    %c0_72 = arith.constant 0 : index
    %c2_73 = arith.constant 2 : index
    %c16_74 = arith.constant 16 : index
    %384 = vector.load %arg18[%c0_72, %c2_73, %c16_74] : memref<8x8x32xf32, #tpu.memory_space<vmem>>, vector<8x1x16xf32>
    %385 = vector.shape_cast %384 : vector<8x1x16xf32> to vector<8x16xf32>
    %386 = vector.shape_cast %380 : vector<8x16xf32> to vector<8x1x16xf32>
    tpu.vector_store %arg18[%c0_72, %c2_73, %c16_74], %386 {strides = array<i32>} : memref<8x8x32xf32, #tpu.memory_space<vmem>>, vector<8x1x16xf32>,
    %387 = tpu.concatenate %372, %380 in 1 : vector<8x16xf32>, vector<8x16xf32> -> vector<8x32xf32>
    %cst_75 = arith.constant dense<0.000000e+00> : vector<8x96xf32>
    %388 = tpu.matmul %387, %4, %cst_75 {dimension_numbers = #tpu.dot_dimension_numbers<[1], [0], [0], [1], [0, 0, 1, 1], [], []>} : vector<8x32xf32>, vector<32x96xf32>, vector<8x96xf32> -> vector<8x96xf32>
    %389 = vector.extract_strided_slice %12 {offsets = [6, 0, 0], sizes = [1, 8, 48], strides = [1, 1, 1]} : vector<8x8x96xf32> to vector<1x8x48xf32>
    %390 = vector.shape_cast %389 : vector<1x8x48xf32> to vector<8x48xf32>
    %391 = vector.extract_strided_slice %12 {offsets = [1, 0, 48], sizes = [1, 8, 48], strides = [1, 1, 1]} : vector<8x8x96xf32> to vector<1x8x48xf32>
    %392 = vector.shape_cast %391 : vector<1x8x48xf32> to vector<8x48xf32>
    %393 = vector.extract_strided_slice %388 {offsets = [0, 0], sizes = [8, 48], strides = [1, 1]} : vector<8x96xf32> to vector<8x48xf32>
    %394 = vector.extract_strided_slice %388 {offsets = [0, 48], sizes = [8, 48], strides = [1, 1]} : vector<8x96xf32> to vector<8x48xf32>
    %395 = vector.extract_strided_slice %390 {offsets = [0, 0], sizes = [8, 32], strides = [1, 1]} : vector<8x48xf32> to vector<8x32xf32>
    %396 = vector.extract_strided_slice %393 {offsets = [0, 0], sizes = [8, 32], strides = [1, 1]} : vector<8x48xf32> to vector<8x32xf32>
    %397 = arith.addf %395, %396 : vector<8x32xf32>
    %398 = arith.negf %397 : vector<8x32xf32>
    %399 = math.exp %398 : vector<8x32xf32>
    %cst_76 = arith.constant 1.000000e+00 : f32
    %400 = vector.broadcast %cst_76 : f32 to vector<8x32xf32>
    %401 = arith.addf %400, %399 : vector<8x32xf32>
    %402 = arith.divf %400, %401 : vector<8x32xf32>
    %403 = vector.extract_strided_slice %392 {offsets = [0, 0], sizes = [8, 32], strides = [1, 1]} : vector<8x48xf32> to vector<8x32xf32>
    %404 = vector.extract_strided_slice %394 {offsets = [0, 0], sizes = [8, 32], strides = [1, 1]} : vector<8x48xf32> to vector<8x32xf32>
    %405 = arith.addf %403, %404 : vector<8x32xf32>
    %406 = arith.negf %405 : vector<8x32xf32>
    %407 = math.exp %406 : vector<8x32xf32>
    %cst_77 = arith.constant 1.000000e+00 : f32
    %408 = vector.broadcast %cst_77 : f32 to vector<8x32xf32>
    %409 = arith.addf %408, %407 : vector<8x32xf32>
    %410 = arith.divf %408, %409 : vector<8x32xf32>
    %411 = vector.extract_strided_slice %390 {offsets = [0, 32], sizes = [8, 16], strides = [1, 1]} : vector<8x48xf32> to vector<8x16xf32>
    %412 = vector.extract_strided_slice %402 {offsets = [0, 0], sizes = [8, 16], strides = [1, 1]} : vector<8x32xf32> to vector<8x16xf32>
    %413 = vector.extract_strided_slice %393 {offsets = [0, 32], sizes = [8, 16], strides = [1, 1]} : vector<8x48xf32> to vector<8x16xf32>
    %414 = vector.extract_strided_slice %14 {offsets = [0, 0], sizes = [8, 16], strides = [1, 1]} : vector<8x32xf32> to vector<8x16xf32>
    %415 = arith.addf %413, %414 : vector<8x16xf32>
    %416 = arith.mulf %412, %415 : vector<8x16xf32>
    %417 = arith.addf %411, %416 : vector<8x16xf32>
    %418 = math.tanh %417 : vector<8x16xf32>
    %419 = vector.extract_strided_slice %392 {offsets = [0, 32], sizes = [8, 16], strides = [1, 1]} : vector<8x48xf32> to vector<8x16xf32>
    %420 = vector.extract_strided_slice %410 {offsets = [0, 0], sizes = [8, 16], strides = [1, 1]} : vector<8x32xf32> to vector<8x16xf32>
    %421 = vector.extract_strided_slice %394 {offsets = [0, 32], sizes = [8, 16], strides = [1, 1]} : vector<8x48xf32> to vector<8x16xf32>
    %422 = vector.extract_strided_slice %14 {offsets = [0, 16], sizes = [8, 16], strides = [1, 1]} : vector<8x32xf32> to vector<8x16xf32>
    %423 = arith.addf %421, %422 : vector<8x16xf32>
    %424 = arith.mulf %420, %423 : vector<8x16xf32>
    %425 = arith.addf %419, %424 : vector<8x16xf32>
    %426 = math.tanh %425 : vector<8x16xf32>
    %427 = vector.extract_strided_slice %402 {offsets = [0, 16], sizes = [8, 16], strides = [1, 1]} : vector<8x32xf32> to vector<8x16xf32>
    %cst_78 = arith.constant 1.000000e+00 : f32
    %428 = vector.broadcast %cst_78 : f32 to vector<8x16xf32>
    %429 = arith.subf %428, %427 : vector<8x16xf32>
    %430 = arith.mulf %429, %418 : vector<8x16xf32>
    %431 = vector.extract_strided_slice %402 {offsets = [0, 16], sizes = [8, 16], strides = [1, 1]} : vector<8x32xf32> to vector<8x16xf32>
    %432 = vector.extract_strided_slice %387 {offsets = [0, 0], sizes = [8, 16], strides = [1, 1]} : vector<8x32xf32> to vector<8x16xf32>
    %433 = arith.mulf %431, %432 : vector<8x16xf32>
    %434 = arith.addf %430, %433 : vector<8x16xf32>
    %435 = vector.extract_strided_slice %410 {offsets = [0, 16], sizes = [8, 16], strides = [1, 1]} : vector<8x32xf32> to vector<8x16xf32>
    %cst_79 = arith.constant 1.000000e+00 : f32
    %436 = vector.broadcast %cst_79 : f32 to vector<8x16xf32>
    %437 = arith.subf %436, %435 : vector<8x16xf32>
    %438 = arith.mulf %437, %426 : vector<8x16xf32>
    %439 = vector.extract_strided_slice %410 {offsets = [0, 16], sizes = [8, 16], strides = [1, 1]} : vector<8x32xf32> to vector<8x16xf32>
    %440 = vector.extract_strided_slice %387 {offsets = [0, 16], sizes = [8, 16], strides = [1, 1]} : vector<8x32xf32> to vector<8x16xf32>
    %441 = arith.mulf %439, %440 : vector<8x16xf32>
    %442 = arith.addf %438, %441 : vector<8x16xf32>
    %c0_80 = arith.constant 0 : index
    %c6_81 = arith.constant 6 : index
    %c0_82 = arith.constant 0 : index
    %443 = vector.load %arg18[%c0_80, %c6_81, %c0_82] : memref<8x8x32xf32, #tpu.memory_space<vmem>>, vector<8x1x16xf32>
    %444 = vector.shape_cast %443 : vector<8x1x16xf32> to vector<8x16xf32>
    %445 = vector.shape_cast %434 : vector<8x16xf32> to vector<8x1x16xf32>
    tpu.vector_store %arg18[%c0_80, %c6_81, %c0_82], %445 {strides = array<i32>} : memref<8x8x32xf32, #tpu.memory_space<vmem>>, vector<8x1x16xf32>,
    %c0_83 = arith.constant 0 : index
    %c1_84 = arith.constant 1 : index
    %c16_85 = arith.constant 16 : index
    %446 = vector.load %arg18[%c0_83, %c1_84, %c16_85] : memref<8x8x32xf32, #tpu.memory_space<vmem>>, vector<8x1x16xf32>
    %447 = vector.shape_cast %446 : vector<8x1x16xf32> to vector<8x16xf32>
    %448 = vector.shape_cast %442 : vector<8x16xf32> to vector<8x1x16xf32>
    tpu.vector_store %arg18[%c0_83, %c1_84, %c16_85], %448 {strides = array<i32>} : memref<8x8x32xf32, #tpu.memory_space<vmem>>, vector<8x1x16xf32>,
    %449 = tpu.concatenate %434, %442 in 1 : vector<8x16xf32>, vector<8x16xf32> -> vector<8x32xf32>
    %cst_86 = arith.constant dense<0.000000e+00> : vector<8x96xf32>
    %450 = tpu.matmul %449, %4, %cst_86 {dimension_numbers = #tpu.dot_dimension_numbers<[1], [0], [0], [1], [0, 0, 1, 1], [], []>} : vector<8x32xf32>, vector<32x96xf32>, vector<8x96xf32> -> vector<8x96xf32>
    %451 = vector.extract_strided_slice %12 {offsets = [7, 0, 0], sizes = [1, 8, 48], strides = [1, 1, 1]} : vector<8x8x96xf32> to vector<1x8x48xf32>
    %452 = vector.shape_cast %451 : vector<1x8x48xf32> to vector<8x48xf32>
    %453 = vector.extract_strided_slice %12 {offsets = [0, 0, 48], sizes = [1, 8, 48], strides = [1, 1, 1]} : vector<8x8x96xf32> to vector<1x8x48xf32>
    %454 = vector.shape_cast %453 : vector<1x8x48xf32> to vector<8x48xf32>
    %455 = vector.extract_strided_slice %450 {offsets = [0, 0], sizes = [8, 48], strides = [1, 1]} : vector<8x96xf32> to vector<8x48xf32>
    %456 = vector.extract_strided_slice %450 {offsets = [0, 48], sizes = [8, 48], strides = [1, 1]} : vector<8x96xf32> to vector<8x48xf32>
    %457 = vector.extract_strided_slice %452 {offsets = [0, 0], sizes = [8, 32], strides = [1, 1]} : vector<8x48xf32> to vector<8x32xf32>
    %458 = vector.extract_strided_slice %455 {offsets = [0, 0], sizes = [8, 32], strides = [1, 1]} : vector<8x48xf32> to vector<8x32xf32>
    %459 = arith.addf %457, %458 : vector<8x32xf32>
    %460 = arith.negf %459 : vector<8x32xf32>
    %461 = math.exp %460 : vector<8x32xf32>
    %cst_87 = arith.constant 1.000000e+00 : f32
    %462 = vector.broadcast %cst_87 : f32 to vector<8x32xf32>
    %463 = arith.addf %462, %461 : vector<8x32xf32>
    %464 = arith.divf %462, %463 : vector<8x32xf32>
    %465 = vector.extract_strided_slice %454 {offsets = [0, 0], sizes = [8, 32], strides = [1, 1]} : vector<8x48xf32> to vector<8x32xf32>
    %466 = vector.extract_strided_slice %456 {offsets = [0, 0], sizes = [8, 32], strides = [1, 1]} : vector<8x48xf32> to vector<8x32xf32>
    %467 = arith.addf %465, %466 : vector<8x32xf32>
    %468 = arith.negf %467 : vector<8x32xf32>
    %469 = math.exp %468 : vector<8x32xf32>
    %cst_88 = arith.constant 1.000000e+00 : f32
    %470 = vector.broadcast %cst_88 : f32 to vector<8x32xf32>
    %471 = arith.addf %470, %469 : vector<8x32xf32>
    %472 = arith.divf %470, %471 : vector<8x32xf32>
    %473 = vector.extract_strided_slice %452 {offsets = [0, 32], sizes = [8, 16], strides = [1, 1]} : vector<8x48xf32> to vector<8x16xf32>
    %474 = vector.extract_strided_slice %464 {offsets = [0, 0], sizes = [8, 16], strides = [1, 1]} : vector<8x32xf32> to vector<8x16xf32>
    %475 = vector.extract_strided_slice %455 {offsets = [0, 32], sizes = [8, 16], strides = [1, 1]} : vector<8x48xf32> to vector<8x16xf32>
    %476 = vector.extract_strided_slice %14 {offsets = [0, 0], sizes = [8, 16], strides = [1, 1]} : vector<8x32xf32> to vector<8x16xf32>
    %477 = arith.addf %475, %476 : vector<8x16xf32>
    %478 = arith.mulf %474, %477 : vector<8x16xf32>
    %479 = arith.addf %473, %478 : vector<8x16xf32>
    %480 = math.tanh %479 : vector<8x16xf32>
    %481 = vector.extract_strided_slice %454 {offsets = [0, 32], sizes = [8, 16], strides = [1, 1]} : vector<8x48xf32> to vector<8x16xf32>
    %482 = vector.extract_strided_slice %472 {offsets = [0, 0], sizes = [8, 16], strides = [1, 1]} : vector<8x32xf32> to vector<8x16xf32>
    %483 = vector.extract_strided_slice %456 {offsets = [0, 32], sizes = [8, 16], strides = [1, 1]} : vector<8x48xf32> to vector<8x16xf32>
    %484 = vector.extract_strided_slice %14 {offsets = [0, 16], sizes = [8, 16], strides = [1, 1]} : vector<8x32xf32> to vector<8x16xf32>
    %485 = arith.addf %483, %484 : vector<8x16xf32>
    %486 = arith.mulf %482, %485 : vector<8x16xf32>
    %487 = arith.addf %481, %486 : vector<8x16xf32>
    %488 = math.tanh %487 : vector<8x16xf32>
    %489 = vector.extract_strided_slice %464 {offsets = [0, 16], sizes = [8, 16], strides = [1, 1]} : vector<8x32xf32> to vector<8x16xf32>
    %cst_89 = arith.constant 1.000000e+00 : f32
    %490 = vector.broadcast %cst_89 : f32 to vector<8x16xf32>
    %491 = arith.subf %490, %489 : vector<8x16xf32>
    %492 = arith.mulf %491, %480 : vector<8x16xf32>
    %493 = vector.extract_strided_slice %464 {offsets = [0, 16], sizes = [8, 16], strides = [1, 1]} : vector<8x32xf32> to vector<8x16xf32>
    %494 = vector.extract_strided_slice %449 {offsets = [0, 0], sizes = [8, 16], strides = [1, 1]} : vector<8x32xf32> to vector<8x16xf32>
    %495 = arith.mulf %493, %494 : vector<8x16xf32>
    %496 = arith.addf %492, %495 : vector<8x16xf32>
    %497 = vector.extract_strided_slice %472 {offsets = [0, 16], sizes = [8, 16], strides = [1, 1]} : vector<8x32xf32> to vector<8x16xf32>
    %cst_90 = arith.constant 1.000000e+00 : f32
    %498 = vector.broadcast %cst_90 : f32 to vector<8x16xf32>
    %499 = arith.subf %498, %497 : vector<8x16xf32>
    %500 = arith.mulf %499, %488 : vector<8x16xf32>
    %501 = vector.extract_strided_slice %472 {offsets = [0, 16], sizes = [8, 16], strides = [1, 1]} : vector<8x32xf32> to vector<8x16xf32>
    %502 = vector.extract_strided_slice %449 {offsets = [0, 16], sizes = [8, 16], strides = [1, 1]} : vector<8x32xf32> to vector<8x16xf32>
    %503 = arith.mulf %501, %502 : vector<8x16xf32>
    %504 = arith.addf %500, %503 : vector<8x16xf32>
    %c0_91 = arith.constant 0 : index
    %c7_92 = arith.constant 7 : index
    %c0_93 = arith.constant 0 : index
    %505 = vector.load %arg18[%c0_91, %c7_92, %c0_93] : memref<8x8x32xf32, #tpu.memory_space<vmem>>, vector<8x1x16xf32>
    %506 = vector.shape_cast %505 : vector<8x1x16xf32> to vector<8x16xf32>
    %507 = vector.shape_cast %496 : vector<8x16xf32> to vector<8x1x16xf32>
    tpu.vector_store %arg18[%c0_91, %c7_92, %c0_93], %507 {strides = array<i32>} : memref<8x8x32xf32, #tpu.memory_space<vmem>>, vector<8x1x16xf32>,
    %c0_94 = arith.constant 0 : index
    %c0_95 = arith.constant 0 : index
    %c16_96 = arith.constant 16 : index
    %508 = vector.load %arg18[%c0_94, %c0_95, %c16_96] : memref<8x8x32xf32, #tpu.memory_space<vmem>>, vector<8x1x16xf32>
    %509 = vector.shape_cast %508 : vector<8x1x16xf32> to vector<8x16xf32>
    %510 = vector.shape_cast %504 : vector<8x16xf32> to vector<8x1x16xf32>
    tpu.vector_store %arg18[%c0_94, %c0_95, %c16_96], %510 {strides = array<i32>} : memref<8x8x32xf32, #tpu.memory_space<vmem>>, vector<8x1x16xf32>,
    %c0_97 = arith.constant 0 : index
    %c0_98 = arith.constant 0 : index
    %c0_99 = arith.constant 0 : index
    %511 = vector.load %arg18[%c0_97, %c0_98, %c0_99] : memref<8x8x32xf32, #tpu.memory_space<vmem>>, vector<8x8x32xf32>
    %512 = vector.shape_cast %511 : vector<8x8x32xf32> to vector<64x32xf32>
    %cst_100 = arith.constant dense<0.000000e+00> : vector<64x32xf32>
    %513 = tpu.matmul %512, %6, %cst_100 {dimension_numbers = #tpu.dot_dimension_numbers<[1], [0], [0], [1], [0, 0, 1, 1], [], []>} : vector<64x32xf32>, vector<32x32xf32>, vector<64x32xf32> -> vector<64x32xf32>
    %514 = vector.broadcast %7 : vector<1x32xf32> to vector<64x32xf32>
    %515 = arith.addf %513, %514 : vector<64x32xf32>
    %516 = math.tanh %515 : vector<64x32xf32>
    %cst_101 = arith.constant dense<0.000000e+00> : vector<64x1xf32>
    %517 = tpu.matmul %516, %8, %cst_101 {dimension_numbers = #tpu.dot_dimension_numbers<[1], [0], [0], [1], [0, 0, 1, 1], [], []>} : vector<64x32xf32>, vector<32x1xf32>, vector<64x1xf32> -> vector<64x1xf32>
    %518 = vector.shape_cast %517 : vector<64x1xf32> to vector<8x8xf32>
    %cst_102 = arith.constant dense<0xFF800000> : vector<8xf32>
    %519 = vector.multi_reduction <maximumf>, %518, %cst_102 [1] : vector<8x8xf32> to vector<8xf32>
    %520 = vector.shape_cast %519 : vector<8xf32> to vector<8x1xf32>
    %521 = vector.broadcast %520 : vector<8x1xf32> to vector<8x8xf32>
    %522 = arith.subf %518, %521 : vector<8x8xf32>
    %523 = math.exp %522 : vector<8x8xf32>
    %cst_103 = arith.constant dense<0.000000e+00> : vector<8xf32>
    %524 = vector.multi_reduction <add>, %523, %cst_103 [1] : vector<8x8xf32> to vector<8xf32>
    %525 = vector.shape_cast %524 : vector<8xf32> to vector<8x1xf32>
    %526 = tpu.reciprocal %525 {approx = true} : vector<8x1xf32> -> vector<8x1xf32>
    %527 = vector.shape_cast %523 : vector<8x8xf32> to vector<8x1x8xf32>
    "tpu.trace_start"() <{level = 10 : i32, message = "nqt,ntd->nqd"}> : () -> ()
    %cst_104 = arith.constant dense<0.000000e+00> : vector<8x1x32xf32>
    %528 = tpu.matmul %527, %511, %cst_104 {dimension_numbers = #tpu.dot_dimension_numbers<[2], [1], [1], [2], [0, 0, 0, 1, 1, 2], [0], [0]>} : vector<8x1x8xf32>, vector<8x8x32xf32>, vector<8x1x32xf32> -> vector<8x1x32xf32>
    "tpu.trace_stop"() : () -> ()
    %529 = vector.shape_cast %528 : vector<8x1x32xf32> to vector<8x32xf32>
    %530 = vector.broadcast %526 : vector<8x1xf32> to vector<8x32xf32>
    %531 = arith.mulf %529, %530 : vector<8x32xf32>
    %c0_105 = arith.constant 0 : index
    %c0_106 = arith.constant 0 : index
    %532 = vector.load %arg8[%c0_105, %c0_106] : memref<32x96xf32, #tpu.memory_space<vmem>>, vector<32x96xf32>
    %c0_107 = arith.constant 0 : index
    %c0_108 = arith.constant 0 : index
    %533 = vector.load %arg9[%c0_107, %c0_108] : memref<1x96xf32, #tpu.memory_space<vmem>>, vector<1x96xf32>
    %c0_109 = arith.constant 0 : index
    %c0_110 = arith.constant 0 : index
    %534 = vector.load %arg10[%c0_109, %c0_110] : memref<32x96xf32, #tpu.memory_space<vmem>>, vector<32x96xf32>
    %c0_111 = arith.constant 0 : index
    %c0_112 = arith.constant 0 : index
    %535 = vector.load %arg11[%c0_111, %c0_112] : memref<1x32xf32, #tpu.memory_space<vmem>>, vector<1x32xf32>
    %c0_113 = arith.constant 0 : index
    %c0_114 = arith.constant 0 : index
    %536 = vector.load %arg12[%c0_113, %c0_114] : memref<32x32xf32, #tpu.memory_space<vmem>>, vector<32x32xf32>
    %c0_115 = arith.constant 0 : index
    %c0_116 = arith.constant 0 : index
    %537 = vector.load %arg13[%c0_115, %c0_116] : memref<1x32xf32, #tpu.memory_space<vmem>>, vector<1x32xf32>
    %c0_117 = arith.constant 0 : index
    %c0_118 = arith.constant 0 : index
    %538 = vector.load %arg14[%c0_117, %c0_118] : memref<32x1xf32, #tpu.memory_space<vmem>>, vector<32x1xf32>
    %cst_119 = arith.constant dense<0.000000e+00> : vector<8x96xf32>
    %539 = tpu.matmul %531, %532, %cst_119 {dimension_numbers = #tpu.dot_dimension_numbers<[1], [0], [0], [1], [0, 0, 1, 1], [], []>} : vector<8x32xf32>, vector<32x96xf32>, vector<8x96xf32> -> vector<8x96xf32>
    %540 = vector.broadcast %533 : vector<1x96xf32> to vector<8x96xf32>
    %541 = arith.addf %539, %540 : vector<8x96xf32>
    %542 = vector.shape_cast %541 : vector<8x96xf32> to vector<4x2x96xf32>
    %543 = vector.shape_cast %535 : vector<1x32xf32> to vector<1x32xf32>
    %544 = vector.broadcast %543 : vector<1x32xf32> to vector<2x32xf32>
    %cst_120 = arith.constant 0.000000e+00 : f32
    %545 = vector.broadcast %cst_120 : f32 to vector<2x32xf32>
    %cst_121 = arith.constant dense<0.000000e+00> : vector<2x96xf32>
    %546 = tpu.matmul %545, %534, %cst_121 {dimension_numbers = #tpu.dot_dimension_numbers<[1], [0], [0], [1], [0, 0, 1, 1], [], []>} : vector<2x32xf32>, vector<32x96xf32>, vector<2x96xf32> -> vector<2x96xf32>
    %547 = vector.extract_strided_slice %542 {offsets = [0, 0, 0], sizes = [1, 2, 48], strides = [1, 1, 1]} : vector<4x2x96xf32> to vector<1x2x48xf32>
    %548 = vector.shape_cast %547 : vector<1x2x48xf32> to vector<2x48xf32>
    %549 = vector.extract_strided_slice %542 {offsets = [3, 0, 48], sizes = [1, 2, 48], strides = [1, 1, 1]} : vector<4x2x96xf32> to vector<1x2x48xf32>
    %550 = vector.shape_cast %549 : vector<1x2x48xf32> to vector<2x48xf32>
    %551 = vector.extract_strided_slice %546 {offsets = [0, 0], sizes = [2, 48], strides = [1, 1]} : vector<2x96xf32> to vector<2x48xf32>
    %552 = vector.extract_strided_slice %546 {offsets = [0, 48], sizes = [2, 48], strides = [1, 1]} : vector<2x96xf32> to vector<2x48xf32>
    %553 = vector.extract_strided_slice %548 {offsets = [0, 0], sizes = [2, 32], strides = [1, 1]} : vector<2x48xf32> to vector<2x32xf32>
    %554 = vector.extract_strided_slice %551 {offsets = [0, 0], sizes = [2, 32], strides = [1, 1]} : vector<2x48xf32> to vector<2x32xf32>
    %555 = arith.addf %553, %554 : vector<2x32xf32>
    %556 = arith.negf %555 : vector<2x32xf32>
    %557 = math.exp %556 : vector<2x32xf32>
    %cst_122 = arith.constant 1.000000e+00 : f32
    %558 = vector.broadcast %cst_122 : f32 to vector<2x32xf32>
    %559 = arith.addf %558, %557 : vector<2x32xf32>
    %560 = arith.divf %558, %559 : vector<2x32xf32>
    %561 = vector.extract_strided_slice %550 {offsets = [0, 0], sizes = [2, 32], strides = [1, 1]} : vector<2x48xf32> to vector<2x32xf32>
    %562 = vector.extract_strided_slice %552 {offsets = [0, 0], sizes = [2, 32], strides = [1, 1]} : vector<2x48xf32> to vector<2x32xf32>
    %563 = arith.addf %561, %562 : vector<2x32xf32>
    %564 = arith.negf %563 : vector<2x32xf32>
    %565 = math.exp %564 : vector<2x32xf32>
    %cst_123 = arith.constant 1.000000e+00 : f32
    %566 = vector.broadcast %cst_123 : f32 to vector<2x32xf32>
    %567 = arith.addf %566, %565 : vector<2x32xf32>
    %568 = arith.divf %566, %567 : vector<2x32xf32>
    %569 = vector.extract_strided_slice %548 {offsets = [0, 32], sizes = [2, 16], strides = [1, 1]} : vector<2x48xf32> to vector<2x16xf32>
    %570 = vector.extract_strided_slice %560 {offsets = [0, 0], sizes = [2, 16], strides = [1, 1]} : vector<2x32xf32> to vector<2x16xf32>
    %571 = vector.extract_strided_slice %551 {offsets = [0, 32], sizes = [2, 16], strides = [1, 1]} : vector<2x48xf32> to vector<2x16xf32>
    %572 = vector.extract_strided_slice %544 {offsets = [0, 0], sizes = [2, 16], strides = [1, 1]} : vector<2x32xf32> to vector<2x16xf32>
    %573 = arith.addf %571, %572 : vector<2x16xf32>
    %574 = arith.mulf %570, %573 : vector<2x16xf32>
    %575 = arith.addf %569, %574 : vector<2x16xf32>
    %576 = math.tanh %575 : vector<2x16xf32>
    %577 = vector.extract_strided_slice %550 {offsets = [0, 32], sizes = [2, 16], strides = [1, 1]} : vector<2x48xf32> to vector<2x16xf32>
    %578 = vector.extract_strided_slice %568 {offsets = [0, 0], sizes = [2, 16], strides = [1, 1]} : vector<2x32xf32> to vector<2x16xf32>
    %579 = vector.extract_strided_slice %552 {offsets = [0, 32], sizes = [2, 16], strides = [1, 1]} : vector<2x48xf32> to vector<2x16xf32>
    %580 = vector.extract_strided_slice %544 {offsets = [0, 16], sizes = [2, 16], strides = [1, 1]} : vector<2x32xf32> to vector<2x16xf32>
    %581 = arith.addf %579, %580 : vector<2x16xf32>
    %582 = arith.mulf %578, %581 : vector<2x16xf32>
    %583 = arith.addf %577, %582 : vector<2x16xf32>
    %584 = math.tanh %583 : vector<2x16xf32>
    %585 = vector.extract_strided_slice %560 {offsets = [0, 16], sizes = [2, 16], strides = [1, 1]} : vector<2x32xf32> to vector<2x16xf32>
    %cst_124 = arith.constant 1.000000e+00 : f32
    %586 = vector.broadcast %cst_124 : f32 to vector<2x16xf32>
    %587 = arith.subf %586, %585 : vector<2x16xf32>
    %588 = arith.mulf %587, %576 : vector<2x16xf32>
    %589 = vector.extract_strided_slice %560 {offsets = [0, 16], sizes = [2, 16], strides = [1, 1]} : vector<2x32xf32> to vector<2x16xf32>
    %590 = vector.extract_strided_slice %545 {offsets = [0, 0], sizes = [2, 16], strides = [1, 1]} : vector<2x32xf32> to vector<2x16xf32>
    %591 = arith.mulf %589, %590 : vector<2x16xf32>
    %592 = arith.addf %588, %591 : vector<2x16xf32>
    %593 = vector.extract_strided_slice %568 {offsets = [0, 16], sizes = [2, 16], strides = [1, 1]} : vector<2x32xf32> to vector<2x16xf32>
    %cst_125 = arith.constant 1.000000e+00 : f32
    %594 = vector.broadcast %cst_125 : f32 to vector<2x16xf32>
    %595 = arith.subf %594, %593 : vector<2x16xf32>
    %596 = arith.mulf %595, %584 : vector<2x16xf32>
    %597 = vector.extract_strided_slice %568 {offsets = [0, 16], sizes = [2, 16], strides = [1, 1]} : vector<2x32xf32> to vector<2x16xf32>
    %598 = vector.extract_strided_slice %545 {offsets = [0, 16], sizes = [2, 16], strides = [1, 1]} : vector<2x32xf32> to vector<2x16xf32>
    %599 = arith.mulf %597, %598 : vector<2x16xf32>
    %600 = arith.addf %596, %599 : vector<2x16xf32>
    %c0_126 = arith.constant 0 : index
    %c0_127 = arith.constant 0 : index
    %c0_128 = arith.constant 0 : index
    %601 = vector.load %arg19[%c0_126, %c0_127, %c0_128] : memref<2x4x32xf32, #tpu.memory_space<vmem>>, vector<2x1x16xf32>
    %602 = vector.shape_cast %601 : vector<2x1x16xf32> to vector<2x16xf32>
    %603 = vector.shape_cast %592 : vector<2x16xf32> to vector<2x1x16xf32>
    tpu.vector_store %arg19[%c0_126, %c0_127, %c0_128], %603 {strides = array<i32>} : memref<2x4x32xf32, #tpu.memory_space<vmem>>, vector<2x1x16xf32>,
    %c0_129 = arith.constant 0 : index
    %c3_130 = arith.constant 3 : index
    %c16_131 = arith.constant 16 : index
    %604 = vector.load %arg19[%c0_129, %c3_130, %c16_131] : memref<2x4x32xf32, #tpu.memory_space<vmem>>, vector<2x1x16xf32>
    %605 = vector.shape_cast %604 : vector<2x1x16xf32> to vector<2x16xf32>
    %606 = vector.shape_cast %600 : vector<2x16xf32> to vector<2x1x16xf32>
    tpu.vector_store %arg19[%c0_129, %c3_130, %c16_131], %606 {strides = array<i32>} : memref<2x4x32xf32, #tpu.memory_space<vmem>>, vector<2x1x16xf32>,
    %607 = tpu.concatenate %592, %600 in 1 : vector<2x16xf32>, vector<2x16xf32> -> vector<2x32xf32>
    %cst_132 = arith.constant dense<0.000000e+00> : vector<2x96xf32>
    %608 = tpu.matmul %607, %534, %cst_132 {dimension_numbers = #tpu.dot_dimension_numbers<[1], [0], [0], [1], [0, 0, 1, 1], [], []>} : vector<2x32xf32>, vector<32x96xf32>, vector<2x96xf32> -> vector<2x96xf32>
    %609 = vector.extract_strided_slice %542 {offsets = [1, 0, 0], sizes = [1, 2, 48], strides = [1, 1, 1]} : vector<4x2x96xf32> to vector<1x2x48xf32>
    %610 = vector.shape_cast %609 : vector<1x2x48xf32> to vector<2x48xf32>
    %611 = vector.extract_strided_slice %542 {offsets = [2, 0, 48], sizes = [1, 2, 48], strides = [1, 1, 1]} : vector<4x2x96xf32> to vector<1x2x48xf32>
    %612 = vector.shape_cast %611 : vector<1x2x48xf32> to vector<2x48xf32>
    %613 = vector.extract_strided_slice %608 {offsets = [0, 0], sizes = [2, 48], strides = [1, 1]} : vector<2x96xf32> to vector<2x48xf32>
    %614 = vector.extract_strided_slice %608 {offsets = [0, 48], sizes = [2, 48], strides = [1, 1]} : vector<2x96xf32> to vector<2x48xf32>
    %615 = vector.extract_strided_slice %610 {offsets = [0, 0], sizes = [2, 32], strides = [1, 1]} : vector<2x48xf32> to vector<2x32xf32>
    %616 = vector.extract_strided_slice %613 {offsets = [0, 0], sizes = [2, 32], strides = [1, 1]} : vector<2x48xf32> to vector<2x32xf32>
    %617 = arith.addf %615, %616 : vector<2x32xf32>
    %618 = arith.negf %617 : vector<2x32xf32>
    %619 = math.exp %618 : vector<2x32xf32>
    %cst_133 = arith.constant 1.000000e+00 : f32
    %620 = vector.broadcast %cst_133 : f32 to vector<2x32xf32>
    %621 = arith.addf %620, %619 : vector<2x32xf32>
    %622 = arith.divf %620, %621 : vector<2x32xf32>
    %623 = vector.extract_strided_slice %612 {offsets = [0, 0], sizes = [2, 32], strides = [1, 1]} : vector<2x48xf32> to vector<2x32xf32>
    %624 = vector.extract_strided_slice %614 {offsets = [0, 0], sizes = [2, 32], strides = [1, 1]} : vector<2x48xf32> to vector<2x32xf32>
    %625 = arith.addf %623, %624 : vector<2x32xf32>
    %626 = arith.negf %625 : vector<2x32xf32>
    %627 = math.exp %626 : vector<2x32xf32>
    %cst_134 = arith.constant 1.000000e+00 : f32
    %628 = vector.broadcast %cst_134 : f32 to vector<2x32xf32>
    %629 = arith.addf %628, %627 : vector<2x32xf32>
    %630 = arith.divf %628, %629 : vector<2x32xf32>
    %631 = vector.extract_strided_slice %610 {offsets = [0, 32], sizes = [2, 16], strides = [1, 1]} : vector<2x48xf32> to vector<2x16xf32>
    %632 = vector.extract_strided_slice %622 {offsets = [0, 0], sizes = [2, 16], strides = [1, 1]} : vector<2x32xf32> to vector<2x16xf32>
    %633 = vector.extract_strided_slice %613 {offsets = [0, 32], sizes = [2, 16], strides = [1, 1]} : vector<2x48xf32> to vector<2x16xf32>
    %634 = vector.extract_strided_slice %544 {offsets = [0, 0], sizes = [2, 16], strides = [1, 1]} : vector<2x32xf32> to vector<2x16xf32>
    %635 = arith.addf %633, %634 : vector<2x16xf32>
    %636 = arith.mulf %632, %635 : vector<2x16xf32>
    %637 = arith.addf %631, %636 : vector<2x16xf32>
    %638 = math.tanh %637 : vector<2x16xf32>
    %639 = vector.extract_strided_slice %612 {offsets = [0, 32], sizes = [2, 16], strides = [1, 1]} : vector<2x48xf32> to vector<2x16xf32>
    %640 = vector.extract_strided_slice %630 {offsets = [0, 0], sizes = [2, 16], strides = [1, 1]} : vector<2x32xf32> to vector<2x16xf32>
    %641 = vector.extract_strided_slice %614 {offsets = [0, 32], sizes = [2, 16], strides = [1, 1]} : vector<2x48xf32> to vector<2x16xf32>
    %642 = vector.extract_strided_slice %544 {offsets = [0, 16], sizes = [2, 16], strides = [1, 1]} : vector<2x32xf32> to vector<2x16xf32>
    %643 = arith.addf %641, %642 : vector<2x16xf32>
    %644 = arith.mulf %640, %643 : vector<2x16xf32>
    %645 = arith.addf %639, %644 : vector<2x16xf32>
    %646 = math.tanh %645 : vector<2x16xf32>
    %647 = vector.extract_strided_slice %622 {offsets = [0, 16], sizes = [2, 16], strides = [1, 1]} : vector<2x32xf32> to vector<2x16xf32>
    %cst_135 = arith.constant 1.000000e+00 : f32
    %648 = vector.broadcast %cst_135 : f32 to vector<2x16xf32>
    %649 = arith.subf %648, %647 : vector<2x16xf32>
    %650 = arith.mulf %649, %638 : vector<2x16xf32>
    %651 = vector.extract_strided_slice %622 {offsets = [0, 16], sizes = [2, 16], strides = [1, 1]} : vector<2x32xf32> to vector<2x16xf32>
    %652 = vector.extract_strided_slice %607 {offsets = [0, 0], sizes = [2, 16], strides = [1, 1]} : vector<2x32xf32> to vector<2x16xf32>
    %653 = arith.mulf %651, %652 : vector<2x16xf32>
    %654 = arith.addf %650, %653 : vector<2x16xf32>
    %655 = vector.extract_strided_slice %630 {offsets = [0, 16], sizes = [2, 16], strides = [1, 1]} : vector<2x32xf32> to vector<2x16xf32>
    %cst_136 = arith.constant 1.000000e+00 : f32
    %656 = vector.broadcast %cst_136 : f32 to vector<2x16xf32>
    %657 = arith.subf %656, %655 : vector<2x16xf32>
    %658 = arith.mulf %657, %646 : vector<2x16xf32>
    %659 = vector.extract_strided_slice %630 {offsets = [0, 16], sizes = [2, 16], strides = [1, 1]} : vector<2x32xf32> to vector<2x16xf32>
    %660 = vector.extract_strided_slice %607 {offsets = [0, 16], sizes = [2, 16], strides = [1, 1]} : vector<2x32xf32> to vector<2x16xf32>
    %661 = arith.mulf %659, %660 : vector<2x16xf32>
    %662 = arith.addf %658, %661 : vector<2x16xf32>
    %c0_137 = arith.constant 0 : index
    %c1_138 = arith.constant 1 : index
    %c0_139 = arith.constant 0 : index
    %663 = vector.load %arg19[%c0_137, %c1_138, %c0_139] : memref<2x4x32xf32, #tpu.memory_space<vmem>>, vector<2x1x16xf32>
    %664 = vector.shape_cast %663 : vector<2x1x16xf32> to vector<2x16xf32>
    %665 = vector.shape_cast %654 : vector<2x16xf32> to vector<2x1x16xf32>
    tpu.vector_store %arg19[%c0_137, %c1_138, %c0_139], %665 {strides = array<i32>} : memref<2x4x32xf32, #tpu.memory_space<vmem>>, vector<2x1x16xf32>,
    %c0_140 = arith.constant 0 : index
    %c2_141 = arith.constant 2 : index
    %c16_142 = arith.constant 16 : index
    %666 = vector.load %arg19[%c0_140, %c2_141, %c16_142] : memref<2x4x32xf32, #tpu.memory_space<vmem>>, vector<2x1x16xf32>
    %667 = vector.shape_cast %666 : vector<2x1x16xf32> to vector<2x16xf32>
    %668 = vector.shape_cast %662 : vector<2x16xf32> to vector<2x1x16xf32>
    tpu.vector_store %arg19[%c0_140, %c2_141, %c16_142], %668 {strides = array<i32>} : memref<2x4x32xf32, #tpu.memory_space<vmem>>, vector<2x1x16xf32>,
    %669 = tpu.concatenate %654, %662 in 1 : vector<2x16xf32>, vector<2x16xf32> -> vector<2x32xf32>
    %cst_143 = arith.constant dense<0.000000e+00> : vector<2x96xf32>
    %670 = tpu.matmul %669, %534, %cst_143 {dimension_numbers = #tpu.dot_dimension_numbers<[1], [0], [0], [1], [0, 0, 1, 1], [], []>} : vector<2x32xf32>, vector<32x96xf32>, vector<2x96xf32> -> vector<2x96xf32>
    %671 = vector.extract_strided_slice %542 {offsets = [2, 0, 0], sizes = [1, 2, 48], strides = [1, 1, 1]} : vector<4x2x96xf32> to vector<1x2x48xf32>
    %672 = vector.shape_cast %671 : vector<1x2x48xf32> to vector<2x48xf32>
    %673 = vector.extract_strided_slice %542 {offsets = [1, 0, 48], sizes = [1, 2, 48], strides = [1, 1, 1]} : vector<4x2x96xf32> to vector<1x2x48xf32>
    %674 = vector.shape_cast %673 : vector<1x2x48xf32> to vector<2x48xf32>
    %675 = vector.extract_strided_slice %670 {offsets = [0, 0], sizes = [2, 48], strides = [1, 1]} : vector<2x96xf32> to vector<2x48xf32>
    %676 = vector.extract_strided_slice %670 {offsets = [0, 48], sizes = [2, 48], strides = [1, 1]} : vector<2x96xf32> to vector<2x48xf32>
    %677 = vector.extract_strided_slice %672 {offsets = [0, 0], sizes = [2, 32], strides = [1, 1]} : vector<2x48xf32> to vector<2x32xf32>
    %678 = vector.extract_strided_slice %675 {offsets = [0, 0], sizes = [2, 32], strides = [1, 1]} : vector<2x48xf32> to vector<2x32xf32>
    %679 = arith.addf %677, %678 : vector<2x32xf32>
    %680 = arith.negf %679 : vector<2x32xf32>
    %681 = math.exp %680 : vector<2x32xf32>
    %cst_144 = arith.constant 1.000000e+00 : f32
    %682 = vector.broadcast %cst_144 : f32 to vector<2x32xf32>
    %683 = arith.addf %682, %681 : vector<2x32xf32>
    %684 = arith.divf %682, %683 : vector<2x32xf32>
    %685 = vector.extract_strided_slice %674 {offsets = [0, 0], sizes = [2, 32], strides = [1, 1]} : vector<2x48xf32> to vector<2x32xf32>
    %686 = vector.extract_strided_slice %676 {offsets = [0, 0], sizes = [2, 32], strides = [1, 1]} : vector<2x48xf32> to vector<2x32xf32>
    %687 = arith.addf %685, %686 : vector<2x32xf32>
    %688 = arith.negf %687 : vector<2x32xf32>
    %689 = math.exp %688 : vector<2x32xf32>
    %cst_145 = arith.constant 1.000000e+00 : f32
    %690 = vector.broadcast %cst_145 : f32 to vector<2x32xf32>
    %691 = arith.addf %690, %689 : vector<2x32xf32>
    %692 = arith.divf %690, %691 : vector<2x32xf32>
    %693 = vector.extract_strided_slice %672 {offsets = [0, 32], sizes = [2, 16], strides = [1, 1]} : vector<2x48xf32> to vector<2x16xf32>
    %694 = vector.extract_strided_slice %684 {offsets = [0, 0], sizes = [2, 16], strides = [1, 1]} : vector<2x32xf32> to vector<2x16xf32>
    %695 = vector.extract_strided_slice %675 {offsets = [0, 32], sizes = [2, 16], strides = [1, 1]} : vector<2x48xf32> to vector<2x16xf32>
    %696 = vector.extract_strided_slice %544 {offsets = [0, 0], sizes = [2, 16], strides = [1, 1]} : vector<2x32xf32> to vector<2x16xf32>
    %697 = arith.addf %695, %696 : vector<2x16xf32>
    %698 = arith.mulf %694, %697 : vector<2x16xf32>
    %699 = arith.addf %693, %698 : vector<2x16xf32>
    %700 = math.tanh %699 : vector<2x16xf32>
    %701 = vector.extract_strided_slice %674 {offsets = [0, 32], sizes = [2, 16], strides = [1, 1]} : vector<2x48xf32> to vector<2x16xf32>
    %702 = vector.extract_strided_slice %692 {offsets = [0, 0], sizes = [2, 16], strides = [1, 1]} : vector<2x32xf32> to vector<2x16xf32>
    %703 = vector.extract_strided_slice %676 {offsets = [0, 32], sizes = [2, 16], strides = [1, 1]} : vector<2x48xf32> to vector<2x16xf32>
    %704 = vector.extract_strided_slice %544 {offsets = [0, 16], sizes = [2, 16], strides = [1, 1]} : vector<2x32xf32> to vector<2x16xf32>
    %705 = arith.addf %703, %704 : vector<2x16xf32>
    %706 = arith.mulf %702, %705 : vector<2x16xf32>
    %707 = arith.addf %701, %706 : vector<2x16xf32>
    %708 = math.tanh %707 : vector<2x16xf32>
    %709 = vector.extract_strided_slice %684 {offsets = [0, 16], sizes = [2, 16], strides = [1, 1]} : vector<2x32xf32> to vector<2x16xf32>
    %cst_146 = arith.constant 1.000000e+00 : f32
    %710 = vector.broadcast %cst_146 : f32 to vector<2x16xf32>
    %711 = arith.subf %710, %709 : vector<2x16xf32>
    %712 = arith.mulf %711, %700 : vector<2x16xf32>
    %713 = vector.extract_strided_slice %684 {offsets = [0, 16], sizes = [2, 16], strides = [1, 1]} : vector<2x32xf32> to vector<2x16xf32>
    %714 = vector.extract_strided_slice %669 {offsets = [0, 0], sizes = [2, 16], strides = [1, 1]} : vector<2x32xf32> to vector<2x16xf32>
    %715 = arith.mulf %713, %714 : vector<2x16xf32>
    %716 = arith.addf %712, %715 : vector<2x16xf32>
    %717 = vector.extract_strided_slice %692 {offsets = [0, 16], sizes = [2, 16], strides = [1, 1]} : vector<2x32xf32> to vector<2x16xf32>
    %cst_147 = arith.constant 1.000000e+00 : f32
    %718 = vector.broadcast %cst_147 : f32 to vector<2x16xf32>
    %719 = arith.subf %718, %717 : vector<2x16xf32>
    %720 = arith.mulf %719, %708 : vector<2x16xf32>
    %721 = vector.extract_strided_slice %692 {offsets = [0, 16], sizes = [2, 16], strides = [1, 1]} : vector<2x32xf32> to vector<2x16xf32>
    %722 = vector.extract_strided_slice %669 {offsets = [0, 16], sizes = [2, 16], strides = [1, 1]} : vector<2x32xf32> to vector<2x16xf32>
    %723 = arith.mulf %721, %722 : vector<2x16xf32>
    %724 = arith.addf %720, %723 : vector<2x16xf32>
    %c0_148 = arith.constant 0 : index
    %c2_149 = arith.constant 2 : index
    %c0_150 = arith.constant 0 : index
    %725 = vector.load %arg19[%c0_148, %c2_149, %c0_150] : memref<2x4x32xf32, #tpu.memory_space<vmem>>, vector<2x1x16xf32>
    %726 = vector.shape_cast %725 : vector<2x1x16xf32> to vector<2x16xf32>
    %727 = vector.shape_cast %716 : vector<2x16xf32> to vector<2x1x16xf32>
    tpu.vector_store %arg19[%c0_148, %c2_149, %c0_150], %727 {strides = array<i32>} : memref<2x4x32xf32, #tpu.memory_space<vmem>>, vector<2x1x16xf32>,
    %c0_151 = arith.constant 0 : index
    %c1_152 = arith.constant 1 : index
    %c16_153 = arith.constant 16 : index
    %728 = vector.load %arg19[%c0_151, %c1_152, %c16_153] : memref<2x4x32xf32, #tpu.memory_space<vmem>>, vector<2x1x16xf32>
    %729 = vector.shape_cast %728 : vector<2x1x16xf32> to vector<2x16xf32>
    %730 = vector.shape_cast %724 : vector<2x16xf32> to vector<2x1x16xf32>
    tpu.vector_store %arg19[%c0_151, %c1_152, %c16_153], %730 {strides = array<i32>} : memref<2x4x32xf32, #tpu.memory_space<vmem>>, vector<2x1x16xf32>,
    %731 = tpu.concatenate %716, %724 in 1 : vector<2x16xf32>, vector<2x16xf32> -> vector<2x32xf32>
    %cst_154 = arith.constant dense<0.000000e+00> : vector<2x96xf32>
    %732 = tpu.matmul %731, %534, %cst_154 {dimension_numbers = #tpu.dot_dimension_numbers<[1], [0], [0], [1], [0, 0, 1, 1], [], []>} : vector<2x32xf32>, vector<32x96xf32>, vector<2x96xf32> -> vector<2x96xf32>
    %733 = vector.extract_strided_slice %542 {offsets = [3, 0, 0], sizes = [1, 2, 48], strides = [1, 1, 1]} : vector<4x2x96xf32> to vector<1x2x48xf32>
    %734 = vector.shape_cast %733 : vector<1x2x48xf32> to vector<2x48xf32>
    %735 = vector.extract_strided_slice %542 {offsets = [0, 0, 48], sizes = [1, 2, 48], strides = [1, 1, 1]} : vector<4x2x96xf32> to vector<1x2x48xf32>
    %736 = vector.shape_cast %735 : vector<1x2x48xf32> to vector<2x48xf32>
    %737 = vector.extract_strided_slice %732 {offsets = [0, 0], sizes = [2, 48], strides = [1, 1]} : vector<2x96xf32> to vector<2x48xf32>
    %738 = vector.extract_strided_slice %732 {offsets = [0, 48], sizes = [2, 48], strides = [1, 1]} : vector<2x96xf32> to vector<2x48xf32>
    %739 = vector.extract_strided_slice %734 {offsets = [0, 0], sizes = [2, 32], strides = [1, 1]} : vector<2x48xf32> to vector<2x32xf32>
    %740 = vector.extract_strided_slice %737 {offsets = [0, 0], sizes = [2, 32], strides = [1, 1]} : vector<2x48xf32> to vector<2x32xf32>
    %741 = arith.addf %739, %740 : vector<2x32xf32>
    %742 = arith.negf %741 : vector<2x32xf32>
    %743 = math.exp %742 : vector<2x32xf32>
    %cst_155 = arith.constant 1.000000e+00 : f32
    %744 = vector.broadcast %cst_155 : f32 to vector<2x32xf32>
    %745 = arith.addf %744, %743 : vector<2x32xf32>
    %746 = arith.divf %744, %745 : vector<2x32xf32>
    %747 = vector.extract_strided_slice %736 {offsets = [0, 0], sizes = [2, 32], strides = [1, 1]} : vector<2x48xf32> to vector<2x32xf32>
    %748 = vector.extract_strided_slice %738 {offsets = [0, 0], sizes = [2, 32], strides = [1, 1]} : vector<2x48xf32> to vector<2x32xf32>
    %749 = arith.addf %747, %748 : vector<2x32xf32>
    %750 = arith.negf %749 : vector<2x32xf32>
    %751 = math.exp %750 : vector<2x32xf32>
    %cst_156 = arith.constant 1.000000e+00 : f32
    %752 = vector.broadcast %cst_156 : f32 to vector<2x32xf32>
    %753 = arith.addf %752, %751 : vector<2x32xf32>
    %754 = arith.divf %752, %753 : vector<2x32xf32>
    %755 = vector.extract_strided_slice %734 {offsets = [0, 32], sizes = [2, 16], strides = [1, 1]} : vector<2x48xf32> to vector<2x16xf32>
    %756 = vector.extract_strided_slice %746 {offsets = [0, 0], sizes = [2, 16], strides = [1, 1]} : vector<2x32xf32> to vector<2x16xf32>
    %757 = vector.extract_strided_slice %737 {offsets = [0, 32], sizes = [2, 16], strides = [1, 1]} : vector<2x48xf32> to vector<2x16xf32>
    %758 = vector.extract_strided_slice %544 {offsets = [0, 0], sizes = [2, 16], strides = [1, 1]} : vector<2x32xf32> to vector<2x16xf32>
    %759 = arith.addf %757, %758 : vector<2x16xf32>
    %760 = arith.mulf %756, %759 : vector<2x16xf32>
    %761 = arith.addf %755, %760 : vector<2x16xf32>
    %762 = math.tanh %761 : vector<2x16xf32>
    %763 = vector.extract_strided_slice %736 {offsets = [0, 32], sizes = [2, 16], strides = [1, 1]} : vector<2x48xf32> to vector<2x16xf32>
    %764 = vector.extract_strided_slice %754 {offsets = [0, 0], sizes = [2, 16], strides = [1, 1]} : vector<2x32xf32> to vector<2x16xf32>
    %765 = vector.extract_strided_slice %738 {offsets = [0, 32], sizes = [2, 16], strides = [1, 1]} : vector<2x48xf32> to vector<2x16xf32>
    %766 = vector.extract_strided_slice %544 {offsets = [0, 16], sizes = [2, 16], strides = [1, 1]} : vector<2x32xf32> to vector<2x16xf32>
    %767 = arith.addf %765, %766 : vector<2x16xf32>
    %768 = arith.mulf %764, %767 : vector<2x16xf32>
    %769 = arith.addf %763, %768 : vector<2x16xf32>
    %770 = math.tanh %769 : vector<2x16xf32>
    %771 = vector.extract_strided_slice %746 {offsets = [0, 16], sizes = [2, 16], strides = [1, 1]} : vector<2x32xf32> to vector<2x16xf32>
    %cst_157 = arith.constant 1.000000e+00 : f32
    %772 = vector.broadcast %cst_157 : f32 to vector<2x16xf32>
    %773 = arith.subf %772, %771 : vector<2x16xf32>
    %774 = arith.mulf %773, %762 : vector<2x16xf32>
    %775 = vector.extract_strided_slice %746 {offsets = [0, 16], sizes = [2, 16], strides = [1, 1]} : vector<2x32xf32> to vector<2x16xf32>
    %776 = vector.extract_strided_slice %731 {offsets = [0, 0], sizes = [2, 16], strides = [1, 1]} : vector<2x32xf32> to vector<2x16xf32>
    %777 = arith.mulf %775, %776 : vector<2x16xf32>
    %778 = arith.addf %774, %777 : vector<2x16xf32>
    %779 = vector.extract_strided_slice %754 {offsets = [0, 16], sizes = [2, 16], strides = [1, 1]} : vector<2x32xf32> to vector<2x16xf32>
    %cst_158 = arith.constant 1.000000e+00 : f32
    %780 = vector.broadcast %cst_158 : f32 to vector<2x16xf32>
    %781 = arith.subf %780, %779 : vector<2x16xf32>
    %782 = arith.mulf %781, %770 : vector<2x16xf32>
    %783 = vector.extract_strided_slice %754 {offsets = [0, 16], sizes = [2, 16], strides = [1, 1]} : vector<2x32xf32> to vector<2x16xf32>
    %784 = vector.extract_strided_slice %731 {offsets = [0, 16], sizes = [2, 16], strides = [1, 1]} : vector<2x32xf32> to vector<2x16xf32>
    %785 = arith.mulf %783, %784 : vector<2x16xf32>
    %786 = arith.addf %782, %785 : vector<2x16xf32>
    %c0_159 = arith.constant 0 : index
    %c3_160 = arith.constant 3 : index
    %c0_161 = arith.constant 0 : index
    %787 = vector.load %arg19[%c0_159, %c3_160, %c0_161] : memref<2x4x32xf32, #tpu.memory_space<vmem>>, vector<2x1x16xf32>
    %788 = vector.shape_cast %787 : vector<2x1x16xf32> to vector<2x16xf32>
    %789 = vector.shape_cast %778 : vector<2x16xf32> to vector<2x1x16xf32>
    tpu.vector_store %arg19[%c0_159, %c3_160, %c0_161], %789 {strides = array<i32>} : memref<2x4x32xf32, #tpu.memory_space<vmem>>, vector<2x1x16xf32>,
    %c0_162 = arith.constant 0 : index
    %c0_163 = arith.constant 0 : index
    %c16_164 = arith.constant 16 : index
    %790 = vector.load %arg19[%c0_162, %c0_163, %c16_164] : memref<2x4x32xf32, #tpu.memory_space<vmem>>, vector<2x1x16xf32>
    %791 = vector.shape_cast %790 : vector<2x1x16xf32> to vector<2x16xf32>
    %792 = vector.shape_cast %786 : vector<2x16xf32> to vector<2x1x16xf32>
    tpu.vector_store %arg19[%c0_162, %c0_163, %c16_164], %792 {strides = array<i32>} : memref<2x4x32xf32, #tpu.memory_space<vmem>>, vector<2x1x16xf32>,
    %c0_165 = arith.constant 0 : index
    %c0_166 = arith.constant 0 : index
    %c0_167 = arith.constant 0 : index
    %793 = vector.load %arg19[%c0_165, %c0_166, %c0_167] : memref<2x4x32xf32, #tpu.memory_space<vmem>>, vector<2x4x32xf32>
    %794 = vector.shape_cast %793 : vector<2x4x32xf32> to vector<8x32xf32>
    %cst_168 = arith.constant dense<0.000000e+00> : vector<8x32xf32>
    %795 = tpu.matmul %794, %536, %cst_168 {dimension_numbers = #tpu.dot_dimension_numbers<[1], [0], [0], [1], [0, 0, 1, 1], [], []>} : vector<8x32xf32>, vector<32x32xf32>, vector<8x32xf32> -> vector<8x32xf32>
    %796 = vector.broadcast %537 : vector<1x32xf32> to vector<8x32xf32>
    %797 = arith.addf %795, %796 : vector<8x32xf32>
    %798 = math.tanh %797 : vector<8x32xf32>
    %cst_169 = arith.constant dense<0.000000e+00> : vector<8x1xf32>
    %799 = tpu.matmul %798, %538, %cst_169 {dimension_numbers = #tpu.dot_dimension_numbers<[1], [0], [0], [1], [0, 0, 1, 1], [], []>} : vector<8x32xf32>, vector<32x1xf32>, vector<8x1xf32> -> vector<8x1xf32>
    %800 = vector.shape_cast %799 : vector<8x1xf32> to vector<2x4xf32>
    %cst_170 = arith.constant dense<0xFF800000> : vector<2xf32>
    %801 = vector.multi_reduction <maximumf>, %800, %cst_170 [1] : vector<2x4xf32> to vector<2xf32>
    %802 = vector.shape_cast %801 : vector<2xf32> to vector<2x1xf32>
    %803 = vector.broadcast %802 : vector<2x1xf32> to vector<2x4xf32>
    %804 = arith.subf %800, %803 : vector<2x4xf32>
    %805 = math.exp %804 : vector<2x4xf32>
    %cst_171 = arith.constant dense<0.000000e+00> : vector<2xf32>
    %806 = vector.multi_reduction <add>, %805, %cst_171 [1] : vector<2x4xf32> to vector<2xf32>
    %807 = vector.shape_cast %806 : vector<2xf32> to vector<2x1xf32>
    %808 = tpu.reciprocal %807 {approx = true} : vector<2x1xf32> -> vector<2x1xf32>
    %809 = vector.shape_cast %805 : vector<2x4xf32> to vector<2x1x4xf32>
    "tpu.trace_start"() <{level = 10 : i32, message = "nqt,ntd->nqd"}> : () -> ()
    %cst_172 = arith.constant dense<0.000000e+00> : vector<2x1x32xf32>
    %810 = tpu.matmul %809, %793, %cst_172 {dimension_numbers = #tpu.dot_dimension_numbers<[2], [1], [1], [2], [0, 0, 0, 1, 1, 2], [0], [0]>} : vector<2x1x4xf32>, vector<2x4x32xf32>, vector<2x1x32xf32> -> vector<2x1x32xf32>
    "tpu.trace_stop"() : () -> ()
    %811 = vector.shape_cast %810 : vector<2x1x32xf32> to vector<2x32xf32>
    %812 = vector.broadcast %808 : vector<2x1xf32> to vector<2x32xf32>
    %813 = arith.mulf %811, %812 : vector<2x32xf32>
    %c0_173 = arith.constant 0 : index
    %c0_174 = arith.constant 0 : index
    %814 = vector.load %arg15[%c0_173, %c0_174] : memref<32x128xf32, #tpu.memory_space<vmem>>, vector<32x128xf32>
    %cst_175 = arith.constant dense<0.000000e+00> : vector<2x128xf32>
    %815 = tpu.matmul %813, %814, %cst_175 {dimension_numbers = #tpu.dot_dimension_numbers<[1], [0], [0], [1], [0, 0, 1, 1], [], []>} : vector<2x32xf32>, vector<32x128xf32>, vector<2x128xf32> -> vector<2x128xf32>
    %c0_176 = arith.constant 0 : index
    %c0_177 = arith.constant 0 : index
    %816 = vector.load %arg16[%c0_176, %c0_177] : memref<1x128xf32, #tpu.memory_space<vmem>>, vector<1x128xf32>
    %817 = vector.broadcast %816 : vector<1x128xf32> to vector<2x128xf32>
    %818 = arith.addf %815, %817 : vector<2x128xf32>
    %c0_178 = arith.constant 0 : index
    %c0_179 = arith.constant 0 : index
    %819 = vector.load %arg17[%c0_178, %c0_179] : memref<2x128xf32, #tpu.memory_space<vmem>>, vector<2x128xf32>
    tpu.vector_store %arg17[%c0_178, %c0_179], %818 {strides = array<i32>} : memref<2x128xf32, #tpu.memory_space<vmem>>, vector<2x128xf32>,
    return
  }
}

</mosaic_0001>

<bundles_post_ra>
// kernel: _lambda_.1
= control target key start
LH: loop header
LB: loop body
LE: loop exit
PB: predicated region body
PF: predicated region fallthrough
CT: control target
= control target key end

     0   :  { %s8440_s0 = inlined_call_operand.vmem [shape: f32[8,8,16], index: 0, kind: input, shape index: {}]   ;;  %s8441_s1 = inlined_call_operand.vmem [shape: f32[16,96], index: 1, kind: input, shape index: {}]   ;;  %s8442_s2 = inlined_call_operand.vmem [shape: f32[1,96], index: 2, kind: input, shape index: {}]   ;;  %s8443_s3 = inlined_call_operand.vmem [shape: f32[32,96], index: 3, kind: input, shape index: {}]   ;;  %s8444_s4 = inlined_call_operand.vmem [shape: f32[1,32], index: 4, kind: input, shape index: {}]   ;;  %s8445_s5 = inlined_call_operand.vmem [shape: f32[32,32], index: 5, kind: input, shape index: {}]   ;;  %s8446_s6 = inlined_call_operand.vmem [shape: f32[1,32], index: 6, kind: input, shape index: {}]   ;;  %s8447_s7 = inlined_call_operand.vmem [shape: f32[32,1], index: 7, kind: input, shape index: {}]   ;;  %s8448_s8 = inlined_call_operand.vmem [shape: f32[32,96], index: 8, kind: input, shape index: {}]   ;;  %s8449_s9 = inlined_call_operand.vmem [shape: f32[1,96], index: 9, kind: input, shape index: {}]   ;;  %s8450_s10 = inlined_call_operand.vmem [shape: f32[32,96], index: 10, kind: input, shape index: {}]   ;;  %s8451_s11 = inlined_call_operand.vmem [shape: f32[1,32], index: 11, kind: input, shape index: {}]   ;;  %s8452_s12 = inlined_call_operand.vmem [shape: f32[32,32], index: 12, kind: input, shape index: {}]   ;;  %s8453_s13 = inlined_call_operand.vmem [shape: f32[1,32], index: 13, kind: input, shape index: {}]   ;;  %s8454_s14 = inlined_call_operand.vmem [shape: f32[32,1], index: 14, kind: input, shape index: {}]   ;;  %s8455_s15 = inlined_call_operand.vmem [shape: f32[32,128], index: 15, kind: input, shape index: {}]   ;;  %s8456_s16 = inlined_call_operand.vmem [shape: f32[1,128], index: 16, kind: input, shape index: {}]   ;;  %s8457_s17 = inlined_call_operand.hbm [shape: f32[2,128], index: 17, kind: output, shape index: {}]  }
   0x1   :  { %8460 = sst [smem:[#allocation7_spill]] %s8440_s0 }
   0x2   :  { %8461 = sst [smem:[#allocation8_spill]] %s8441_s1 }
   0x3   :  { %s8462_s26 = sld [smem:[#allocation8_spill]]  ;;  %v68_v2 = vld [vmem:[%s8443_s3] sm:$0xff]  ;;  %vm88_vm0 = vcmask 130048   ;;  %v6615_v3 = vmov 0.0|0.0   ;;  %v69_v5 = vld [vmem:[%s8443_s3 + $0x8] sm:$0xff]  ;;  %s8463_s20 = sld [smem:[#allocation7_spill]] }
   0x4   :  { %6275 = vmatprep.subr.bf16.mxu1 %v6615_v3  ;;  %v6736_v7 = vpack.c.bf16 %v69_v5, %v68_v2  ;;  %v70_v8 = vld [vmem:[%s8443_s3 + $0x10] sm:$0xff]  ;;  %v71_v9 = vld [vmem:[%s8443_s3 + $0x18] sm:$0xff]  ;;  %vm6616_vm1 = vmmov 0   ;;  %v6617_v10 = vmov 0.0   ;;  %v5785_v13 = vld [vmem:[%s8444_s4] ss:$0 sm:$0xff] }
   0x5   :  { %6013 = vmatprep.mubr.msk.f32.mxu1 %vm6616_vm1, %v6617_v10  ;;  %v6751_v12 = vpack.c.bf16 %v71_v9, %v70_v8  ;;  %s6618_s0 = smov 32  }
   0x6   :  { %6277 = vmatpush3.bf16.msra.mxu1 %v6736_v7  ;;  %311 = vrot.lane.b32.xlu0 %v5785_v13, %s6618_s0 }
   0x7   :  { %6278 = vmatprep.subr.bf16.mxu1 %v6615_v3 }
   0x9   :  { %v65_v0 = vld [vmem:[%s8462_s26] sm:$0xff]  ;;  %v66_v1 = vld [vmem:[%s8462_s26 + $0x8] sm:$0xff]  ;;  %v59_v14 = vld [vmem:[%s8463_s20 + $0x10] sm:$0xff] }
   0xa   :  { %v6271_v4 = vpack.c.bf16 %v66_v1, %v65_v0  ;;  %v57_v6 = vld [vmem:[%s8463_s20] sm:$0xff]  ;;  %v58_v11 = vld [vmem:[%s8463_s20 + $0x8] sm:$0xff] }
   0xb   :  { %5993 = vmatprep.mubr.msk.f32.mxu0 %vm88_vm0, %v57_v6 }
   0xc   :  { %6272 = vmatprep.subr.bf16.mxu0 %v6271_v4 }
   0xd   :  { %6274 = vmatpush3.bf16.msra.mxu0 %v6271_v4 }
   0xe   :  { %22 = vsyncpa [#allocation5], 0  ;;  %6287 = vmatprep.subr.bf16.mxu0 %v6615_v3  ;;  %6280 = vmatpush3.bf16.msra.mxu1 %v6751_v12  ;;  %v60_v15 = vld [vmem:[%s8463_s20 + $0x18] sm:$0xff]  ;;  %v61_v16 = vld [vmem:[%s8463_s20 + $0x20] sm:$0xff]  ;;  %s6619_s1 = smov 64   ;;  %s6622_s3 = smov 80  }
   0xf   :  { %326 = vrot.lane.b32.xlu0 %v5785_v13, %s6619_s1  ;;  %6281 = vmatprep.subr.bf16.mxu1 %v6615_v3  ;;  %v62_v17 = vld [vmem:[%s8463_s20 + $0x28] sm:$0xff]  ;;  %v63_v18 = vld [vmem:[%s8463_s20 + $0x30] sm:$0xff]  ;;  %v64_v19 = vld [vmem:[%s8463_s20 + $0x38] sm:$0xff]  ;;  %s6620_s20 = smov 96   ;;  %vm218_vm2 = vcmask 261120   ;;  %s6623_s29 = smov 16  }
  0x10   :  { %5994 = vmatmul.mubr.msk.f32.vlgmr.msra.gmra.mrb[0].mxu0 %vm88_vm0, %v58_v11  ;;  %v5774_v22 = vld [vmem:[%s8442_s2] ss:$0 sm:$0xff]  ;;  %s6621_s2 = smov 112   ;;  %s6624_s30 = smov 48   ;;  %vm463_vm3 = vcmask 122880   ;;  %vm578_vm4 = vcmask 254080  }
  0x11   :  { %5996 = vmatprep.mubr.msk.f32.mxu0 %vm88_vm0, %v59_v14  ;;  %6289 = vmatpush3.bf16.msra.mxu0 %v6736_v7  ;;  %vm3509_vm5 = vcmask 1041409   ;;  %vm3511_vm6 = vcmask 1042434   ;;  %vm3513_vm7 = vcmask 1043459   ;;  %vm3515_vm8 = vcmask 1044484  }
  0x12   :  { %6014 = vmatmul.mubr.f32.vlgmr.msra.gmra.mrb[0].mxu1 %v6617_v10  ;;  %6290 = vmatprep.subr.bf16.mxu0 %v6615_v3  ;;  %vm3517_vm9 = vcmask 1045509   ;;  %vm3519_vm10 = vcmask 1046534   ;;  %vm3521_vm11 = vcmask 1047559   ;;  %vm3524_vm12 = vcmask 64512  }
  0x13   :  { %6283 = vmatpush3.bf16.msra.mxu1 %v6736_v7  ;;  %6024 = vmatprep.mubr.msk.f32.mxu1 %vm6616_vm1, %v6617_v10  ;;  %vm5519_vm13 = vcmask 1043456   ;;  %vm5460_vm14 = vcmask 25600   ;;  %vm5516_vm15 = vcmask 31744  }
  0x14   :  { %5997 = vmatmul.mubr.msk.f32.gmra.mrb[2].mxu0 %vm88_vm0, %v60_v15  ;;  %6284 = vmatprep.subr.bf16.mxu1 %v6615_v3 }
  0x15   :  { %5999 = vmatprep.mubr.msk.f32.mxu0 %vm88_vm0, %v61_v16  ;;  %6292 = vmatpush3.bf16.msra.mxu0 %v6751_v12 }
  0x16   :  { %6299 = vmatprep.subr.bf16.mxu0 %v6615_v3 }
  0x17   :  { %6286 = vmatpush3.bf16.msra.mxu1 %v6751_v12 }
  0x18   :  { %6000 = vmatmul.mubr.msk.f32.gmra.mrb[4].mxu0 %vm88_vm0, %v62_v17  ;;  %6293 = vmatprep.subr.bf16.mxu1 %v6615_v3 }
  0x19   :  { %6002 = vmatprep.mubr.msk.f32.mxu0 %vm88_vm0, %v63_v18 }
  0x1c   :  { %6003 = vmatmul.mubr.msk.f32.gmra.mrb[6].mxu0 %vm88_vm0, %v64_v19 }
  0x1d   :  { %6035 = vmatprep.mubr.msk.f32.mxu0 %vm6616_vm1, %v6617_v10 }
  0x78   :  { %v6800_v20 = vpop.permute.xlu0 %311 }
  0x81   :  { %v6810_v31 = vpop.permute.xlu0 %326 }
  0xe3   :  { %v5995_v21 = vpop.f32.mrb[0].mxu0 }
  0xe4   :  { %v6805_v23 = vadd.f32 %v5995_v21, %v5774_v22  ;;  %v179_v24 = vpop.f32.mrb[1].mxu0 }
  0xe5   :  { %v288_v25 = vpop.f32.mrb[0].mxu1  ;;  %v6823_v41 = vadd.f32 %v5774_v22, %v179_v24 }
  0xe6   :  { %v6015_v27 = vpop.f32.mrb[1].mxu1  ;;  %v314_v28 = vadd.f32 %v6800_v20, %v288_v25  ;;  %v329_v34 = vadd.f32 %v6810_v31, %v288_v25 }
  0xe7   :  { %v5998_v26 = vpop.f32.mrb[2].mxu0  ;;  %v292_v42 = vadd.f32 %v288_v25, %v6823_v41 }
  0xe8   :  { %v6808_v29 = vadd.f32 %v5998_v26, %v5774_v22  ;;  %v189_v30 = vpop.f32.mrb[3].mxu0  ;;  %316 = vrot.lane.b32.xlu1 %v314_v28, %s6620_s20 }
  0xe9   :  { %v6812_v32 = vadd.f32 %v5774_v22, %v189_v30  ;;  %v5783_v44 = vmul.f32 -1.442695, %v292_v42 }
  0xeb   :  { %v6001_v33 = vpop.f32.mrb[4].mxu0  ;;  %6405 = vpow2.f32 %v5783_v44 }
  0xec   :  { %v6816_v35 = vadd.f32 %v6001_v33, %v5774_v22  ;;  %v199_v36 = vpop.f32.mrb[5].mxu0  ;;  %331 = vrot.lane.b32.xlu1 %v329_v34, %s6620_s20 }
  0xed   :  { %v6818_v37 = vadd.f32 %v5774_v22, %v199_v36 }
  0xef   :  { %v6004_v38 = vpop.f32.mrb[6].mxu0 }
  0xf0   :  { %v209_v39 = vpop.f32.mrb[7].mxu0  ;;  %v6826_v43 = vadd.f32 %v6004_v38, %v5774_v22 }
  0xf1   :  { %v6821_v40 = vadd.f32 %v5774_v22, %v209_v39 }
  0xf2   :  { %v299_v45 = vadd.f32 %v288_v25, %v6826_v43 }
  0xf4   :  { %v5784_v46 = vmul.f32 -1.442695, %v299_v45 }
  0xf5   :  { %v6406_v47 = vpop.eup %6405 }
  0xf6   :  { %6407 = vpow2.f32 %v5784_v46  ;;  %v296_v48 = vadd.f32 1.0, %v6406_v47 }
  0xf8   :  { %6409 = vrcp.f32 %v296_v48 }
 0x100   :  { %v6408_v49 = vpop.eup %6407 }
 0x101   :  { %v303_v50 = vadd.f32 1.0, %v6408_v49 }
 0x102   :  { %v6410_v51 = vpop.eup %6409 }
 0x103   :  { %6411 = vrcp.f32 %v303_v50  ;;  %v341_v63 = vsub.f32 1.0, %v6410_v51  ;;  %v347_v1 = vmul.f32 0.0, %v6410_v51 }
 0x10d   :  { %v6412_v54 = vpop.eup %6411 }
 0x10e   :  { %v349_v5 = vsub.f32 1.0, %v6412_v54  ;;  %v355_v8 = vmul.f32 0.0, %v6412_v54 }
 0x15a   :  { %v317_v52 = vpop.permute.xlu1 %316 }
 0x15b   :  { %v319_v53 = vmul.f32 %v6410_v51, %v317_v52 }
 0x15d   :  { %321 = vrot.lane.b32.xlu0 %v319_v53, %s6618_s0 }
 0x15e   :  { %v332_v55 = vpop.permute.xlu1 %331 }
 0x15f   :  { %v334_v56 = vmul.f32 %v6412_v54, %v332_v55 }
 0x161   :  { %336 = vrot.lane.b32.xlu1 %v334_v56, %s6618_s0 }
 0x1cf   :  { %v322_v57 = vpop.permute.xlu0 %321 }
 0x1d0   :  { %v324_v58 = vadd.f32 %v322_v57, %v6823_v41 }
 0x1d2   :  { %6413 = vtanh.f32 %v324_v58 }
 0x1d3   :  { %v337_v59 = vpop.permute.xlu1 %336 }
 0x1d4   :  { %v339_v60 = vadd.f32 %v337_v59, %v6826_v43 }
 0x1d6   :  { %6415 = vtanh.f32 %v339_v60 }
 0x1dc   :  { %v6414_v61 = vpop.eup %6413 }
 0x1dd   :  { %343 = vrot.lane.b32.xlu0 %v6414_v61, %s6621_s2 }
 0x1e0   :  { %v6416_v62 = vpop.eup %6415 }
 0x1e1   :  { %351 = vrot.lane.b32.xlu1 %v6416_v62, %s6621_s2 }
 0x24f   :  { %v344_v0 = vpop.permute.xlu0 %343 }
 0x250   :  { %v346_v2 = vmul.f32 %v344_v0, %v341_v63 }
 0x252   :  { %v6835_v4 = vadd.f32 %v347_v1, %v346_v2 }
 0x253   :  { %v352_v6 = vpop.permute.xlu1 %351 }
 0x254   :  { %v354_v9 = vmul.f32 %v352_v6, %v349_v5  ;;  %587 = vrot.lane.b32.xlu0 %v6835_v4, %s6621_s2 }
 0x256   :  { %v6839_v11 = vadd.f32 %v355_v8, %v354_v9 }
 0x258   :  { %590 = vrot.lane.b32.xlu1 %v6839_v11, %s6622_s3 }
 0x2c6   :  { %v588_v13 = vpop.permute.xlu0 %587 }
 0x2ca   :  { %v591_v14 = vpop.permute.xlu1 %590 }
 0x2cb   :  { %v593_v15 = vsel %vm88_vm0, %v588_v13, %v591_v14 }
 0x2cc   :  { %6025 = vmatmul.mubr.msk.f32.vlgmr.msra.gmra.mrb[2].mxu1 %vm218_vm2, %v593_v15 }
 0x2cd   :  { %6295 = vmatpush3.bf16.msra.mxu1 %v6736_v7  ;;  %6046 = vmatprep.mubr.msk.f32.mxu1 %vm6616_vm1, %v6617_v10 }
 0x2ce   :  { %6296 = vmatprep.subr.bf16.mxu1 %v6615_v3 }
 0x2d1   :  { %6298 = vmatpush3.bf16.msra.mxu1 %v6751_v12 }
 0x2d2   :  { %6305 = vmatprep.subr.bf16.mxu1 %v6615_v3 }
 0x39f   :  { %v663_v16 = vpop.f32.mrb[2].mxu1 }
 0x3a0   :  { %v6026_v17 = vpop.f32.mrb[3].mxu1  ;;  %v693_v18 = vadd.f32 %v663_v16, %v6810_v31  ;;  %v681_v19 = vadd.f32 %v663_v16, %v6800_v20  ;;  %v667_v21 = vadd.f32 %v663_v16, %v6805_v23  ;;  %v674_v22 = vadd.f32 %v663_v16, %v6821_v40 }
 0x3a2   :  { %695 = vrot.lane.b32.xlu1 %v693_v18, %s6620_s20  ;;  %683 = vrot.lane.b32.xlu0 %v681_v19, %s6620_s20  ;;  %v5787_v24 = vmul.f32 -1.442695, %v667_v21  ;;  %v5788_v25 = vmul.f32 -1.442695, %v674_v22 }
 0x3a4   :  { %6417 = vpow2.f32 %v5787_v24 }
 0x3a5   :  { %6419 = vpow2.f32 %v5788_v25 }
 0x3ae   :  { %v6418_v26 = vpop.eup %6417 }
 0x3af   :  { %v6420_v27 = vpop.eup %6419  ;;  %v671_v28 = vadd.f32 1.0, %v6418_v26 }
 0x3b0   :  { %v678_v30 = vadd.f32 1.0, %v6420_v27 }
 0x3b1   :  { %6421 = vrcp.f32 %v671_v28 }
 0x3b2   :  { %6423 = vrcp.f32 %v678_v30 }
 0x3bb   :  { %v6422_v33 = vpop.eup %6421 }
 0x3bc   :  { %v6424_v34 = vpop.eup %6423  ;;  %v705_v51 = vsub.f32 1.0, %v6422_v33 }
 0x3bd   :  { %v716_v57 = vsub.f32 1.0, %v6424_v34 }
 0x414   :  { %v696_v36 = vpop.permute.xlu1 %695  ;;  %v684_v38 = vpop.permute.xlu0 %683 }
 0x415   :  { %v698_v39 = vmul.f32 %v6424_v34, %v696_v36  ;;  %v686_v42 = vmul.f32 %v6422_v33, %v684_v38 }
 0x417   :  { %700 = vrot.lane.b32.xlu1 %v698_v39, %s6618_s0  ;;  %688 = vrot.lane.b32.xlu0 %v686_v42, %s6618_s0 }
 0x41b   :  { %711 = vrot.lane.b32.xlu1 %v593_v15, %s6623_s29 }
 0x41f   :  { %722 = vrot.lane.b32.xlu1 %v593_v15, %s6624_s30 }
 0x489   :  { %v689_v44 = vpop.permute.xlu0 %688  ;;  %v701_v45 = vpop.permute.xlu1 %700 }
 0x48a   :  { %v691_v46 = vadd.f32 %v689_v44, %v6805_v23  ;;  %v703_v47 = vadd.f32 %v701_v45, %v6821_v40 }
 0x48c   :  { %6425 = vtanh.f32 %v691_v46 }
 0x48d   :  { %6427 = vtanh.f32 %v703_v47  ;;  %v712_v50 = vpop.permute.xlu1 %711 }
 0x48e   :  { %v714_v53 = vmul.f32 %v6422_v33, %v712_v50 }
 0x491   :  { %v723_v55 = vpop.permute.xlu1 %722 }
 0x492   :  { %v725_v59 = vmul.f32 %v6424_v34, %v723_v55 }
 0x496   :  { %v6426_v48 = vpop.eup %6425 }
 0x497   :  { %707 = vrot.lane.b32.xlu0 %v6426_v48, %s6621_s2  ;;  %v6428_v49 = vpop.eup %6427 }
 0x49b   :  { %718 = vrot.lane.b32.xlu0 %v6428_v49, %s6621_s2 }
 0x509   :  { %v708_v52 = vpop.permute.xlu0 %707 }
 0x50a   :  { %v710_v54 = vmul.f32 %v708_v52, %v705_v51 }
 0x50c   :  { %v6865_v56 = vadd.f32 %v714_v53, %v710_v54 }
 0x50d   :  { %v719_v58 = vpop.permute.xlu0 %718 }
 0x50e   :  { %v721_v60 = vmul.f32 %v719_v58, %v716_v57  ;;  %955 = vrot.lane.b32.xlu0 %v6865_v56, %s6621_s2 }
 0x510   :  { %v6869_v61 = vadd.f32 %v725_v59, %v721_v60 }
 0x512   :  { %958 = vrot.lane.b32.xlu1 %v6869_v61, %s6622_s3 }
 0x580   :  { %v956_v62 = vpop.permute.xlu0 %955 }
 0x584   :  { %v959_v63 = vpop.permute.xlu1 %958 }
 0x585   :  { %v961_v0 = vsel %vm88_vm0, %v956_v62, %v959_v63 }
 0x586   :  { %6036 = vmatmul.mubr.msk.f32.vlgmr.msra.gmra.mrb[8].mxu0 %vm218_vm2, %v961_v0 }
 0x587   :  { %6301 = vmatpush3.bf16.msra.mxu0 %v6736_v7  ;;  %6057 = vmatprep.mubr.msk.f32.mxu0 %vm6616_vm1, %v6617_v10 }
 0x588   :  { %6302 = vmatprep.subr.bf16.mxu0 %v6615_v3 }
 0x58b   :  { %6304 = vmatpush3.bf16.msra.mxu0 %v6751_v12 }
 0x58c   :  { %6311 = vmatprep.subr.bf16.mxu0 %v6615_v3 }
 0x659   :  { %v1031_v1 = vpop.f32.mrb[8].mxu0 }
 0x65a   :  { %v6037_v2 = vpop.f32.mrb[9].mxu0  ;;  %v1061_v5 = vadd.f32 %v1031_v1, %v6810_v31  ;;  %v1049_v6 = vadd.f32 %v1031_v1, %v6800_v20  ;;  %v1035_v8 = vadd.f32 %v1031_v1, %v6812_v32  ;;  %v1042_v9 = vadd.f32 %v1031_v1, %v6816_v35 }
 0x65c   :  { %1063 = vrot.lane.b32.xlu1 %v1061_v5, %s6620_s20  ;;  %1051 = vrot.lane.b32.xlu0 %v1049_v6, %s6620_s20  ;;  %v5790_v13 = vmul.f32 -1.442695, %v1035_v8  ;;  %v5791_v14 = vmul.f32 -1.442695, %v1042_v9 }
 0x65e   :  { %6429 = vpow2.f32 %v5790_v13 }
 0x65f   :  { %6431 = vpow2.f32 %v5791_v14 }
 0x668   :  { %v6430_v15 = vpop.eup %6429 }
 0x669   :  { %v6432_v16 = vpop.eup %6431  ;;  %v1039_v17 = vadd.f32 1.0, %v6430_v15 }
 0x66a   :  { %v1046_v18 = vadd.f32 1.0, %v6432_v16 }
 0x66b   :  { %6433 = vrcp.f32 %v1039_v17 }
 0x66c   :  { %6435 = vrcp.f32 %v1046_v18 }
 0x675   :  { %v6434_v19 = vpop.eup %6433 }
 0x676   :  { %v6436_v21 = vpop.eup %6435  ;;  %v1073_v39 = vsub.f32 1.0, %v6434_v19 }
 0x677   :  { %v1084_v48 = vsub.f32 1.0, %v6436_v21 }
 0x6ce   :  { %v1064_v22 = vpop.permute.xlu1 %1063  ;;  %v1052_v24 = vpop.permute.xlu0 %1051 }
 0x6cf   :  { %v1066_v25 = vmul.f32 %v6436_v21, %v1064_v22  ;;  %v1054_v26 = vmul.f32 %v6434_v19, %v1052_v24 }
 0x6d1   :  { %1068 = vrot.lane.b32.xlu1 %v1066_v25, %s6618_s0  ;;  %1056 = vrot.lane.b32.xlu0 %v1054_v26, %s6618_s0 }
 0x6d5   :  { %1079 = vrot.lane.b32.xlu1 %v961_v0, %s6623_s29 }
 0x6d9   :  { %1090 = vrot.lane.b32.xlu1 %v961_v0, %s6624_s30 }
 0x743   :  { %v1057_v27 = vpop.permute.xlu0 %1056  ;;  %v1069_v28 = vpop.permute.xlu1 %1068 }
 0x744   :  { %v1059_v30 = vadd.f32 %v1057_v27, %v6812_v32  ;;  %v1071_v33 = vadd.f32 %v1069_v28, %v6816_v35 }
 0x746   :  { %6437 = vtanh.f32 %v1059_v30 }
 0x747   :  { %6439 = vtanh.f32 %v1071_v33  ;;  %v1080_v38 = vpop.permute.xlu1 %1079 }
 0x748   :  { %v1082_v44 = vmul.f32 %v6434_v19, %v1080_v38 }
 0x74b   :  { %v1091_v46 = vpop.permute.xlu1 %1090 }
 0x74c   :  { %v1093_v50 = vmul.f32 %v6436_v21, %v1091_v46 }
 0x750   :  { %v6438_v34 = vpop.eup %6437 }
 0x751   :  { %1075 = vrot.lane.b32.xlu0 %v6438_v34, %s6621_s2  ;;  %v6440_v36 = vpop.eup %6439 }
 0x755   :  { %1086 = vrot.lane.b32.xlu0 %v6440_v36, %s6621_s2 }
 0x7c3   :  { %v1076_v42 = vpop.permute.xlu0 %1075 }
 0x7c4   :  { %v1078_v45 = vmul.f32 %v1076_v42, %v1073_v39 }
 0x7c6   :  { %v6895_v47 = vadd.f32 %v1082_v44, %v1078_v45 }
 0x7c7   :  { %v1087_v49 = vpop.permute.xlu0 %1086 }
 0x7c8   :  { %v1089_v51 = vmul.f32 %v1087_v49, %v1084_v48  ;;  %1323 = vrot.lane.b32.xlu0 %v6895_v47, %s6621_s2 }
 0x7ca   :  { %v6899_v52 = vadd.f32 %v1093_v50, %v1089_v51 }
 0x7cc   :  { %1326 = vrot.lane.b32.xlu1 %v6899_v52, %s6622_s3 }
 0x83a   :  { %v1324_v53 = vpop.permute.xlu0 %1323 }
 0x83e   :  { %v1327_v54 = vpop.permute.xlu1 %1326 }
 0x83f   :  { %v1329_v55 = vsel %vm88_vm0, %v1324_v53, %v1327_v54 }
 0x840   :  { %6047 = vmatmul.mubr.msk.f32.vlgmr.msra.gmra.mrb[4].mxu1 %vm218_vm2, %v1329_v55 }
 0x841   :  { %6307 = vmatpush3.bf16.msra.mxu1 %v6736_v7  ;;  %6068 = vmatprep.mubr.msk.f32.mxu1 %vm6616_vm1, %v6617_v10 }
 0x842   :  { %6308 = vmatprep.subr.bf16.mxu1 %v6615_v3 }
 0x845   :  { %6310 = vmatpush3.bf16.msra.mxu1 %v6751_v12 }
 0x846   :  { %6317 = vmatprep.subr.bf16.mxu1 %v6615_v3 }
 0x913   :  { %v1399_v57 = vpop.f32.mrb[4].mxu1 }
 0x914   :  { %v6048_v58 = vpop.f32.mrb[5].mxu1  ;;  %v1429_v59 = vadd.f32 %v1399_v57, %v6810_v31  ;;  %v1417_v60 = vadd.f32 %v1399_v57, %v6800_v20  ;;  %v1403_v62 = vadd.f32 %v1399_v57, %v6808_v29  ;;  %v1410_v63 = vadd.f32 %v1399_v57, %v6818_v37 }
 0x916   :  { %1431 = vrot.lane.b32.xlu1 %v1429_v59, %s6620_s20  ;;  %1419 = vrot.lane.b32.xlu0 %v1417_v60, %s6620_s20  ;;  %v5793_v0 = vmul.f32 -1.442695, %v1403_v62  ;;  %v5794_v1 = vmul.f32 -1.442695, %v1410_v63 }
 0x918   :  { %6441 = vpow2.f32 %v5793_v0 }
 0x919   :  { %6443 = vpow2.f32 %v5794_v1 }
 0x922   :  { %v6442_v2 = vpop.eup %6441 }
 0x923   :  { %v6444_v5 = vpop.eup %6443  ;;  %v1407_v6 = vadd.f32 1.0, %v6442_v2 }
 0x924   :  { %v1414_v8 = vadd.f32 1.0, %v6444_v5 }
 0x925   :  { %6445 = vrcp.f32 %v1407_v6 }
 0x926   :  { %6447 = vrcp.f32 %v1414_v8 }
 0x92f   :  { %v6446_v9 = vpop.eup %6445 }
 0x930   :  { %v6448_v13 = vpop.eup %6447  ;;  %v1441_v27 = vsub.f32 1.0, %v6446_v9 }
 0x931   :  { %v1452_v38 = vsub.f32 1.0, %v6448_v13 }
 0x988   :  { %v1432_v14 = vpop.permute.xlu1 %1431  ;;  %v1420_v15 = vpop.permute.xlu0 %1419 }
 0x989   :  { %v1434_v16 = vmul.f32 %v6448_v13, %v1432_v14  ;;  %v1422_v17 = vmul.f32 %v6446_v9, %v1420_v15 }
 0x98b   :  { %1436 = vrot.lane.b32.xlu1 %v1434_v16, %s6618_s0  ;;  %1424 = vrot.lane.b32.xlu0 %v1422_v17, %s6618_s0 }
 0x98f   :  { %1447 = vrot.lane.b32.xlu1 %v1329_v55, %s6623_s29 }
 0x993   :  { %1458 = vrot.lane.b32.xlu1 %v1329_v55, %s6624_s30 }
 0x9fd   :  { %v1425_v18 = vpop.permute.xlu0 %1424  ;;  %v1437_v19 = vpop.permute.xlu1 %1436 }
 0x9fe   :  { %v1427_v21 = vadd.f32 %v1425_v18, %v6808_v29  ;;  %v1439_v22 = vadd.f32 %v1437_v19, %v6818_v37 }
 0xa00   :  { %6449 = vtanh.f32 %v1427_v21 }
 0xa01   :  { %6451 = vtanh.f32 %v1439_v22  ;;  %v1448_v26 = vpop.permute.xlu1 %1447 }
 0xa02   :  { %v1450_v30 = vmul.f32 %v6446_v9, %v1448_v26 }
 0xa05   :  { %v1459_v34 = vpop.permute.xlu1 %1458 }
 0xa06   :  { %v1461_v42 = vmul.f32 %v6448_v13, %v1459_v34 }
 0xa0a   :  { %v6450_v24 = vpop.eup %6449 }
 0xa0b   :  { %1443 = vrot.lane.b32.xlu0 %v6450_v24, %s6621_s2  ;;  %v6452_v25 = vpop.eup %6451 }
 0xa0f   :  { %1454 = vrot.lane.b32.xlu0 %v6452_v25, %s6621_s2 }
 0xa7d   :  { %v1444_v28 = vpop.permute.xlu0 %1443 }
 0xa7e   :  { %v1446_v33 = vmul.f32 %v1444_v28, %v1441_v27 }
 0xa80   :  { %v6925_v36 = vadd.f32 %v1450_v30, %v1446_v33 }
 0xa81   :  { %v1455_v39 = vpop.permute.xlu0 %1454 }
 0xa82   :  { %v1457_v44 = vmul.f32 %v1455_v39, %v1452_v38  ;;  %1691 = vrot.lane.b32.xlu0 %v6925_v36, %s6621_s2 }
 0xa84   :  { %v6929_v45 = vadd.f32 %v1461_v42, %v1457_v44 }
 0xa86   :  { %1694 = vrot.lane.b32.xlu1 %v6929_v45, %s6622_s3 }
 0xaf4   :  { %v1692_v46 = vpop.permute.xlu0 %1691 }
 0xaf8   :  { %v1695_v48 = vpop.permute.xlu1 %1694 }
 0xaf9   :  { %v1697_v49 = vsel %vm88_vm0, %v1692_v46, %v1695_v48 }
 0xafa   :  { %6058 = vmatmul.mubr.msk.f32.vlgmr.msra.gmra.mrb[10].mxu0 %vm218_vm2, %v1697_v49 }
 0xafb   :  { %6313 = vmatpush3.bf16.msra.mxu0 %v6736_v7  ;;  %6079 = vmatprep.mubr.msk.f32.mxu0 %vm6616_vm1, %v6617_v10 }
 0xafc   :  { %6314 = vmatprep.subr.bf16.mxu0 %v6615_v3 }
 0xaff   :  { %6316 = vmatpush3.bf16.msra.mxu0 %v6751_v12 }
 0xbcd   :  { %v1767_v50 = vpop.f32.mrb[10].mxu0 }
 0xbce   :  { %v6059_v51 = vpop.f32.mrb[11].mxu0  ;;  %v1797_v53 = vadd.f32 %v1767_v50, %v6810_v31  ;;  %v1785_v54 = vadd.f32 %v1767_v50, %v6800_v20  ;;  %v1771_v55 = vadd.f32 %v1767_v50, %v6818_v37  ;;  %v1778_v57 = vadd.f32 %v1767_v50, %v6808_v29 }
 0xbd0   :  { %1799 = vrot.lane.b32.xlu1 %v1797_v53, %s6620_s20  ;;  %1787 = vrot.lane.b32.xlu0 %v1785_v54, %s6620_s20  ;;  %v5796_v58 = vmul.f32 -1.442695, %v1771_v55  ;;  %v5797_v59 = vmul.f32 -1.442695, %v1778_v57 }
 0xbd2   :  { %6453 = vpow2.f32 %v5796_v58 }
 0xbd3   :  { %6455 = vpow2.f32 %v5797_v59 }
 0xbdc   :  { %v6454_v60 = vpop.eup %6453 }
 0xbdd   :  { %v6456_v62 = vpop.eup %6455  ;;  %v1775_v63 = vadd.f32 1.0, %v6454_v60 }
 0xbde   :  { %v1782_v0 = vadd.f32 1.0, %v6456_v62 }
 0xbdf   :  { %6457 = vrcp.f32 %v1775_v63 }
 0xbe0   :  { %6459 = vrcp.f32 %v1782_v0 }
 0xbe9   :  { %v6458_v1 = vpop.eup %6457 }
 0xbea   :  { %v6460_v2 = vpop.eup %6459  ;;  %v1809_v21 = vsub.f32 1.0, %v6458_v1 }
 0xbeb   :  { %v1820_v28 = vsub.f32 1.0, %v6460_v2 }
 0xc42   :  { %v1800_v5 = vpop.permute.xlu1 %1799  ;;  %v1788_v6 = vpop.permute.xlu0 %1787 }
 0xc43   :  { %v1802_v8 = vmul.f32 %v6460_v2, %v1800_v5  ;;  %v1790_v9 = vmul.f32 %v6458_v1, %v1788_v6 }
 0xc45   :  { %1804 = vrot.lane.b32.xlu1 %v1802_v8, %s6618_s0  ;;  %1792 = vrot.lane.b32.xlu0 %v1790_v9, %s6618_s0 }
 0xc49   :  { %1815 = vrot.lane.b32.xlu1 %v1697_v49, %s6623_s29 }
 0xc4d   :  { %1826 = vrot.lane.b32.xlu1 %v1697_v49, %s6624_s30 }
 0xcb7   :  { %v1793_v13 = vpop.permute.xlu0 %1792  ;;  %v1805_v14 = vpop.permute.xlu1 %1804 }
 0xcb8   :  { %v1795_v15 = vadd.f32 %v1793_v13, %v6818_v37  ;;  %v1807_v16 = vadd.f32 %v1805_v14, %v6808_v29 }
 0xcba   :  { %6461 = vtanh.f32 %v1795_v15 }
 0xcbb   :  { %6463 = vtanh.f32 %v1807_v16  ;;  %v1816_v19 = vpop.permute.xlu1 %1815 }
 0xcbc   :  { %v1818_v24 = vmul.f32 %v6458_v1, %v1816_v19 }
 0xcbf   :  { %v1827_v26 = vpop.permute.xlu1 %1826 }
 0xcc0   :  { %v1829_v30 = vmul.f32 %v6460_v2, %v1827_v26 }
 0xcc4   :  { %v6462_v17 = vpop.eup %6461 }
 0xcc5   :  { %1811 = vrot.lane.b32.xlu0 %v6462_v17, %s6621_s2  ;;  %v6464_v18 = vpop.eup %6463 }
 0xcc9   :  { %1822 = vrot.lane.b32.xlu0 %v6464_v18, %s6621_s2 }
 0xd37   :  { %v1812_v22 = vpop.permute.xlu0 %1811 }
 0xd38   :  { %v1814_v25 = vmul.f32 %v1812_v22, %v1809_v21 }
 0xd3a   :  { %v6954_v27 = vadd.f32 %v1818_v24, %v1814_v25 }
 0xd3b   :  { %v1823_v37 = vpop.permute.xlu0 %1822 }
 0xd3c   :  { %v1825_v29 = vmul.f32 %v1823_v37, %v1820_v28  ;;  %2059 = vrot.lane.b32.xlu0 %v6954_v27, %s6621_s2 }
 0xd3e   :  { %v6958_v33 = vadd.f32 %v1829_v30, %v1825_v29 }
 0xd40   :  { %2062 = vrot.lane.b32.xlu1 %v6958_v33, %s6622_s3 }
 0xdae   :  { %v2060_v34 = vpop.permute.xlu0 %2059 }
 0xdb2   :  { %v2063_v38 = vpop.permute.xlu1 %2062 }
 0xdb3   :  { %v2065_v39 = vsel %vm88_vm0, %v2060_v34, %v2063_v38 }
 0xdb4   :  { %6069 = vmatmul.mubr.msk.f32.vlgmr.msra.gmra.mrb[6].mxu1 %vm218_vm2, %v2065_v39 }
 0xdb5   :  { %6319 = vmatpush3.bf16.msra.mxu1 %v6736_v7  ;;  %6090 = vmatprep.mubr.msk.f32.mxu1 %vm6616_vm1, %v6617_v10 }
 0xdb6   :  { %6320 = vmatprep.subr.bf16.mxu1 %v6615_v3 }
 0xdb9   :  { %6322 = vmatpush3.bf16.msra.mxu1 %v6751_v12 }
 0xe87   :  { %v2135_v42 = vpop.f32.mrb[6].mxu1 }
 0xe88   :  { %v6070_v44 = vpop.f32.mrb[7].mxu1  ;;  %v2165_v46 = vadd.f32 %v2135_v42, %v6810_v31  ;;  %v2153_v48 = vadd.f32 %v2135_v42, %v6800_v20  ;;  %v2139_v49 = vadd.f32 %v2135_v42, %v6816_v35  ;;  %v2146_v7 = vadd.f32 %v2135_v42, %v6812_v32 }
 0xe8a   :  { %2167 = vrot.lane.b32.xlu1 %v2165_v46, %s6620_s20  ;;  %2155 = vrot.lane.b32.xlu0 %v2153_v48, %s6620_s20  ;;  %v5799_v50 = vmul.f32 -1.442695, %v2139_v49  ;;  %v5800_v51 = vmul.f32 -1.442695, %v2146_v7 }
 0xe8c   :  { %6465 = vpow2.f32 %v5799_v50 }
 0xe8d   :  { %6467 = vpow2.f32 %v5800_v51 }
 0xe96   :  { %v6466_v53 = vpop.eup %6465 }
 0xe97   :  { %v6468_v12 = vpop.eup %6467  ;;  %v2143_v54 = vadd.f32 1.0, %v6466_v53 }
 0xe98   :  { %v2150_v55 = vadd.f32 1.0, %v6468_v12 }
 0xe99   :  { %6469 = vrcp.f32 %v2143_v54 }
 0xe9a   :  { %6471 = vrcp.f32 %v2150_v55 }
 0xea3   :  { %v6470_v57 = vpop.eup %6469 }
 0xea4   :  { %v6472_v58 = vpop.eup %6471  ;;  %v2177_v13 = vsub.f32 1.0, %v6470_v57 }
 0xea5   :  { %v2188_v19 = vsub.f32 1.0, %v6472_v58 }
 0xefc   :  { %v2168_v59 = vpop.permute.xlu1 %2167  ;;  %v2156_v60 = vpop.permute.xlu0 %2155 }
 0xefd   :  { %v2170_v62 = vmul.f32 %v6472_v58, %v2168_v59  ;;  %v2158_v63 = vmul.f32 %v6470_v57, %v2156_v60 }
 0xeff   :  { %2172 = vrot.lane.b32.xlu1 %v2170_v62, %s6618_s0  ;;  %2160 = vrot.lane.b32.xlu0 %v2158_v63, %s6618_s0  ;;  %v6625_v63 = vmov 1966171168  }
 0xf03   :  { %2183 = vrot.lane.b32.xlu1 %v2065_v39, %s6623_s29 }
 0xf07   :  { %2194 = vrot.lane.b32.xlu1 %v2065_v39, %s6624_s30 }
 0xf71   :  { %v2161_v0 = vpop.permute.xlu0 %2160  ;;  %v2173_v1 = vpop.permute.xlu1 %2172 }
 0xf72   :  { %v2163_v2 = vadd.f32 %v2161_v0, %v6816_v35  ;;  %v2175_v5 = vadd.f32 %v2173_v1, %v6812_v32  ;;  %v360_v0 = vunpack.c.l.s4 %v6625_v63  ;;  %v362_v1 = vlaneseq }
 0xf74   :  { %6473 = vtanh.f32 %v2163_v2  ;;  %v361_v2 = vunpack.c.0.s8 %v360_v0 }
 0xf75   :  { %6475 = vtanh.f32 %v2175_v5  ;;  %v2184_v9 = vpop.permute.xlu1 %2183  ;;  %v7008_v5 = vshrl.u32 %v362_v1, 7 }
 0xf76   :  { %v2186_v15 = vmul.f32 %v6470_v57, %v2184_v9 }
 0xf79   :  { %v2195_v17 = vpop.permute.xlu1 %2194 }
 0xf7a   :  { %v2197_v21 = vmul.f32 %v6472_v58, %v2195_v17 }
 0xf7e   :  { %v6474_v6 = vpop.eup %6473 }
 0xf7f   :  { %2179 = vrot.lane.b32.xlu0 %v6474_v6, %s6621_s2  ;;  %v6476_v8 = vpop.eup %6475  ;;  %v7011_v6 = vsub.s32 %v361_v2, %v7008_v5 }
 0xf81   :  { %v480_v17 = vrot.slane %v6839_v11, %v7011_v6 }
 0xf83   :  { %2190 = vrot.lane.b32.xlu0 %v6476_v8, %s6621_s2  ;;  %v365_v8 = vrot.slane %v6835_v4, %v7011_v6 }
 0xff1   :  { %v2180_v14 = vpop.permute.xlu0 %2179 }
 0xff2   :  { %v2182_v16 = vmul.f32 %v2180_v14, %v2177_v13 }
 0xff4   :  { %v6983_v18 = vadd.f32 %v2186_v15, %v2182_v16  ;;  %v7016_v16 = vsub.s32 0, %v7008_v5 }
 0xff5   :  { %v2191_v35 = vpop.permute.xlu0 %2190 }
 0xff6   :  { %v2193_v32 = vmul.f32 %v2191_v35, %v2188_v19  ;;  %2427 = vrot.lane.b32.xlu0 %v6983_v18, %s6621_s2 }
 0xff8   :  { %v6987_v22 = vadd.f32 %v2197_v21, %v2193_v32  ;;  %v7023_v21 = vrot.slane %v365_v8, %v7011_v6  ;;  %v735_v32 = vrot.slane %v6865_v56, %v7011_v6 }
 0xffa   :  { %2430 = vrot.lane.b32.xlu1 %v6987_v22, %s6622_s3 }
0x1068   :  { %v2428_v24 = vpop.permute.xlu0 %2427 }
0x106c   :  { %v2431_v25 = vpop.permute.xlu1 %2430 }
0x106d   :  { %v2433_v26 = vsel %vm88_vm0, %v2428_v24, %v2431_v25 }
0x106e   :  { %6080 = vmatmul.mubr.msk.f32.vlgmr.msra.gmra.mrb[12].mxu0 %vm218_vm2, %v2433_v26 }
0x1141   :  { %v2503_v28 = vpop.f32.mrb[12].mxu0 }
0x1142   :  { %v6081_v37 = vpop.f32.mrb[13].mxu0  ;;  %v2533_v30 = vadd.f32 %v2503_v28, %v6810_v31  ;;  %v2521_v29 = vadd.f32 %v2503_v28, %v6800_v20  ;;  %v2507_v34 = vadd.f32 %v2503_v28, %v6821_v40  ;;  %v2514_v38 = vadd.f32 %v2503_v28, %v6805_v23 }
0x1143   :  { %v7030_v28 = vrot.slane %v480_v17, %v7011_v6  ;;  %v849_v37 = vrot.slane %v6869_v61, %v7011_v6 }
0x1144   :  { %2535 = vrot.lane.b32.xlu1 %v2533_v30, %s6620_s20  ;;  %2523 = vrot.lane.b32.xlu0 %v2521_v29, %s6620_s20  ;;  %v5802_v39 = vmul.f32 -1.442695, %v2507_v34  ;;  %v5803_v42 = vmul.f32 -1.442695, %v2514_v38  ;;  %v410_v29 = vrot.slane %v7023_v21, %v7016_v16  ;;  %v7039_v34 = vrot.slane %v735_v32, %v7011_v6 }
0x1145   :  { %v1103_v38 = vrot.slane %v6895_v47, %v7011_v6  ;;  %v857_v0 = vcombine.high %v849_v37, %v849_v37 }
0x1146   :  { %6477 = vpow2.f32 %v5802_v39  ;;  %v525_v39 = vrot.slane %v7030_v28, %v7016_v16 }
0x1147   :  { %6479 = vpow2.f32 %v5803_v42  ;;  %v7049_v42 = vrot.slane %v849_v37, %v7011_v6 }
0x1150   :  { %v6478_v44 = vpop.eup %6477 }
0x1151   :  { %v6480_v46 = vpop.eup %6479  ;;  %v2511_v48 = vadd.f32 1.0, %v6478_v44  ;;  %v780_v44 = vrot.slane %v7039_v34, %v7016_v16 }
0x1152   :  { %v2518_v49 = vadd.f32 1.0, %v6480_v46  ;;  %v7054_v46 = vrot.slane %v1103_v38, %v7011_v6 }
0x1153   :  { %6481 = vrcp.f32 %v2511_v48  ;;  %v1217_v48 = vrot.slane %v6899_v52, %v7011_v6 }
0x1154   :  { %6483 = vrcp.f32 %v2518_v49  ;;  %v1471_v49 = vrot.slane %v6925_v36, %v7011_v6 }
0x115d   :  { %v6482_v7 = vpop.eup %6481 }
0x115e   :  { %v6484_v50 = vpop.eup %6483 }
0x115f   :  { %v2556_v35 = vsub.f32 1.0, %v6484_v50 }
0x11b6   :  { %v2536_v51 = vpop.permute.xlu1 %2535  ;;  %v2524_v53 = vpop.permute.xlu0 %2523 }
0x11b7   :  { %v2538_v12 = vmul.f32 %v6484_v50, %v2536_v51  ;;  %v2526_v54 = vmul.f32 %v6482_v7, %v2524_v53  ;;  %v1148_v51 = vrot.slane %v7054_v46, %v7016_v16  ;;  %v7067_v53 = vrot.slane %v1217_v48, %v7011_v6 }
0x11b9   :  { %2540 = vrot.lane.b32.xlu1 %v2538_v12, %s6618_s0  ;;  %2528 = vrot.lane.b32.xlu0 %v2526_v54, %s6618_s0  ;;  %v7070_v12 = vrot.slane %v1471_v49, %v7011_v6  ;;  %v1585_v54 = vrot.slane %v6929_v45, %v7011_v6 }
0x11bb   :  { %v1593_v37 = vcombine.high %v1585_v54, %v1585_v54 }
0x11bd   :  { %2551 = vrot.lane.b32.xlu1 %v2433_v26, %s6623_s29 }
0x11c1   :  { %2562 = vrot.lane.b32.xlu1 %v2433_v26, %s6624_s30 }
0x122b   :  { %v2529_v55 = vpop.permute.xlu0 %2528  ;;  %v2541_v57 = vpop.permute.xlu1 %2540 }
0x122c   :  { %v2531_v58 = vadd.f32 %v2529_v55, %v6821_v40  ;;  %v2543_v59 = vadd.f32 %v2541_v57, %v6805_v23  ;;  %v2545_v23 = vsub.f32 1.0, %v6482_v7  ;;  %v488_v57 = vcombine.high %v480_v17, %v480_v17 }
0x122e   :  { %6485 = vtanh.f32 %v2531_v58  ;;  %v1262_v58 = vrot.slane %v7067_v53, %v7016_v16 }
0x122f   :  { %6487 = vtanh.f32 %v2543_v59  ;;  %v2552_v40 = vpop.permute.xlu1 %2551  ;;  %v1516_v59 = vrot.slane %v7070_v12, %v7016_v16 }
0x1230   :  { %v2554_v13 = vmul.f32 %v6482_v7, %v2552_v40  ;;  %v894_v7 = vrot.slane %v7049_v42, %v7016_v16  ;;  %v7093_v40 = vrot.slane %v488_v57, %v7011_v6 }
0x1233   :  { %v2563_v15 = vpop.permute.xlu1 %2562 }
0x1234   :  { %v2565_v25 = vmul.f32 %v6484_v50, %v2563_v15  ;;  %v373_v50 = vcombine.high %v365_v8, %v365_v8  ;;  %v1111_v8 = vcombine.high %v1103_v38, %v1103_v38 }
0x1236   :  { %v7077_v55 = vrot.slane %v373_v50, %v7011_v6  ;;  %v7108_v17 = vrot.slane %v1111_v8, %v7011_v6 }
0x1238   :  { %v6486_v60 = vpop.eup %6485  ;;  %v414_v63 = vrot.slane %v7077_v55, %v7016_v16 }
0x1239   :  { %2547 = vrot.lane.b32.xlu0 %v6486_v60, %s6621_s2  ;;  %v6488_v62 = vpop.eup %6487  ;;  %v7084_v60 = vrot.slane %v1585_v54, %v7011_v6 }
0x123b   :  { %v1630_v2 = vrot.slane %v7084_v60, %v7016_v16 }
0x123d   :  { %2558 = vrot.lane.b32.xlu0 %v6488_v62, %s6621_s2  ;;  %v743_v62 = vcombine.high %v735_v32, %v735_v32 }
0x12ab   :  { %v2548_v9 = vpop.permute.xlu0 %2547 }
0x12ac   :  { %v2550_v14 = vmul.f32 %v2548_v9, %v2545_v23  ;;  %v7096_v23 = vrot.slane %v743_v62, %v7011_v6  ;;  %v7101_v9 = vrot.slane %v857_v0, %v7011_v6 }
0x12ae   :  { %v7020_v19 = vadd.f32 %v2554_v13, %v2550_v14  ;;  %v1225_v13 = vcombine.high %v1217_v48, %v1217_v48  ;;  %v529_v14 = vrot.slane %v7093_v40, %v7016_v16  ;;  %v784_v15 = vrot.slane %v7096_v23, %v7016_v16 }
0x12af   :  { %v2559_v24 = vpop.permute.xlu0 %2558  ;;  %v898_v32 = vrot.slane %v7101_v9, %v7016_v16  ;;  %v7135_v48 = vrot.slane %v1593_v37, %v7011_v6 }
0x12b0   :  { %v2561_v26 = vmul.f32 %v2559_v24, %v2556_v35  ;;  %2795 = vrot.lane.b32.xlu0 %v7020_v19, %s6621_s2  ;;  %v1479_v35 = vcombine.high %v1471_v49, %v1471_v49  ;;  %v7115_v24 = vrot.slane %v1225_v13, %v7011_v6  ;;  %v7181_v13 = vrot.slane %v7020_v19, %v7011_v6 }
0x12b1   :  { %v1634_v54 = vrot.slane %v7135_v48, %v7016_v16 }
0x12b2   :  { %v7034_v30 = vadd.f32 %v2565_v25, %v2561_v26  ;;  %v1152_v25 = vrot.slane %v7108_v17, %v7016_v16  ;;  %v7120_v26 = vrot.slane %v1479_v35, %v7011_v6  ;;  %v1266_v38 = vrot.slane %v7115_v24, %v7016_v16 }
0x12b4   :  { %2798 = vrot.lane.b32.xlu1 %v7034_v30, %s6622_s3  ;;  %439 = vrot.lane.b32.xlu0 %v410_v29, %s6621_s2  ;;  %v1839_v29 = vrot.slane %v6954_v27, %v7011_v6  ;;  %v7177_v8 = vrot.slane %v7034_v30, %v7011_v6 }
0x12b6   :  { %v7138_v49 = vrot.slane %v1839_v29, %v7011_v6  ;;  %v7191_v35 = vrot.slane %v7177_v8, %v7011_v6 }
0x12b8   :  { %554 = vrot.lane.b32.xlu1 %v525_v39, %s6622_s3  ;;  %809 = vrot.lane.b32.xlu0 %v780_v44, %s6621_s2  ;;  %v7130_v39 = vrot.slane %v6958_v33, %v7011_v6  ;;  %v1520_v44 = vrot.slane %v7120_v26, %v7016_v16  ;;  %v1884_v57 = vrot.slane %v7138_v49, %v7016_v16 }
0x12ba   :  { %v7148_v50 = vrot.slane %v7130_v39, %v7011_v6 }
0x12bc   :  { %923 = vrot.lane.b32.xlu1 %v894_v7, %s6622_s3  ;;  %1177 = vrot.lane.b32.xlu0 %v1148_v51, %s6621_s2  ;;  %v7142_v7 = vrot.slane %v6983_v18, %v7011_v6  ;;  %v1847_v51 = vcombine.high %v1839_v29, %v1839_v29  ;;  %v1998_v62 = vrot.slane %v7148_v50, %v7016_v16 }
0x12c0   :  { %1291 = vrot.lane.b32.xlu1 %v1262_v58, %s6622_s3  ;;  %1545 = vrot.lane.b32.xlu0 %v1516_v59, %s6621_s2  ;;  %v7156_v58 = vrot.slane %v7142_v7, %v7011_v6  ;;  %v7160_v59 = vrot.slane %v6987_v22, %v7011_v6 }
0x12c2   :  { %v2252_v0 = vrot.slane %v7156_v58, %v7016_v16 }
0x12c4   :  { %1659 = vrot.lane.b32.xlu1 %v1630_v2, %s6622_s3  ;;  %441 = vrot.lane.b32.xlu0 %v414_v63, %s6621_s2  ;;  %v7167_v63 = vrot.slane %v1847_v51, %v7011_v6  ;;  %v7173_v2 = vrot.slane %v7160_v59, %v7011_v6 }
0x12c8   :  { %556 = vrot.lane.b32.xlu1 %v529_v14, %s6622_s3  ;;  %811 = vrot.lane.b32.xlu0 %v784_v15, %s6621_s2  ;;  %v2366_v14 = vrot.slane %v7173_v2, %v7016_v16  ;;  %v1888_v15 = vrot.slane %v7167_v63, %v7016_v16 }
0x12cc   :  { %925 = vrot.lane.b32.xlu1 %v898_v32, %s6622_s3  ;;  %1179 = vrot.lane.b32.xlu0 %v1152_v25, %s6621_s2  ;;  %v7195_v32 = vrot.slane %v7181_v13, %v7011_v6  ;;  %v2734_v25 = vrot.slane %v7191_v35, %v7016_v16 }
0x12ce   :  { %v2620_v37 = vrot.slane %v7195_v32, %v7016_v16 }
0x12d0   :  { %1293 = vrot.lane.b32.xlu1 %v1266_v38, %s6622_s3  ;;  %1547 = vrot.lane.b32.xlu0 %v1520_v44, %s6621_s2 }
0x12d4   :  { %1661 = vrot.lane.b32.xlu1 %v1634_v54, %s6622_s3  ;;  %1913 = vrot.lane.b32.xlu0 %v1884_v57, %s6621_s2 }
0x12d8   :  { %2027 = vrot.lane.b32.xlu1 %v1998_v62, %s6622_s3  ;;  %2281 = vrot.lane.b32.xlu0 %v2252_v0, %s6621_s2 }
0x12dc   :  { %2395 = vrot.lane.b32.xlu1 %v2366_v14, %s6622_s3  ;;  %1915 = vrot.lane.b32.xlu0 %v1888_v15, %s6621_s2 }
0x12e0   :  { %2763 = vrot.lane.b32.xlu1 %v2734_v25, %s6622_s3  ;;  %2649 = vrot.lane.b32.xlu0 %v2620_v37, %s6621_s2 }
0x1322   :  { %v2796_v29 = vpop.permute.xlu0 %2795 }
0x1326   :  { %v2799_v38 = vpop.permute.xlu1 %2798  ;;  %v440_v44 = vpop.permute.xlu0 %439 }
0x1327   :  { %464 = vst.msk [vmem:[#allocation2] sm:$0x1] %vm463_vm3, %v440_v44  ;;  %v2801_v51 = vsel %vm88_vm0, %v2796_v29, %v2799_v38 }
0x1328   :  { %2919 = vrot.lane.b32.xlu1 %v2801_v51, %s6623_s29  ;;  %6091 = vmatmul.mubr.msk.f32.vlgmr.msra.gmra.mrb[8].mxu1 %vm218_vm2, %v2801_v51 }
0x132a   :  { %v555_v54 = vpop.permute.xlu1 %554  ;;  %v810_v57 = vpop.permute.xlu0 %809 }
0x132b   :  { %579 = vst.msk [vmem:[#allocation2 + $0x7] sm:$0x1] %vm578_vm4, %v555_v54 }
0x132c   :  { %833 = vst.msk [vmem:[#allocation2 + $0x1] sm:$0x1] %vm463_vm3, %v810_v57  ;;  %2930 = vrot.lane.b32.xlu1 %v2801_v51, %s6624_s30 }
0x132e   :  { %v924_v62 = vpop.permute.xlu1 %923  ;;  %v1178_v0 = vpop.permute.xlu0 %1177 }
0x132f   :  { %947 = vst.msk [vmem:[#allocation2 + $0x6] sm:$0x1] %vm578_vm4, %v924_v62 }
0x1330   :  { %1201 = vst.msk [vmem:[#allocation2 + $0x2] sm:$0x1] %vm463_vm3, %v1178_v0 }
0x1332   :  { %v1292_v14 = vpop.permute.xlu1 %1291  ;;  %v1546_v15 = vpop.permute.xlu0 %1545 }
0x1333   :  { %1315 = vst.msk [vmem:[#allocation2 + $0x5] sm:$0x1] %vm578_vm4, %v1292_v14 }
0x1334   :  { %1569 = vst.msk [vmem:[#allocation2 + $0x3] sm:$0x1] %vm463_vm3, %v1546_v15 }
0x1336   :  { %v1660_v25 = vpop.permute.xlu1 %1659  ;;  %v442_v37 = vpop.permute.xlu0 %441 }
0x1337   :  { %1683 = vst.msk [vmem:[#allocation2 + $0x4] sm:$0x1] %vm578_vm4, %v1660_v25 }
0x1338   :  { %465 = vst.msk [vmem:[#allocation2 + $0x8] sm:$0x1] %vm463_vm3, %v442_v37 }
0x133a   :  { %v557_v29 = vpop.permute.xlu1 %556  ;;  %v812_v38 = vpop.permute.xlu0 %811 }
0x133b   :  { %580 = vst.msk [vmem:[#allocation2 + $0xf] sm:$0x1] %vm578_vm4, %v557_v29 }
0x133c   :  { %834 = vst.msk [vmem:[#allocation2 + $0x9] sm:$0x1] %vm463_vm3, %v812_v38 }
0x133e   :  { %v926_v44 = vpop.permute.xlu1 %925  ;;  %v1180_v51 = vpop.permute.xlu0 %1179 }
0x133f   :  { %948 = vst.msk [vmem:[#allocation2 + $0xe] sm:$0x1] %vm578_vm4, %v926_v44  ;;  %v1961_v44 = vcombine.high %v7130_v39, %v7130_v39 }
0x1340   :  { %1202 = vst.msk [vmem:[#allocation2 + $0xa] sm:$0x1] %vm463_vm3, %v1180_v51  ;;  %v2215_v51 = vcombine.high %v7142_v7, %v7142_v7 }
0x1342   :  { %v1294_v54 = vpop.permute.xlu1 %1293  ;;  %v1548_v57 = vpop.permute.xlu0 %1547 }
0x1343   :  { %1316 = vst.msk [vmem:[#allocation2 + $0xd] sm:$0x1] %vm578_vm4, %v1294_v54 }
0x1344   :  { %1570 = vst.msk [vmem:[#allocation2 + $0xb] sm:$0x1] %vm463_vm3, %v1548_v57  ;;  %v7239_v57 = vrot.slane %v1961_v44, %v7011_v6  ;;  %v518_v44 = vcombine.high %v7030_v28, %v7030_v28 }
0x1346   :  { %v1662_v62 = vpop.permute.xlu1 %1661  ;;  %v1914_v0 = vpop.permute.xlu0 %1913  ;;  %v533_v28 = vrot.slane %v518_v44, %v7016_v16 }
0x1347   :  { %1684 = vst.msk [vmem:[#allocation2 + $0xc] sm:$0x1] %vm578_vm4, %v1662_v62  ;;  %v7242_v62 = vrot.slane %v2215_v51, %v7011_v6  ;;  %v773_v51 = vcombine.high %v7039_v34, %v7039_v34  ;;  %v1255_v34 = vcombine.high %v7067_v53, %v7067_v53 }
0x1348   :  { %1937 = vst.msk [vmem:[#allocation2 + $0x4] sm:$0x1] %vm463_vm3, %v1914_v0  ;;  %v2329_v0 = vcombine.high %v7160_v59, %v7160_v59  ;;  %v2697_v59 = vcombine.high %v7177_v8, %v7177_v8 }
0x134a   :  { %v2028_v14 = vpop.permute.xlu1 %2027  ;;  %v2282_v15 = vpop.permute.xlu0 %2281 }
0x134b   :  { %2051 = vst.msk [vmem:[#allocation2 + $0x3] sm:$0x1] %vm578_vm4, %v2028_v14  ;;  %v2583_v14 = vcombine.high %v7181_v13, %v7181_v13  ;;  %v2256_v13 = vrot.slane %v7242_v62, %v7016_v16 }
0x134c   :  { %2305 = vst.msk [vmem:[#allocation2 + $0x5] sm:$0x1] %vm463_vm3, %v2282_v15 }
0x134e   :  { %v2396_v25 = vpop.permute.xlu1 %2395  ;;  %v1916_v37 = vpop.permute.xlu0 %1915 }
0x134f   :  { %2419 = vst.msk [vmem:[#allocation2 + $0x2] sm:$0x1] %vm578_vm4, %v2396_v25  ;;  %v2002_v25 = vrot.slane %v7239_v57, %v7016_v16 }
0x1350   :  { %1938 = vst.msk [vmem:[#allocation2 + $0xc] sm:$0x1] %vm463_vm3, %v1916_v37  ;;  %v7261_v37 = vrot.slane %v2329_v0, %v7011_v6 }
0x1352   :  { %v2764_v29 = vpop.permute.xlu1 %2763  ;;  %v2650_v38 = vpop.permute.xlu0 %2649 }
0x1353   :  { %2787 = vst.msk [vmem:[#allocation2 + $0x1] sm:$0x1] %vm578_vm4, %v2764_v29  ;;  %v2370_v29 = vrot.slane %v7261_v37, %v7016_v16 }
0x1354   :  { %2673 = vst.msk [vmem:[#allocation2 + $0x6] sm:$0x1] %vm463_vm3, %v2650_v38  ;;  %v7275_v38 = vrot.slane %v2697_v59, %v7011_v6  ;;  %v405_v59 = vcombine.high %v7077_v55, %v7077_v55  ;;  %v889_v55 = vcombine.high %v7101_v9, %v7101_v9 }
0x13fb   :  { %v7236_v54 = vpop.f32.mrb[8].mxu1 }
0x13fc   :  { %v6092_v15 = vpop.f32.mrb[9].mxu1  ;;  %v2901_v39 = vadd.f32 %v7236_v54, %v6810_v31  ;;  %v2889_v7 = vadd.f32 %v7236_v54, %v6800_v20  ;;  %v7264_v31 = vrot.slane %v2583_v14, %v7011_v6  ;;  %v403_v20 = vcombine.high %v7023_v21, %v7023_v21 }
0x13fd   :  { %v2738_v21 = vrot.slane %v7275_v38, %v7016_v16  ;;  %v887_v14 = vcombine.high %v7049_v42, %v7049_v42  ;;  %v1141_v15 = vcombine.high %v7054_v46, %v7054_v46  ;;  %v1623_v46 = vcombine.high %v7084_v60, %v7084_v60 }
0x13fe   :  { %2903 = vrot.lane.b32.xlu1 %v2901_v39, %s6620_s20  ;;  %2891 = vrot.lane.b32.xlu0 %v2889_v7, %s6620_s20  ;;  %v2624_v8 = vrot.slane %v7264_v31, %v7016_v16  ;;  %v418_v0 = vrot.slane %v403_v20, %v7016_v16  ;;  %v788_v39 = vrot.slane %v773_v51, %v7016_v16 }
0x13ff   :  { %v1509_v7 = vcombine.high %v7070_v12, %v7070_v12  ;;  %v1156_v42 = vrot.slane %v1141_v15, %v7016_v16  ;;  %v520_v12 = vcombine.high %v7093_v40, %v7093_v40  ;;  %v775_v20 = vcombine.high %v7096_v23, %v7096_v23 }
0x1400   :  { %v422_v60 = vrot.slane %v405_v59, %v7016_v16  ;;  %v1257_v23 = vcombine.high %v7115_v24, %v7115_v24  ;;  %v1511_v51 = vcombine.high %v7120_v26, %v7120_v26  ;;  %v1991_v26 = vcombine.high %v7148_v50, %v7148_v50 }
0x1401   :  { %v1524_v53 = vrot.slane %v1509_v7, %v7016_v16  ;;  %v537_v44 = vrot.slane %v520_v12, %v7016_v16  ;;  %v792_v40 = vrot.slane %v775_v20, %v7016_v16  ;;  %v2245_v15 = vcombine.high %v7156_v58, %v7156_v58 }
0x1402   :  { %2029 = vrot.lane.b32.xlu1 %v2002_v25, %s6622_s3  ;;  %2283 = vrot.lane.b32.xlu0 %v2256_v13, %s6621_s2  ;;  %v902_v25 = vrot.slane %v887_v14, %v7016_v16  ;;  %v1270_v13 = vrot.slane %v1255_v34, %v7016_v16  ;;  %v1274_v14 = vrot.slane %v1257_v23, %v7016_v16 }
0x1403   :  { %v1528_v24 = vrot.slane %v1511_v51, %v7016_v16  ;;  %v2006_v34 = vrot.slane %v1991_v26, %v7016_v16  ;;  %v2260_v50 = vrot.slane %v2245_v15, %v7016_v16  ;;  %v1879_v58 = vcombine.high %v7167_v63, %v7167_v63 }
0x1404   :  { %v2727_v7 = vcombine.high %v7191_v35, %v7191_v35  ;;  %v2875_v63 = vadd.f32 %v7236_v54, %v6826_v43  ;;  %v2882_v35 = vadd.f32 %v7236_v54, %v6823_v41  ;;  %v358_v54 = vcombine.high %v6835_v4, %v6835_v4 }
0x1405   :  { %v2247_v23 = vcombine.high %v7242_v62, %v7242_v62  ;;  %v473_v4 = vcombine.high %v6839_v11, %v6839_v11  ;;  %v728_v62 = vcombine.high %v6865_v56, %v6865_v56  ;;  %v2361_v26 = vcombine.high %v7261_v37, %v7261_v37 }
0x1406   :  { %2397 = vrot.lane.b32.xlu1 %v2370_v29, %s6622_s3  ;;  %2651 = vrot.lane.b32.xlu0 %v2624_v8, %s6621_s2  ;;  %v1638_v29 = vrot.slane %v1623_v46, %v7016_v16  ;;  %v1143_v8 = vcombine.high %v7108_v17, %v7108_v17  ;;  %v1625_v17 = vcombine.high %v7135_v48, %v7135_v48  ;;  %v5805_v46 = vmul.f32 -1.442695, %v2875_v63 }
0x1407   :  { %v5806_v59 = vmul.f32 -1.442695, %v2882_v35  ;;  %v2615_v15 = vcombine.high %v7264_v31, %v7264_v31  ;;  %v7412_v11 = vrot.slane %v473_v4, %v7011_v6  ;;  %v7415_v56 = vrot.slane %v728_v62, %v7011_v6 }
0x1408   :  { %v1160_v9 = vrot.slane %v1143_v8, %v7016_v16  ;;  %6489 = vpow2.f32 %v5805_v46  ;;  %v1096_v31 = vcombine.high %v6895_v47, %v6895_v47 }
0x1409   :  { %6491 = vpow2.f32 %v5806_v59 }
0x140a   :  { %2765 = vrot.lane.b32.xlu1 %v2738_v21, %s6622_s3  ;;  %443 = vrot.lane.b32.xlu0 %v418_v0, %s6621_s2  ;;  %v906_v21 = vrot.slane %v889_v55, %v7016_v16  ;;  %v1877_v0 = vcombine.high %v7138_v49, %v7138_v49  ;;  %v2359_v49 = vcombine.high %v7173_v2, %v7173_v2 }
0x140c   :  { %v1892_v48 = vrot.slane %v1877_v0, %v7016_v16 }
0x140e   :  { %558 = vrot.lane.b32.xlu1 %v533_v28, %s6622_s3  ;;  %813 = vrot.lane.b32.xlu0 %v788_v39, %s6621_s2  ;;  %v1642_v28 = vrot.slane %v1625_v17, %v7016_v16  ;;  %v2613_v39 = vcombine.high %v7195_v32, %v7195_v32  ;;  %v2742_v32 = vrot.slane %v2727_v7, %v7016_v16 }
0x140f   :  { %v7395_v17 = vrot.slane %v358_v54, %v7011_v6 }
0x1410   :  { %v2628_v2 = vrot.slane %v2613_v39, %v7016_v16  ;;  %v2378_v39 = vrot.slane %v2361_v26, %v7016_v16  ;;  %v744_v26 = vcombine.high %v7415_v56, %v7415_v56 }
0x1411   :  { %v7421_v37 = vrot.slane %v7395_v17, %v7011_v6 }
0x1412   :  { %927 = vrot.lane.b32.xlu1 %v902_v25, %s6622_s3  ;;  %1181 = vrot.lane.b32.xlu0 %v1156_v42, %s6621_s2  ;;  %v2374_v25 = vrot.slane %v2359_v49, %v7016_v16  ;;  %v1896_v42 = vrot.slane %v1879_v58, %v7016_v16 }
0x1413   :  { %v426_v7 = vrot.slane %v7421_v37, %v7016_v16 }
0x1416   :  { %1295 = vrot.lane.b32.xlu1 %v1270_v13, %s6622_s3  ;;  %1549 = vrot.lane.b32.xlu0 %v1524_v53, %s6621_s2  ;;  %v6490_v13 = vpop.eup %6489 }
0x1417   :  { %v6492_v53 = vpop.eup %6491  ;;  %v2879_v12 = vadd.f32 1.0, %v6490_v13 }
0x1418   :  { %v2886_v20 = vadd.f32 1.0, %v6492_v53 }
0x1419   :  { %6493 = vrcp.f32 %v2879_v12  ;;  %v1578_v12 = vcombine.high %v6929_v45, %v6929_v45  ;;  %v374_v45 = vcombine.high %v7395_v17, %v7395_v17 }
0x141a   :  { %1663 = vrot.lane.b32.xlu1 %v1638_v29, %s6622_s3  ;;  %445 = vrot.lane.b32.xlu0 %v422_v60, %s6621_s2  ;;  %v7376_v29 = vpop.permute.xlu1 %2919  ;;  %6495 = vrcp.f32 %v2886_v20 }
0x141b   :  { %v7501_v62 = vrot.slane %v374_v45, %v7011_v6 }
0x141e   :  { %560 = vrot.lane.b32.xlu1 %v537_v44, %s6622_s3  ;;  %815 = vrot.lane.b32.xlu0 %v792_v40, %s6621_s2  ;;  %v7378_v60 = vpop.permute.xlu1 %2930 }
0x1422   :  { %929 = vrot.lane.b32.xlu1 %v906_v21, %s6622_s3  ;;  %1183 = vrot.lane.b32.xlu0 %v1160_v9, %s6621_s2  ;;  %v1993_v9 = vcombine.high %v7239_v57, %v7239_v57 }
0x1423   :  { %v7380_v55 = vpop.eup %6493 }
0x1424   :  { %v7382_v8 = vpop.eup %6495  ;;  %v2010_v57 = vrot.slane %v1993_v9, %v7016_v16 }
0x1426   :  { %1297 = vrot.lane.b32.xlu1 %v1274_v14, %s6622_s3  ;;  %1551 = vrot.lane.b32.xlu0 %v1528_v24, %s6621_s2  ;;  %v2264_v24 = vrot.slane %v2247_v23, %v7016_v16  ;;  %v7485_v23 = vrot.slane %v1578_v12, %v7011_v6 }
0x142a   :  { %1665 = vrot.lane.b32.xlu1 %v1642_v28, %s6622_s3  ;;  %1917 = vrot.lane.b32.xlu0 %v1892_v48, %s6621_s2  ;;  %v842_v28 = vcombine.high %v6869_v61, %v6869_v61  ;;  %v2729_v61 = vcombine.high %v7275_v38, %v7275_v38  ;;  %v7447_v38 = vrot.slane %v1096_v31, %v7011_v6 }
0x142c   :  { %v2746_v63 = vrot.slane %v2729_v61, %v7016_v16  ;;  %v7476_v20 = vrot.slane %v7447_v38, %v7011_v6 }
0x142e   :  { %2031 = vrot.lane.b32.xlu1 %v2006_v34, %s6622_s3  ;;  %2285 = vrot.lane.b32.xlu0 %v2260_v50, %s6621_s2  ;;  %v2632_v34 = vrot.slane %v2615_v15, %v7016_v16  ;;  %v7434_v50 = vrot.slane %v842_v28, %v7011_v6  ;;  %v430_v28 = vrot.slane %v7501_v62, %v7016_v16 }
0x1430   :  { %v858_v31 = vcombine.high %v7434_v50, %v7434_v50 }
0x1432   :  { %2399 = vrot.lane.b32.xlu1 %v2374_v25, %s6622_s3  ;;  %2653 = vrot.lane.b32.xlu0 %v2628_v2, %s6621_s2  ;;  %v7440_v25 = vrot.slane %v7412_v11, %v7011_v6  ;;  %v7444_v2 = vrot.slane %v7415_v56, %v7011_v6  ;;  %v7529_v56 = vrot.slane %v744_v26, %v7011_v6 }
0x1434   :  { %v541_v59 = vrot.slane %v7440_v25, %v7016_v16 }
0x1436   :  { %2767 = vrot.lane.b32.xlu1 %v2742_v32, %s6622_s3  ;;  %1919 = vrot.lane.b32.xlu0 %v1896_v42, %s6621_s2  ;;  %v1210_v32 = vcombine.high %v6899_v52, %v6899_v52  ;;  %v1464_v42 = vcombine.high %v6925_v36, %v6925_v36  ;;  %v796_v52 = vrot.slane %v7444_v2, %v7016_v16 }
0x1437   :  { %v7464_v36 = vrot.slane %v7434_v50, %v7011_v6  ;;  %v800_v50 = vrot.slane %v7529_v56, %v7016_v16 }
0x1438   :  { %v1224_v13 = vrot.slane %v1210_v32, %v7011_v6  ;;  %v7468_v53 = vrot.slane %v1464_v42, %v7011_v6 }
0x143a   :  { %v7496_v9 = vrot.slane %v7468_v53, %v7011_v6 }
0x1470   :  { %v2904_v44 = vpop.permute.xlu1 %2903  ;;  %v2892_v40 = vpop.permute.xlu0 %2891 }
0x1471   :  { %v2906_v51 = vmul.f32 %v7382_v8, %v2904_v44  ;;  %v2894_v21 = vmul.f32 %v7380_v55, %v2892_v40  ;;  %v910_v40 = vrot.slane %v7464_v36, %v7016_v16 }
0x1473   :  { %2908 = vrot.lane.b32.xlu1 %v2906_v51, %s6618_s0  ;;  %2896 = vrot.lane.b32.xlu0 %v2894_v21, %s6618_s0  ;;  %v1164_v51 = vrot.slane %v7476_v20, %v7016_v16  ;;  %v7492_v21 = vrot.slane %v1224_v13, %v7011_v6 }
0x1474   :  { %v2030_v0 = vpop.permute.xlu1 %2029  ;;  %v2284_v14 = vpop.permute.xlu0 %2283 }
0x1475   :  { %2052 = vst.msk [vmem:[#allocation2 + $0xb] sm:$0x1] %vm578_vm4, %v2030_v0  ;;  %v489_v0 = vcombine.high %v7412_v11, %v7412_v11 }
0x1476   :  { %2306 = vst.msk [vmem:[#allocation2 + $0xd] sm:$0x1] %vm463_vm3, %v2284_v14  ;;  %v1278_v14 = vrot.slane %v7492_v21, %v7016_v16 }
0x1477   :  { %2033 = vrot.lane.b32.xlu1 %v2010_v57, %s6622_s3  ;;  %2287 = vrot.lane.b32.xlu0 %v2264_v24, %s6621_s2  ;;  %v1532_v57 = vrot.slane %v7496_v9, %v7016_v16  ;;  %v7513_v24 = vrot.slane %v7485_v23, %v7011_v6 }
0x1478   :  { %v2398_v48 = vpop.permute.xlu1 %2397  ;;  %v2652_v49 = vpop.permute.xlu0 %2651 }
0x1479   :  { %2420 = vst.msk [vmem:[#allocation2 + $0xa] sm:$0x1] %vm578_vm4, %v2398_v48  ;;  %v7522_v48 = vrot.slane %v489_v0, %v7011_v6 }
0x147a   :  { %2674 = vst.msk [vmem:[#allocation2 + $0xe] sm:$0x1] %vm463_vm3, %v2652_v49  ;;  %v1646_v49 = vrot.slane %v7513_v24, %v7016_v16 }
0x147b   :  { %2401 = vrot.lane.b32.xlu1 %v2378_v39, %s6622_s3  ;;  %2655 = vrot.lane.b32.xlu0 %v2632_v34, %s6621_s2  ;;  %v1112_v39 = vcombine.high %v7447_v38, %v7447_v38  ;;  %v1832_v34 = vcombine.high %v6954_v27, %v6954_v27  ;;  %v7546_v38 = vrot.slane %v858_v31, %v7011_v6 }
0x147c   :  { %v2766_v58 = vpop.permute.xlu1 %2765  ;;  %v444_v47 = vpop.permute.xlu0 %443  ;;  %v1480_v27 = vcombine.high %v7468_v53, %v7468_v53 }
0x147d   :  { %2788 = vst.msk [vmem:[#allocation2 + $0x9] sm:$0x1] %vm578_vm4, %v2766_v58  ;;  %v7549_v32 = vrot.slane %v1112_v39, %v7011_v6  ;;  %v1846_v42 = vrot.slane %v1832_v34, %v7011_v6  ;;  %v914_v53 = vrot.slane %v7546_v38, %v7016_v16 }
0x147e   :  { %466 = vst.msk [vmem:[#allocation2 + $0x10] sm:$0x1] %vm463_vm3, %v444_v47  ;;  %v545_v47 = vrot.slane %v7522_v48, %v7016_v16  ;;  %v7572_v12 = vrot.slane %v1480_v27, %v7011_v6 }
0x147f   :  { %2769 = vrot.lane.b32.xlu1 %v2746_v63, %s6622_s3  ;;  %447 = vrot.lane.b32.xlu0 %v426_v7, %s6621_s2  ;;  %v1226_v7 = vcombine.high %v1224_v13, %v1224_v13  ;;  %v1946_v63 = vcombine.high %v6958_v33, %v6958_v33  ;;  %v2200_v13 = vcombine.high %v6983_v18, %v6983_v18 }
0x1480   :  { %v559_v35 = vpop.permute.xlu1 %558  ;;  %v814_v46 = vpop.permute.xlu0 %813  ;;  %v1168_v33 = vrot.slane %v7549_v32, %v7016_v16  ;;  %v1536_v0 = vrot.slane %v7572_v12, %v7016_v16 }
0x1481   :  { %581 = vst.msk [vmem:[#allocation2 + $0x17] sm:$0x1] %vm578_vm4, %v559_v35 }
0x1482   :  { %835 = vst.msk [vmem:[#allocation2 + $0x11] sm:$0x1] %vm463_vm3, %v814_v46 }
0x1483   :  { %562 = vrot.lane.b32.xlu1 %v541_v59, %s6622_s3  ;;  %817 = vrot.lane.b32.xlu0 %v796_v52, %s6621_s2  ;;  %v7559_v59 = vrot.slane %v1226_v7, %v7011_v6  ;;  %v1594_v52 = vcombine.high %v7485_v23, %v7485_v23  ;;  %v7583_v23 = vrot.slane %v1846_v42, %v7011_v6 }
0x1484   :  { %v928_v54 = vpop.permute.xlu1 %927  ;;  %v1182_v44 = vpop.permute.xlu0 %1181 }
0x1485   :  { %949 = vst.msk [vmem:[#allocation2 + $0x16] sm:$0x1] %vm578_vm4, %v928_v54  ;;  %v1960_v54 = vrot.slane %v1946_v63, %v7011_v6  ;;  %v7580_v45 = vrot.slane %v1594_v52, %v7011_v6 }
0x1486   :  { %1203 = vst.msk [vmem:[#allocation2 + $0x12] sm:$0x1] %vm463_vm3, %v1182_v44 }
0x1487   :  { %931 = vrot.lane.b32.xlu1 %v910_v40, %s6622_s3  ;;  %1185 = vrot.lane.b32.xlu0 %v1164_v51, %s6621_s2  ;;  %v1282_v40 = vrot.slane %v7559_v59, %v7016_v16  ;;  %v2214_v51 = vrot.slane %v2200_v13, %v7011_v6  ;;  %v1650_v26 = vrot.slane %v7580_v45, %v7016_v16 }
0x1488   :  { %v1296_v17 = vpop.permute.xlu1 %1295  ;;  %v1550_v4 = vpop.permute.xlu0 %1549  ;;  %v1962_v63 = vcombine.high %v1960_v54, %v1960_v54 }
0x1489   :  { %1317 = vst.msk [vmem:[#allocation2 + $0x15] sm:$0x1] %vm578_vm4, %v1296_v17  ;;  %v2314_v17 = vcombine.high %v6987_v22, %v6987_v22  ;;  %v1900_v22 = vrot.slane %v7583_v23, %v7016_v16  ;;  %v2216_v13 = vcombine.high %v2214_v51, %v2214_v51 }
0x148a   :  { %1571 = vst.msk [vmem:[#allocation2 + $0x13] sm:$0x1] %vm463_vm3, %v1550_v4  ;;  %v2568_v4 = vcombine.high %v7020_v19, %v7020_v19  ;;  %v7601_v19 = vrot.slane %v1960_v54, %v7011_v6 }
0x148b   :  { %1299 = vrot.lane.b32.xlu1 %v1278_v14, %s6622_s3  ;;  %1553 = vrot.lane.b32.xlu0 %v1532_v57, %s6621_s2 }
0x148c   :  { %v1664_v15 = vpop.permute.xlu1 %1663  ;;  %v446_v11 = vpop.permute.xlu0 %445  ;;  %v2014_v34 = vrot.slane %v7601_v19, %v7016_v16 }
0x148d   :  { %1685 = vst.msk [vmem:[#allocation2 + $0x14] sm:$0x1] %vm578_vm4, %v1664_v15  ;;  %v2328_v15 = vrot.slane %v2314_v17, %v7011_v6 }
0x148e   :  { %467 = vst.msk [vmem:[#allocation2 + $0x18] sm:$0x1] %vm463_vm3, %v446_v11  ;;  %v2582_v11 = vrot.slane %v2568_v4, %v7011_v6 }
0x148f   :  { %1667 = vrot.lane.b32.xlu1 %v1646_v49, %s6622_s3  ;;  %449 = vrot.lane.b32.xlu0 %v430_v28, %s6621_s2  ;;  %v2682_v28 = vcombine.high %v7034_v30, %v7034_v30  ;;  %v7610_v49 = vrot.slane %v2214_v51, %v7011_v6  ;;  %v2330_v51 = vcombine.high %v2328_v15, %v2328_v15 }
0x1490   :  { %v561_v61 = vpop.permute.xlu1 %560  ;;  %v816_v58 = vpop.permute.xlu0 %815  ;;  %v7625_v7 = vrot.slane %v2582_v11, %v7011_v6  ;;  %v2584_v17 = vcombine.high %v2582_v11, %v2582_v11 }
0x1491   :  { %582 = vst.msk [vmem:[#allocation2 + $0x1f] sm:$0x1] %vm578_vm4, %v561_v61  ;;  %v1848_v61 = vcombine.high %v1846_v42, %v1846_v42  ;;  %v2268_v30 = vrot.slane %v7610_v49, %v7016_v16 }
0x1492   :  { %836 = vst.msk [vmem:[#allocation2 + $0x19] sm:$0x1] %vm463_vm3, %v816_v58  ;;  %v2696_v58 = vrot.slane %v2682_v28, %v7011_v6  ;;  %v404_v28 = vcombine.high %v7421_v37, %v7421_v37  ;;  %v888_v37 = vcombine.high %v7464_v36, %v7464_v36  ;;  %v521_v36 = vcombine.high %v7522_v48, %v7522_v48 }
0x1493   :  { %564 = vrot.lane.b32.xlu1 %v545_v47, %s6622_s3  ;;  %819 = vrot.lane.b32.xlu0 %v800_v50, %s6621_s2  ;;  %v7622_v47 = vrot.slane %v2328_v15, %v7011_v6  ;;  %v7630_v42 = vrot.slane %v1848_v61, %v7011_v6  ;;  %v1626_v48 = vcombine.high %v7580_v45, %v7580_v45 }
0x1494   :  { %v930_v35 = vpop.permute.xlu1 %929  ;;  %v1184_v46 = vpop.permute.xlu0 %1183  ;;  %v7639_v52 = vrot.slane %v2696_v58, %v7011_v6 }
0x1495   :  { %950 = vst.msk [vmem:[#allocation2 + $0x1e] sm:$0x1] %vm578_vm4, %v930_v35  ;;  %v2382_v35 = vrot.slane %v7622_v47, %v7016_v16  ;;  %v1904_v54 = vrot.slane %v7630_v42, %v7016_v16 }
0x1496   :  { %1204 = vst.msk [vmem:[#allocation2 + $0x1a] sm:$0x1] %vm463_vm3, %v1184_v46  ;;  %v2636_v46 = vrot.slane %v7625_v7, %v7016_v16  ;;  %v2728_v45 = vcombine.high %v7639_v52, %v7639_v52 }
0x1497   :  { %933 = vrot.lane.b32.xlu1 %v914_v53, %s6622_s3  ;;  %1187 = vrot.lane.b32.xlu0 %v1168_v33, %s6621_s2 }
0x1498   :  { %v1298_v18 = vpop.permute.xlu1 %1297  ;;  %v1552_v44 = vpop.permute.xlu0 %1551 }
0x1499   :  { %1318 = vst.msk [vmem:[#allocation2 + $0x1d] sm:$0x1] %vm578_vm4, %v1298_v18  ;;  %v7646_v18 = vrot.slane %v1962_v63, %v7011_v6  ;;  %v553_v63 = vrot.slane %v521_v36, %v7016_v16  ;;  %v1510_v36 = vcombine.high %v7496_v9, %v7496_v9 }
0x149a   :  { %1572 = vst.msk [vmem:[#allocation2 + $0x1b] sm:$0x1] %vm463_vm3, %v1552_v44  ;;  %v2750_v44 = vrot.slane %v7639_v52, %v7016_v16 }
0x149b   :  { %1301 = vrot.lane.b32.xlu1 %v1282_v40, %s6622_s3  ;;  %1555 = vrot.lane.b32.xlu0 %v1536_v0, %s6621_s2  ;;  %v7653_v40 = vrot.slane %v2216_v13, %v7011_v6  ;;  %v2018_v4 = vrot.slane %v7646_v18, %v7016_v16  ;;  %v1658_v13 = vrot.slane %v1626_v48, %v7016_v16 }
0x149c   :  { %v1666_v14 = vpop.permute.xlu1 %1665  ;;  %v1918_v57 = vpop.permute.xlu0 %1917  ;;  %v776_v48 = vcombine.high %v7529_v56, %v7529_v56 }
0x149d   :  { %1686 = vst.msk [vmem:[#allocation2 + $0x1c] sm:$0x1] %vm578_vm4, %v1666_v14  ;;  %v2272_v0 = vrot.slane %v7653_v40, %v7016_v16  ;;  %v2358_v14 = vrot.slane %v2330_v51, %v7011_v6 }
0x149e   :  { %1939 = vst.msk [vmem:[#allocation2 + $0x14] sm:$0x1] %vm463_vm3, %v1918_v57  ;;  %v7663_v57 = vrot.slane %v2584_v17, %v7011_v6 }
0x149f   :  { %1669 = vrot.lane.b32.xlu1 %v1650_v26, %s6622_s3  ;;  %1921 = vrot.lane.b32.xlu0 %v1900_v22, %s6621_s2  ;;  %v2698_v26 = vcombine.high %v2696_v58, %v2696_v58  ;;  %v2386_v22 = vrot.slane %v2358_v14, %v7016_v16  ;;  %v918_v58 = vrot.slane %v888_v37, %v7016_v16 }
0x14a0   :  { %v2032_v31 = vpop.permute.xlu1 %2031  ;;  %v2286_v39 = vpop.permute.xlu0 %2285  ;;  %v2640_v15 = vrot.slane %v7663_v57, %v7016_v16  ;;  %v2362_v17 = vcombine.high %v2358_v14, %v2358_v14 }
0x14a1   :  { %2053 = vst.msk [vmem:[#allocation2 + $0x13] sm:$0x1] %vm578_vm4, %v2032_v31  ;;  %v2726_v11 = vrot.slane %v2698_v26, %v7011_v6 }
0x14a2   :  { %2307 = vst.msk [vmem:[#allocation2 + $0x15] sm:$0x1] %vm463_vm3, %v2286_v39  ;;  %v434_v39 = vrot.slane %v404_v28, %v7016_v16 }
0x14a3   :  { %2035 = vrot.lane.b32.xlu1 %v2014_v34, %s6622_s3  ;;  %2289 = vrot.lane.b32.xlu0 %v2268_v30, %s6621_s2  ;;  %v2754_v31 = vrot.slane %v2726_v11, %v7016_v16  ;;  %v519_v34 = vcombine.high %v7440_v25, %v7440_v25  ;;  %v1256_v30 = vcombine.high %v7492_v21, %v7492_v21 }
0x14a4   :  { %v2400_v50 = vpop.permute.xlu1 %2399  ;;  %v2654_v27 = vpop.permute.xlu0 %2653  ;;  %v890_v21 = vcombine.high %v7546_v38, %v7546_v38  ;;  %v1992_v38 = vcombine.high %v7601_v19, %v7601_v19  ;;  %v1994_v19 = vcombine.high %v7646_v18, %v7646_v18 }
0x14a5   :  { %2421 = vst.msk [vmem:[#allocation2 + $0x12] sm:$0x1] %vm578_vm4, %v2400_v50  ;;  %v549_v61 = vrot.slane %v519_v34, %v7016_v16  ;;  %v1286_v25 = vrot.slane %v1256_v30, %v7016_v16  ;;  %v1624_v50 = vcombine.high %v7513_v24, %v7513_v24  ;;  %v1258_v24 = vcombine.high %v7559_v59, %v7559_v59 }
0x14a6   :  { %2675 = vst.msk [vmem:[#allocation2 + $0x16] sm:$0x1] %vm463_vm3, %v2654_v27  ;;  %v2360_v59 = vcombine.high %v7622_v47, %v7622_v47  ;;  %v2026_v47 = vrot.slane %v1994_v19, %v7016_v16  ;;  %v774_v34 = vcombine.high %v7444_v2, %v7444_v2 }
0x14a7   :  { %2403 = vrot.lane.b32.xlu1 %v2382_v35, %s6622_s3  ;;  %2657 = vrot.lane.b32.xlu0 %v2636_v46, %s6621_s2  ;;  %v1654_v27 = vrot.slane %v1624_v50, %v7016_v16  ;;  %v922_v35 = vrot.slane %v890_v21, %v7016_v16  ;;  %v1290_v46 = vrot.slane %v1258_v24, %v7016_v16 }
0x14a8   :  { %v2768_v53 = vpop.permute.xlu1 %2767  ;;  %v1920_v33 = vpop.permute.xlu0 %1919  ;;  %v804_v30 = vrot.slane %v774_v34, %v7016_v16 }
0x14a9   :  { %2789 = vst.msk [vmem:[#allocation2 + $0x11] sm:$0x1] %vm578_vm4, %v2768_v53  ;;  %v2022_v53 = vrot.slane %v1992_v38, %v7016_v16 }
0x14aa   :  { %1940 = vst.msk [vmem:[#allocation2 + $0x1c] sm:$0x1] %vm463_vm3, %v1920_v33  ;;  %v2390_v33 = vrot.slane %v2360_v59, %v7016_v16 }
0x14ab   :  { %2771 = vrot.lane.b32.xlu1 %v2750_v44, %s6622_s3  ;;  %1923 = vrot.lane.b32.xlu0 %v1904_v54, %s6621_s2  ;;  %v2758_v54 = vrot.slane %v2728_v45, %v7016_v16  ;;  %v1512_v45 = vcombine.high %v7572_v12, %v7572_v12 }
0x14af   :  { %2037 = vrot.lane.b32.xlu1 %v2018_v4, %s6622_s3  ;;  %2291 = vrot.lane.b32.xlu0 %v2272_v0, %s6621_s2 }
0x14b3   :  { %2405 = vrot.lane.b32.xlu1 %v2386_v22, %s6622_s3  ;;  %2659 = vrot.lane.b32.xlu0 %v2640_v15, %s6621_s2  ;;  %v2394_v22 = vrot.slane %v2362_v17, %v7016_v16  ;;  %v2730_v15 = vcombine.high %v2726_v11, %v2726_v11  ;;  %v2246_v17 = vcombine.high %v7610_v49, %v7610_v49 }
0x14b7   :  { %2773 = vrot.lane.b32.xlu1 %v2754_v31, %s6622_s3  ;;  %451 = vrot.lane.b32.xlu0 %v434_v39, %s6621_s2 }
0x14bb   :  { %566 = vrot.lane.b32.xlu1 %v549_v61, %s6622_s3 }
0x14bf   :  { %935 = vrot.lane.b32.xlu1 %v918_v58, %s6622_s3 }
0x14c3   :  { %1303 = vrot.lane.b32.xlu1 %v1286_v25, %s6622_s3  ;;  %v1142_v25 = vcombine.high %v7476_v20, %v7476_v20  ;;  %v1540_v20 = vrot.slane %v1510_v36, %v7016_v16 }
0x14c5   :  { %v1172_v2 = vrot.slane %v1142_v25, %v7016_v16 }
0x14c7   :  { %1671 = vrot.lane.b32.xlu1 %v1654_v27, %s6622_s3 }
0x14cb   :  { %568 = vrot.lane.b32.xlu1 %v553_v63, %s6622_s3 }
0x14cf   :  { %937 = vrot.lane.b32.xlu1 %v922_v35, %s6622_s3  ;;  %v406_v35 = vcombine.high %v7501_v62, %v7501_v62  ;;  %v808_v62 = vrot.slane %v776_v48, %v7016_v16 }
0x14d1   :  { %v438_v9 = vrot.slane %v406_v35, %v7016_v16  ;;  %v73_v35 = vld [vmem:[%s8445_s5] sm:$0xff] }
0x14d3   :  { %1305 = vrot.lane.b32.xlu1 %v1290_v46, %s6622_s3 }
0x14d7   :  { %1673 = vrot.lane.b32.xlu1 %v1658_v13, %s6622_s3 }
0x14db   :  { %2039 = vrot.lane.b32.xlu1 %v2022_v53, %s6622_s3  ;;  %v1144_v53 = vcombine.high %v7549_v32, %v7549_v32  ;;  %v1544_v32 = vrot.slane %v1512_v45, %v7016_v16 }
0x14dd   :  { %v1176_v56 = vrot.slane %v1144_v53, %v7016_v16  ;;  %v76_v53 = vld [vmem:[%s8445_s5 + $0x18] sm:$0xff] }
0x14df   :  { %2407 = vrot.lane.b32.xlu1 %v2390_v33, %s6622_s3 }
0x14e3   :  { %2775 = vrot.lane.b32.xlu1 %v2758_v54, %s6622_s3 }
0x14e5   :  { %v2909_v44 = vpop.permute.xlu1 %2908  ;;  %v2897_v51 = vpop.permute.xlu0 %2896 }
0x14e6   :  { %v2899_v4 = vadd.f32 %v2897_v51, %v6826_v43  ;;  %v2911_v52 = vadd.f32 %v2909_v44, %v6823_v41  ;;  %v2762_v43 = vrot.slane %v2730_v15, %v7016_v16  ;;  %v1878_v44 = vcombine.high %v7583_v23, %v7583_v23 }
0x14e7   :  { %2041 = vrot.lane.b32.xlu1 %v2026_v47, %s6622_s3  ;;  %v2276_v23 = vrot.slane %v2246_v17, %v7016_v16  ;;  %v1880_v15 = vcombine.high %v7630_v42, %v7630_v42 }
0x14e8   :  { %6497 = vtanh.f32 %v2899_v4  ;;  %v1908_v12 = vrot.slane %v1878_v44, %v7016_v16 }
0x14e9   :  { %v2034_v0 = vpop.permute.xlu1 %2033  ;;  %v2288_v26 = vpop.permute.xlu0 %2287  ;;  %6499 = vtanh.f32 %v2911_v52 }
0x14ea   :  { %2054 = vst.msk [vmem:[#allocation2 + $0x1b] sm:$0x1] %vm578_vm4, %v2034_v0  ;;  %v2614_v0 = vcombine.high %v7625_v7, %v7625_v7  ;;  %v1912_v7 = vrot.slane %v1880_v15, %v7016_v16 }
0x14eb   :  { %2308 = vst.msk [vmem:[#allocation2 + $0x1d] sm:$0x1] %vm463_vm3, %v2288_v26  ;;  %2409 = vrot.lane.b32.xlu1 %v2394_v22, %s6622_s3 }
0x14ec   :  { %v2644_v49 = vrot.slane %v2614_v0, %v7016_v16 }
0x14ed   :  { %v2402_v18 = vpop.permute.xlu1 %2401  ;;  %v2656_v14 = vpop.permute.xlu0 %2655 }
0x14ee   :  { %2422 = vst.msk [vmem:[#allocation2 + $0x1a] sm:$0x1] %vm578_vm4, %v2402_v18 }
0x14ef   :  { %2676 = vst.msk [vmem:[#allocation2 + $0x1e] sm:$0x1] %vm463_vm3, %v2656_v14  ;;  %2777 = vrot.lane.b32.xlu1 %v2762_v43, %s6622_s3  ;;  %v2248_v43 = vcombine.high %v7653_v40, %v7653_v40 }
0x14f1   :  { %v2770_v41 = vpop.permute.xlu1 %2769  ;;  %v448_v28 = vpop.permute.xlu0 %447  ;;  %v2280_v42 = vrot.slane %v2248_v43, %v7016_v16 }
0x14f2   :  { %2790 = vst.msk [vmem:[#allocation2 + $0x19] sm:$0x1] %vm578_vm4, %v2770_v41  ;;  %v6498_v11 = vpop.eup %6497 }
0x14f3   :  { %468 = vst.msk [vmem:[#allocation2 + $0x20] sm:$0x1] %vm463_vm3, %v448_v28  ;;  %2915 = vrot.lane.b32.xlu0 %v6498_v11, %s6621_s2  ;;  %v6500_v61 = vpop.eup %6499  ;;  %v2616_v11 = vcombine.high %v7663_v57, %v7663_v57 }
0x14f5   :  { %v563_v31 = vpop.permute.xlu1 %562  ;;  %v818_v39 = vpop.permute.xlu0 %817  ;;  %v2648_v40 = vrot.slane %v2616_v11, %v7016_v16 }
0x14f6   :  { %583 = vst.msk [vmem:[#allocation2 + $0x27] sm:$0x1] %vm578_vm4, %v563_v31 }
0x14f7   :  { %837 = vst.msk [vmem:[#allocation2 + $0x21] sm:$0x1] %vm463_vm3, %v818_v39  ;;  %2926 = vrot.lane.b32.xlu0 %v6500_v61, %s6621_s2 }
0x14f9   :  { %v932_v37 = vpop.permute.xlu1 %931  ;;  %v1186_v58 = vpop.permute.xlu0 %1185 }
0x14fa   :  { %951 = vst.msk [vmem:[#allocation2 + $0x26] sm:$0x1] %vm578_vm4, %v932_v37 }
0x14fb   :  { %1205 = vst.msk [vmem:[#allocation2 + $0x22] sm:$0x1] %vm463_vm3, %v1186_v58  ;;  %821 = vrot.lane.b32.xlu0 %v804_v30, %s6621_s2 }
0x14fd   :  { %v1300_v50 = vpop.permute.xlu1 %1299  ;;  %v1554_v27 = vpop.permute.xlu0 %1553 }
0x14fe   :  { %1319 = vst.msk [vmem:[#allocation2 + $0x25] sm:$0x1] %vm578_vm4, %v1300_v50 }
0x14ff   :  { %1573 = vst.msk [vmem:[#allocation2 + $0x23] sm:$0x1] %vm463_vm3, %v1554_v27  ;;  %1189 = vrot.lane.b32.xlu0 %v1172_v2, %s6621_s2  ;;  %v2913_v2 = vsub.f32 1.0, %v7380_v55 }
0x1501   :  { %v1668_v63 = vpop.permute.xlu1 %1667  ;;  %v450_v21 = vpop.permute.xlu0 %449 }
0x1502   :  { %1687 = vst.msk [vmem:[#allocation2 + $0x24] sm:$0x1] %vm578_vm4, %v1668_v63 }
0x1503   :  { %469 = vst.msk [vmem:[#allocation2 + $0x28] sm:$0x1] %vm463_vm3, %v450_v21  ;;  %1557 = vrot.lane.b32.xlu0 %v1540_v20, %s6621_s2  ;;  %v2922_v21 = vmul.f32 %v7380_v55, %v7376_v29  ;;  %v75_v55 = vld [vmem:[%s8445_s5 + $0x10] sm:$0xff] }
0x1505   :  { %v565_v24 = vpop.permute.xlu1 %564  ;;  %v820_v46 = vpop.permute.xlu0 %819 }
0x1506   :  { %584 = vst.msk [vmem:[#allocation2 + $0x2f] sm:$0x1] %vm578_vm4, %v565_v24  ;;  %v74_v24 = vld [vmem:[%s8445_s5 + $0x8] sm:$0xff] }
0x1507   :  { %838 = vst.msk [vmem:[#allocation2 + $0x29] sm:$0x1] %vm463_vm3, %v820_v46  ;;  %453 = vrot.lane.b32.xlu0 %v438_v9, %s6621_s2  ;;  %v2924_v9 = vsub.f32 1.0, %v7382_v8  ;;  %v6323_v48 = vpack.c.bf16 %v74_v24, %v73_v35 }
0x1509   :  { %v934_v13 = vpop.permute.xlu1 %933  ;;  %v1188_v38 = vpop.permute.xlu0 %1187  ;;  %6324 = vmatprep.subr.bf16.mxu0 %v6323_v48 }
0x150a   :  { %952 = vst.msk [vmem:[#allocation2 + $0x2e] sm:$0x1] %vm578_vm4, %v934_v13  ;;  %6326 = vmatpush3.bf16.msra.mxu0 %v6323_v48 }
0x150b   :  { %1206 = vst.msk [vmem:[#allocation2 + $0x2a] sm:$0x1] %vm463_vm3, %v1188_v38  ;;  %823 = vrot.lane.b32.xlu0 %v808_v62, %s6621_s2  ;;  %v2933_v62 = vmul.f32 %v7382_v8, %v7378_v60 }
0x150d   :  { %v1302_v59 = vpop.permute.xlu1 %1301  ;;  %v1556_v33 = vpop.permute.xlu0 %1555 }
0x150e   :  { %1320 = vst.msk [vmem:[#allocation2 + $0x2d] sm:$0x1] %vm578_vm4, %v1302_v59 }
0x150f   :  { %1574 = vst.msk [vmem:[#allocation2 + $0x2b] sm:$0x1] %vm463_vm3, %v1556_v33  ;;  %1191 = vrot.lane.b32.xlu0 %v1176_v56, %s6621_s2 }
0x1511   :  { %v1670_v54 = vpop.permute.xlu1 %1669  ;;  %v1922_v19 = vpop.permute.xlu0 %1921 }
0x1512   :  { %1688 = vst.msk [vmem:[#allocation2 + $0x2c] sm:$0x1] %vm578_vm4, %v1670_v54 }
0x1513   :  { %1941 = vst.msk [vmem:[#allocation2 + $0x24] sm:$0x1] %vm463_vm3, %v1922_v19  ;;  %1559 = vrot.lane.b32.xlu0 %v1544_v32, %s6621_s2  ;;  %v6327_v32 = vpack.c.bf16 %v76_v53, %v75_v55 }
0x1515   :  { %v2036_v51 = vpop.permute.xlu1 %2035  ;;  %v2290_v47 = vpop.permute.xlu0 %2289  ;;  %6328 = vmatprep.subr.bf16.mxu0 %v6327_v32 }
0x1516   :  { %2055 = vst.msk [vmem:[#allocation2 + $0x23] sm:$0x1] %vm578_vm4, %v2036_v51  ;;  %6330 = vmatpush3.bf16.msra.mxu0 %v6327_v32 }
0x1517   :  { %2309 = vst.msk [vmem:[#allocation2 + $0x25] sm:$0x1] %vm463_vm3, %v2290_v47  ;;  %1925 = vrot.lane.b32.xlu0 %v1908_v12, %s6621_s2  ;;  %6133 = vmatprep.subr.mxu0 %v6617_v10 }
0x1519   :  { %v2404_v4 = vpop.permute.xlu1 %2403  ;;  %v2658_v52 = vpop.permute.xlu0 %2657 }
0x151a   :  { %2423 = vst.msk [vmem:[#allocation2 + $0x22] sm:$0x1] %vm578_vm4, %v2404_v4 }
0x151b   :  { %2677 = vst.msk [vmem:[#allocation2 + $0x26] sm:$0x1] %vm463_vm3, %v2658_v52  ;;  %2293 = vrot.lane.b32.xlu0 %v2276_v23, %s6621_s2 }
0x151d   :  { %v2772_v26 = vpop.permute.xlu1 %2771  ;;  %v1924_v22 = vpop.permute.xlu0 %1923 }
0x151e   :  { %2791 = vst.msk [vmem:[#allocation2 + $0x21] sm:$0x1] %vm578_vm4, %v2772_v26 }
0x151f   :  { %1942 = vst.msk [vmem:[#allocation2 + $0x2c] sm:$0x1] %vm463_vm3, %v1924_v22  ;;  %2661 = vrot.lane.b32.xlu0 %v2644_v49, %s6621_s2 }
0x1521   :  { %v2038_v18 = vpop.permute.xlu1 %2037  ;;  %v2292_v14 = vpop.permute.xlu0 %2291 }
0x1522   :  { %2056 = vst.msk [vmem:[#allocation2 + $0x2b] sm:$0x1] %vm578_vm4, %v2038_v18 }
0x1523   :  { %2310 = vst.msk [vmem:[#allocation2 + $0x2d] sm:$0x1] %vm463_vm3, %v2292_v14  ;;  %1927 = vrot.lane.b32.xlu0 %v1912_v7, %s6621_s2 }
0x1525   :  { %v2406_v41 = vpop.permute.xlu1 %2405  ;;  %v2660_v28 = vpop.permute.xlu0 %2659 }
0x1526   :  { %2424 = vst.msk [vmem:[#allocation2 + $0x2a] sm:$0x1] %vm578_vm4, %v2406_v41 }
0x1527   :  { %2678 = vst.msk [vmem:[#allocation2 + $0x2e] sm:$0x1] %vm463_vm3, %v2660_v28  ;;  %2295 = vrot.lane.b32.xlu0 %v2280_v42, %s6621_s2 }
0x1529   :  { %v2774_v31 = vpop.permute.xlu1 %2773  ;;  %v452_v39 = vpop.permute.xlu0 %451 }
0x152a   :  { %2792 = vst.msk [vmem:[#allocation2 + $0x29] sm:$0x1] %vm578_vm4, %v2774_v31 }
0x152b   :  { %470 = vst.msk [vmem:[#allocation2 + $0x30] sm:$0x1] %vm463_vm3, %v452_v39  ;;  %2663 = vrot.lane.b32.xlu0 %v2648_v40, %s6621_s2 }
0x152d   :  { %v567_v34 = vpop.permute.xlu1 %566 }
0x152e   :  { %585 = vst.msk [vmem:[#allocation2 + $0x37] sm:$0x1] %vm578_vm4, %v567_v34 }
0x1531   :  { %v936_v61 = vpop.permute.xlu1 %935 }
0x1532   :  { %953 = vst.msk [vmem:[#allocation2 + $0x36] sm:$0x1] %vm578_vm4, %v936_v61 }
0x1535   :  { %v1304_v37 = vpop.permute.xlu1 %1303 }
0x1536   :  { %1321 = vst.msk [vmem:[#allocation2 + $0x35] sm:$0x1] %vm578_vm4, %v1304_v37 }
0x1539   :  { %v1672_v57 = vpop.permute.xlu1 %1671 }
0x153a   :  { %1689 = vst.msk [vmem:[#allocation2 + $0x34] sm:$0x1] %vm578_vm4, %v1672_v57 }
0x153d   :  { %v569_v58 = vpop.permute.xlu1 %568 }
0x153e   :  { %586 = vst.msk [vmem:[#allocation2 + $0x3f] sm:$0x1] %vm578_vm4, %v569_v58 }
0x1541   :  { %v938_v30 = vpop.permute.xlu1 %937 }
0x1542   :  { %954 = vst.msk [vmem:[#allocation2 + $0x3e] sm:$0x1] %vm578_vm4, %v938_v30 }
0x1545   :  { %v1306_v25 = vpop.permute.xlu1 %1305 }
0x1546   :  { %1322 = vst.msk [vmem:[#allocation2 + $0x3d] sm:$0x1] %vm578_vm4, %v1306_v25 }
0x1549   :  { %v1674_v50 = vpop.permute.xlu1 %1673 }
0x154a   :  { %1690 = vst.msk [vmem:[#allocation2 + $0x3c] sm:$0x1] %vm578_vm4, %v1674_v50 }
0x154d   :  { %v2040_v27 = vpop.permute.xlu1 %2039 }
0x1551   :  { %v2408_v63 = vpop.permute.xlu1 %2407 }
0x1555   :  { %v2776_v59 = vpop.permute.xlu1 %2775 }
0x1559   :  { %v2042_v52 = vpop.permute.xlu1 %2041 }
0x155d   :  { %v2410_v41 = vpop.permute.xlu1 %2409 }
0x1561   :  { %v2778_v37 = vpop.permute.xlu1 %2777 }
0x1565   :  { %v2916_v36 = vpop.permute.xlu0 %2915 }
0x1566   :  { %v2918_v20 = vmul.f32 %v2916_v36, %v2913_v2 }
0x1568   :  { %v2923_v46 = vadd.f32 %v2922_v21, %v2918_v20 }
0x1569   :  { %v2927_v13 = vpop.permute.xlu0 %2926 }
0x156a   :  { %v2943_v38 = vrot.slane %v2923_v46, %v7011_v6  ;;  %v2929_v29 = vmul.f32 %v2927_v13, %v2924_v9  ;;  %v2936_v54 = vcombine.high %v2923_v46, %v2923_v46 }
0x156c   :  { %v2951_v33 = vcombine.high %v2943_v38, %v2943_v38  ;;  %v2959_v56 = vrot.slane %v2943_v38, %v7011_v6  ;;  %v2934_v45 = vadd.f32 %v2933_v62, %v2929_v29  ;;  %v2950_v12 = vrot.slane %v2936_v54, %v7011_v6 }
0x156d   :  { %v822_v19 = vpop.permute.xlu0 %821 }
0x156e   :  { %v3057_v60 = vrot.slane %v2934_v45, %v7011_v6  ;;  %839 = vst.msk [vmem:[#allocation2 + $0x31] sm:$0x1] %vm463_vm3, %v822_v19  ;;  %v2988_v8 = vrot.slane %v2959_v56, %v7016_v16  ;;  %v2973_v44 = vrot.slane %v2951_v33, %v7011_v6  ;;  %v3050_v17 = vcombine.high %v2934_v45, %v2934_v45 }
0x156f   :  { %2793 = vst.msk [vmem:[#allocation2 + $0x31] sm:$0x1] %vm578_vm4, %v2776_v59  ;;  %v2981_v22 = vcombine.high %v2959_v56, %v2959_v56  ;;  %v2966_v15 = vrot.slane %v2950_v12, %v7011_v6  ;;  %v2952_v28 = vcombine.high %v2950_v12, %v2950_v12 }
0x1570   :  { %v3065_v51 = vcombine.high %v3057_v60, %v3057_v60  ;;  %v3073_v47 = vrot.slane %v3057_v60, %v7011_v6  ;;  %3017 = vrot.lane.b32.xlu0 %v2988_v8, %s6621_s2  ;;  %v2992_v0 = vrot.slane %v2973_v44, %v7016_v16  ;;  %v3064_v18 = vrot.slane %v3050_v17, %v7011_v6 }
0x1571   :  { %v1190_v4 = vpop.permute.xlu0 %1189  ;;  %v2996_v7 = vrot.slane %v2981_v22, %v7016_v16  ;;  %v3004_v31 = vrot.slane %v2966_v15, %v7016_v16  ;;  %v2983_v40 = vcombine.high %v2973_v44, %v2973_v44  ;;  %v2980_v61 = vrot.slane %v2952_v28, %v7011_v6  ;;  %v79_v28 = vld [vmem:[%s8447_s7 + $0x8] sm:$0xff] }
0x1572   :  { %1207 = vst.msk [vmem:[#allocation2 + $0x32] sm:$0x1] %vm463_vm3, %v1190_v4  ;;  %v3102_v23 = vrot.slane %v3073_v47, %v7016_v16  ;;  %v3087_v26 = vrot.slane %v3065_v51, %v7011_v6  ;;  %v3095_v43 = vcombine.high %v3073_v47, %v3073_v47  ;;  %v3080_v39 = vrot.slane %v3064_v18, %v7011_v6 }
0x1573   :  { %2425 = vst.msk [vmem:[#allocation2 + $0x32] sm:$0x1] %vm578_vm4, %v2408_v63  ;;  %v3066_v57 = vcombine.high %v3064_v18, %v3064_v18  ;;  %v3000_v30 = vrot.slane %v2983_v40, %v7016_v16  ;;  %v3008_v2 = vrot.slane %v2980_v61, %v7016_v16  ;;  %v2982_v63 = vcombine.high %v2966_v15, %v2966_v15 }
0x1574   :  { %3131 = vrot.lane.b32.xlu1 %v3102_v23, %s6622_s3  ;;  %3019 = vrot.lane.b32.xlu0 %v2992_v0, %s6621_s2  ;;  %v3106_v14 = vrot.slane %v3087_v26, %v7016_v16  ;;  %v3110_v11 = vrot.slane %v3095_v43, %v7016_v16  ;;  %v3118_v58 = vrot.slane %v3080_v39, %v7016_v16  ;;  %v6626_v40 = vmov 0  }
0x1575   :  { %v1558_v49 = vpop.permute.xlu0 %1557  ;;  %v3097_v25 = vcombine.high %v3087_v26, %v3087_v26  ;;  %v3094_v36 = vrot.slane %v3066_v57, %v7011_v6  ;;  %v3012_v35 = vrot.slane %v2982_v63, %v7016_v16  ;;  %v3096_v24 = vcombine.high %v3080_v39, %v3080_v39  ;;  %6402 = vset.pattern.permute.xlu1 %v6626_v40 }
0x1576   :  { %1575 = vst.msk [vmem:[#allocation2 + $0x33] sm:$0x1] %vm463_vm3, %v1558_v49  ;;  %v2984_v46 = vcombine.high %v2980_v61, %v2980_v61  ;;  %6403 = vset.pattern.permute.xlu0 %v6626_v40 }
0x1577   :  { %2057 = vst.msk [vmem:[#allocation2 + $0x33] sm:$0x1] %vm578_vm4, %v2040_v27  ;;  %v3114_v27 = vrot.slane %v3097_v25, %v7016_v16  ;;  %v3122_v20 = vrot.slane %v3094_v36, %v7016_v16  ;;  %v3126_v48 = vrot.slane %v3096_v24, %v7016_v16  ;;  %v3098_v38 = vcombine.high %v3094_v36, %v3094_v36 }
0x1578   :  { %3133 = vrot.lane.b32.xlu1 %v3106_v14, %s6622_s3  ;;  %3021 = vrot.lane.b32.xlu0 %v2996_v7, %s6621_s2  ;;  %v3016_v13 = vrot.slane %v2984_v46, %v7016_v16 }
0x1579   :  { %v454_v42 = vpop.permute.xlu0 %453  ;;  %v3130_v29 = vrot.slane %v3098_v38, %v7016_v16 }
0x157a   :  { %471 = vst.msk [vmem:[#allocation2 + $0x38] sm:$0x1] %vm463_vm3, %v454_v42  ;;  %v80_v42 = vld [vmem:[%s8447_s7 + $0x10] sm:$0xff] }
0x157c   :  { %3135 = vrot.lane.b32.xlu1 %v3110_v11, %s6622_s3  ;;  %3025 = vrot.lane.b32.xlu0 %v3004_v31, %s6621_s2  ;;  %v81_v31 = vld [vmem:[%s8447_s7 + $0x18] sm:$0xff] }
0x157d   :  { %v824_v34 = vpop.permute.xlu0 %823  ;;  %v6335_v39 = vpack.c.bf16 %v81_v31, %v80_v42 }
0x157e   :  { %840 = vst.msk [vmem:[#allocation2 + $0x39] sm:$0x1] %vm463_vm3, %v824_v34  ;;  %v5807_v34 = vld [vmem:[%s8446_s6] ss:$0 sm:$0xff] }
0x157f   :  { %2794 = vst.msk [vmem:[#allocation2 + $0x39] sm:$0x1] %vm578_vm4, %v2778_v37 }
0x1580   :  { %3139 = vrot.lane.b32.xlu1 %v3118_v58, %s6622_s3  ;;  %3023 = vrot.lane.b32.xlu0 %v3000_v30, %s6621_s2 }
0x1581   :  { %v1192_v50 = vpop.permute.xlu0 %1191 }
0x1582   :  { %1208 = vst.msk [vmem:[#allocation2 + $0x3a] sm:$0x1] %vm463_vm3, %v1192_v50 }
0x1583   :  { %2426 = vst.msk [vmem:[#allocation2 + $0x3a] sm:$0x1] %vm578_vm4, %v2410_v41  ;;  %v78_v41 = vld [vmem:[%s8447_s7] sm:$0xff] }
0x1584   :  { %3137 = vrot.lane.b32.xlu1 %v3114_v27, %s6622_s3  ;;  %3027 = vrot.lane.b32.xlu0 %v3008_v2, %s6621_s2  ;;  %v6331_v11 = vpack.c.bf16 %v79_v28, %v78_v41 }
0x1585   :  { %v1560_v21 = vpop.permute.xlu0 %1559 }
0x1586   :  { %1576 = vst.msk [vmem:[#allocation2 + $0x3b] sm:$0x1] %vm463_vm3, %v1560_v21  ;;  %6332 = vmatprep.subr.bf16.mxu1 %v6331_v11 }
0x1587   :  { %2058 = vst.msk [vmem:[#allocation2 + $0x3b] sm:$0x1] %vm578_vm4, %v2042_v52  ;;  %6334 = vmatpush3.bf16.msra.mxu1 %v6331_v11 }
0x1588   :  { %3141 = vrot.lane.b32.xlu1 %v3122_v20, %s6622_s3  ;;  %3029 = vrot.lane.b32.xlu0 %v3012_v35, %s6621_s2 }
0x1589   :  { %v1926_v9 = vpop.permute.xlu0 %1925  ;;  %6336 = vmatprep.subr.bf16.mxu1 %v6335_v39 }
0x158a   :  { %1943 = vst.msk [vmem:[#allocation2 + $0x34] sm:$0x1] %vm463_vm3, %v1926_v9 }
0x158b   :  { %6338 = vmatpush3.bf16.msra.mxu1 %v6335_v39 }
0x158c   :  { %3143 = vrot.lane.b32.xlu1 %v3126_v48, %s6622_s3  ;;  %3031 = vrot.lane.b32.xlu0 %v3016_v13, %s6621_s2 }
0x158d   :  { %v2294_v62 = vpop.permute.xlu0 %2293  ;;  %6143 = vmatprep.subr.mxu1 %v6617_v10 }
0x158e   :  { %2311 = vst.msk [vmem:[#allocation2 + $0x35] sm:$0x1] %vm463_vm3, %v2294_v62 }
0x1590   :  { %3145 = vrot.lane.b32.xlu1 %v3130_v29, %s6622_s3 }
0x1591   :  { %v2662_v55 = vpop.permute.xlu0 %2661 }
0x1592   :  { %2679 = vst.msk [vmem:[#allocation2 + $0x36] sm:$0x1] %vm463_vm3, %v2662_v55 }
0x1595   :  { %v1928_v53 = vpop.permute.xlu0 %1927 }
0x1596   :  { %1944 = vst.msk [vmem:[#allocation2 + $0x3c] sm:$0x1] %vm463_vm3, %v1928_v53 }
0x1599   :  { %v2296_v59 = vpop.permute.xlu0 %2295 }
0x159a   :  { %2312 = vst.msk [vmem:[#allocation2 + $0x3d] sm:$0x1] %vm463_vm3, %v2296_v59 }
0x159d   :  { %v2664_v33 = vpop.permute.xlu0 %2663 }
0x159e   :  { %2680 = vst.msk [vmem:[#allocation2 + $0x3e] sm:$0x1] %vm463_vm3, %v2664_v33 }
0x15e2   :  { %v3018_v56 = vpop.permute.xlu0 %3017 }
0x15e3   :  { %3041 = vst.msk [vmem:[#allocation2 + $0x7] sm:$0x1] %vm463_vm3, %v3018_v56 }
0x15e6   :  { %v3132_v45 = vpop.permute.xlu1 %3131  ;;  %v3020_v54 = vpop.permute.xlu0 %3019 }
0x15e7   :  { %3155 = vst.msk [vmem:[#allocation2] sm:$0x1] %vm578_vm4, %v3132_v45 }
0x15e8   :  { %3042 = vst.msk [vmem:[#allocation2 + $0xf] sm:$0x1] %vm463_vm3, %v3020_v54 }
0x15ea   :  { %v3134_v19 = vpop.permute.xlu1 %3133  ;;  %v3022_v32 = vpop.permute.xlu0 %3021 }
0x15eb   :  { %3156 = vst.msk [vmem:[#allocation2 + $0x8] sm:$0x1] %vm578_vm4, %v3134_v19 }
0x15ec   :  { %3043 = vst.msk [vmem:[#allocation2 + $0x17] sm:$0x1] %vm463_vm3, %v3022_v32 }
0x15ee   :  { %v3136_v60 = vpop.permute.xlu1 %3135  ;;  %v3026_v8 = vpop.permute.xlu0 %3025  ;;  %v3163_v44 = vld [vmem:[#allocation2] sm:$0xff] }
0x15ef   :  { %3157 = vst.msk [vmem:[#allocation2 + $0x10] sm:$0x1] %vm578_vm4, %v3136_v60  ;;  %6101 = vmatprep.mubr.msk.f32.mxu0 %vm218_vm2, %v3163_v44 }
0x15f0   :  { %3045 = vst.msk [vmem:[#allocation2 + $0x27] sm:$0x1] %vm463_vm3, %v3026_v8  ;;  %v3476_v8 = vand.u32 127, %v362_v1 }
0x15f2   :  { %v3140_v51 = vpop.permute.xlu1 %3139  ;;  %v3024_v47 = vpop.permute.xlu0 %3023  ;;  %v7919_v12 = vld [vmem:[#allocation2 + $0x8] sm:$0xff] }
0x15f3   :  { %3159 = vst.msk [vmem:[#allocation2 + $0x20] sm:$0x1] %vm578_vm4, %v3140_v51  ;;  %6102 = vmatmul.mubr.msk.f32.vlgmr.msra.gmra.mrb[14].mxu0 %vm218_vm2, %v7919_v12 }
0x15f4   :  { %3044 = vst.msk [vmem:[#allocation2 + $0x1f] sm:$0x1] %vm463_vm3, %v3024_v47  ;;  %6134 = vmatpush3.msra.mxu0 %v3163_v44  ;;  %v8006_v47 = vsub.s32 %v3476_v8, %v7008_v5 }
0x15f5   :  { %6138 = vmatprep.subr.mxu0 %v6617_v10 }
0x15f6   :  { %v3138_v17 = vpop.permute.xlu1 %3137  ;;  %v3028_v4 = vpop.permute.xlu0 %3027  ;;  %v3165_v52 = vld [vmem:[#allocation2 + $0x10] sm:$0xff] }
0x15f7   :  { %3158 = vst.msk [vmem:[#allocation2 + $0x18] sm:$0x1] %vm578_vm4, %v3138_v17  ;;  %6104 = vmatprep.mubr.msk.f32.mxu0 %vm218_vm2, %v3165_v52 }
0x15f8   :  { %3046 = vst.msk [vmem:[#allocation2 + $0x2f] sm:$0x1] %vm463_vm3, %v3028_v4 }
0x15fa   :  { %v3142_v23 = vpop.permute.xlu1 %3141  ;;  %v3030_v0 = vpop.permute.xlu0 %3029  ;;  %v7937_v15 = vld [vmem:[#allocation2 + $0x20] sm:$0xff] }
0x15fb   :  { %3160 = vst.msk [vmem:[#allocation2 + $0x28] sm:$0x1] %vm578_vm4, %v3142_v23 }
0x15fc   :  { %3047 = vst.msk [vmem:[#allocation2 + $0x37] sm:$0x1] %vm463_vm3, %v3030_v0 }
0x15fe   :  { %v3144_v26 = vpop.permute.xlu1 %3143  ;;  %v3032_v22 = vpop.permute.xlu0 %3031  ;;  %v7931_v49 = vld [vmem:[#allocation2 + $0x18] sm:$0xff] }
0x15ff   :  { %3161 = vst.msk [vmem:[#allocation2 + $0x30] sm:$0x1] %vm578_vm4, %v3144_v26  ;;  %6105 = vmatmul.mubr.msk.f32.gmra.mrb[16].mxu0 %vm218_vm2, %v7931_v49 }
0x1600   :  { %3048 = vst.msk [vmem:[#allocation2 + $0x3f] sm:$0x1] %vm463_vm3, %v3032_v22  ;;  %6107 = vmatprep.mubr.msk.f32.mxu0 %vm218_vm2, %v7937_v15 }
0x1602   :  { %v3146_v18 = vpop.permute.xlu1 %3145  ;;  %v7941_v14 = vld [vmem:[#allocation2 + $0x28] sm:$0xff] }
0x1603   :  { %3162 = vst.msk [vmem:[#allocation2 + $0x38] sm:$0x1] %vm578_vm4, %v3146_v18  ;;  %6108 = vmatmul.mubr.msk.f32.gmra.mrb[18].mxu0 %vm218_vm2, %v7941_v14 }
0x1606   :  { %v7946_v7 = vld [vmem:[#allocation2 + $0x30] sm:$0xff] }
0x1607   :  { %6110 = vmatprep.mubr.msk.f32.mxu0 %vm218_vm2, %v7946_v7 }
0x160a   :  { %v7950_v43 = vld [vmem:[#allocation2 + $0x38] sm:$0xff] }
0x160b   :  { %6111 = vmatmul.mubr.msk.f32.gmra.mrb[20].mxu0 %vm218_vm2, %v7950_v43 }
0x160c   :  { %6135 = vmatprep.mubr.msk.f32.mxu0 %vm6616_vm1, %v6617_v10 }
0x16c6   :  { %v6103_v61 = vpop.f32.mrb[14].mxu0 }
0x16c7   :  { %v3273_v37 = vadd.f32 %v6103_v61, %v5807_v34  ;;  %v3267_v57 = vpop.f32.mrb[15].mxu0 }
0x16c8   :  { %v3268_v58 = vadd.f32 %v5807_v34, %v3267_v57 }
0x16ca   :  { %6501 = vtanh.f32 %v3268_v58 }
0x16cb   :  { %6503 = vtanh.f32 %v3273_v37 }
0x16d2   :  { %v6106_v30 = vpop.f32.mrb[16].mxu0 }
0x16d3   :  { %v3283_v25 = vadd.f32 %v6106_v30, %v5807_v34  ;;  %v3277_v50 = vpop.f32.mrb[17].mxu0 }
0x16d4   :  { %v6502_v27 = vpop.eup %6501  ;;  %v3278_v2 = vadd.f32 %v5807_v34, %v3277_v50  ;;  %v3539_v50 = vsub.s32 2, %v7008_v5 }
0x16d5   :  { %v6504_v36 = vpop.eup %6503  ;;  %6121 = vmatprep.mubr.msk.f32.mxu1 %vm218_vm2, %v6502_v27 }
0x16d6   :  { %6505 = vtanh.f32 %v3278_v2  ;;  %v6109_v63 = vpop.f32.mrb[18].mxu0  ;;  %6122 = vmatmul.mubr.msk.f32.vlgmr.msra.gmra.mrb[10].mxu1 %vm218_vm2, %v6504_v36 }
0x16d7   :  { %6507 = vtanh.f32 %v3283_v25  ;;  %v3293_v21 = vadd.f32 %v6109_v63, %v5807_v34  ;;  %6144 = vmatpush3.msra.mxu1 %v3165_v52  ;;  %v3287_v20 = vpop.f32.mrb[19].mxu0  ;;  %v3535_v25 = vsub.s32 1, %v7008_v5  ;;  %v3543_v63 = vsub.s32 3, %v7008_v5 }
0x16d8   :  { %v3288_v35 = vadd.f32 %v5807_v34, %v3287_v20  ;;  %6153 = vmatprep.subr.mxu1 %v6617_v10 }
0x16da   :  { %6509 = vtanh.f32 %v3288_v35 }
0x16db   :  { %6511 = vtanh.f32 %v3293_v21 }
0x16de   :  { %v6112_v24 = vpop.f32.mrb[20].mxu0 }
0x16df   :  { %v3303_v46 = vadd.f32 %v6112_v24, %v5807_v34  ;;  %v3297_v9 = vpop.f32.mrb[21].mxu0 }
0x16e0   :  { %v6506_v48 = vpop.eup %6505  ;;  %v3298_v13 = vadd.f32 %v5807_v34, %v3297_v9 }
0x16e1   :  { %v6508_v38 = vpop.eup %6507  ;;  %6124 = vmatprep.mubr.msk.f32.mxu1 %vm218_vm2, %v6506_v48 }
0x16e2   :  { %6513 = vtanh.f32 %v3298_v13  ;;  %6125 = vmatmul.mubr.msk.f32.gmra.mrb[12].mxu1 %vm218_vm2, %v6508_v38  ;;  %v3551_v38 = vsub.s32 5, %v7008_v5 }
0x16e3   :  { %6515 = vtanh.f32 %v3303_v46  ;;  %v3547_v46 = vsub.s32 4, %v7008_v5 }
0x16e4   :  { %v6510_v62 = vpop.eup %6509 }
0x16e5   :  { %v6512_v29 = vpop.eup %6511  ;;  %6127 = vmatprep.mubr.msk.f32.mxu1 %vm218_vm2, %v6510_v62 }
0x16e6   :  { %6128 = vmatmul.mubr.msk.f32.gmra.mrb[14].mxu1 %vm218_vm2, %v6512_v29 }
0x16ec   :  { %v6514_v55 = vpop.eup %6513 }
0x16ed   :  { %v6516_v53 = vpop.eup %6515  ;;  %6130 = vmatprep.mubr.msk.f32.mxu1 %vm218_vm2, %v6514_v55 }
0x16ee   :  { %6131 = vmatmul.mubr.msk.f32.gmra.mrb[16].mxu1 %vm218_vm2, %v6516_v53  ;;  %v3555_v53 = vsub.s32 6, %v7008_v5 }
0x16ef   :  { %6145 = vmatprep.mubr.msk.f32.mxu1 %vm6616_vm1, %v6617_v10 }
0x17a9   :  { %v7983_v59 = vpop.f32.mrb[10].mxu1 }
0x17aa   :  { %3455 = vperm.xlu1 %6402, %v7983_v59   ;;  %v3404_v33 = vpop.f32.mrb[11].mxu1 }
0x17ab   :  { %3452 = vperm.xlu0 %6403, %v3404_v33  }
0x17b5   :  { %v7986_v56 = vpop.f32.mrb[12].mxu1 }
0x17b6   :  { %3461 = vperm.xlu0 %6403, %v7986_v56   ;;  %v7989_v45 = vpop.f32.mrb[13].mxu1 }
0x17b7   :  { %3458 = vperm.xlu1 %6402, %v7989_v45  }
0x17b9   :  { %v7992_v54 = vpop.f32.mrb[14].mxu1 }
0x17ba   :  { %3467 = vperm.xlu0 %6403, %v7992_v54   ;;  %v7995_v19 = vpop.f32.mrb[15].mxu1 }
0x17bb   :  { %3464 = vperm.xlu1 %6402, %v7995_v19  }
0x17c1   :  { %v7998_v32 = vpop.f32.mrb[16].mxu1 }
0x17c2   :  { %3473 = vperm.xlu0 %6403, %v7998_v32   ;;  %v8001_v60 = vpop.f32.mrb[17].mxu1 }
0x17c3   :  { %3470 = vperm.xlu1 %6402, %v8001_v60  }
0x1829   :  { %v3456_v44 = vpop.permute.xlu1 %3455 }
0x182a   :  { %v3453_v51 = vpop.permute.xlu0 %3452  ;;  %v3484_v52 = vrot.slane %v3456_v44, %v8006_v47 }
0x182b   :  { %v3480_v23 = vrot.slane %v3453_v51, %v8006_v47  ;;  %v3559_v51 = vsub.s32 7, %v7008_v5 }
0x182d   :  { %v3510_v22 = vsel %vm3509_vm5, %v3484_v52, %v3480_v23 }
0x1835   :  { %v3462_v4 = vpop.permute.xlu0 %3461 }
0x1836   :  { %v3459_v17 = vpop.permute.xlu1 %3458  ;;  %v3492_v28 = vrot.slane %v3462_v4, %v8006_v47 }
0x1837   :  { %v3488_v0 = vrot.slane %v3459_v17, %v8006_v47 }
0x1839   :  { %v3512_v1 = vsel %vm3511_vm6, %v3488_v0, %v3510_v22  ;;  %v3468_v18 = vpop.permute.xlu0 %3467 }
0x183a   :  { %v3465_v26 = vpop.permute.xlu1 %3464  ;;  %v3514_v42 = vsel %vm3513_vm7, %v3492_v28, %v3512_v1  ;;  %v3500_v39 = vrot.slane %v3468_v18, %v8006_v47 }
0x183b   :  { %v3496_v41 = vrot.slane %v3465_v26, %v8006_v47 }
0x183d   :  { %v3516_v11 = vsel %vm3515_vm8, %v3496_v41, %v3514_v42 }
0x183e   :  { %v3518_v37 = vsel %vm3517_vm9, %v3500_v39, %v3516_v11 }
0x1841   :  { %v3474_v31 = vpop.permute.xlu0 %3473 }
0x1842   :  { %v3471_v40 = vpop.permute.xlu1 %3470  ;;  %v3508_v61 = vrot.slane %v3474_v31, %v8006_v47 }
0x1843   :  { %v3504_v34 = vrot.slane %v3471_v40, %v8006_v47 }
0x1845   :  { %v3520_v57 = vsel %vm3519_vm10, %v3504_v34, %v3518_v37 }
0x1846   :  { %v3522_v58 = vsel %vm3521_vm11, %v3508_v61, %v3520_v57 }
0x1847   :  { %v3525_v30 = vsel %vm3524_vm12, %v3522_v58, -inf  ;;  %v4274_v58 = vld [vmem:[%s8450_s10] sm:$0xff] }
0x1848   :  { %3526 = vmax.xlane.f32.xlu1 %v3525_v30  ;;  %v4275_v30 = vld [vmem:[%s8450_s10 + $0x8] sm:$0xff] }
0x18d5   :  { %v3527_v27 = vpop.xlane.xlu1 %3526 }
0x18d6   :  { %v3532_v2 = vrot.slane %v3527_v27, %v7016_v16  ;;  %v3536_v36 = vrot.slane %v3527_v27, %v3535_v25  ;;  %v3540_v21 = vrot.slane %v3527_v27, %v3539_v50  ;;  %v3544_v9 = vrot.slane %v3527_v27, %v3543_v63 }
0x18d7   :  { %v3548_v62 = vrot.slane %v3527_v27, %v3547_v46 }
0x18d8   :  { %v3569_v20 = vsub.f32 %v3404_v33, %v3532_v2  ;;  %v3570_v35 = vsub.f32 %v7983_v59, %v3536_v36  ;;  %v3571_v48 = vsub.f32 %v7989_v45, %v3540_v21  ;;  %v3572_v29 = vsub.f32 %v7986_v56, %v3544_v9 }
0x18d9   :  { %v3552_v33 = vrot.slane %v3527_v27, %v3551_v38  ;;  %v3573_v59 = vsub.f32 %v7995_v19, %v3548_v62  ;;  %v3556_v45 = vrot.slane %v3527_v27, %v3555_v53  ;;  %v3560_v56 = vrot.slane %v3527_v27, %v3559_v51  ;;  %v4270_v38 = vld [vmem:[%s8448_s8 + $0x8] sm:$0xff] }
0x18da   :  { %v3577_v24 = vmul.f32 1.442695, %v3569_v20  ;;  %v3579_v13 = vmul.f32 1.442695, %v3570_v35  ;;  %v3581_v55 = vmul.f32 1.442695, %v3571_v48  ;;  %v8089_v36 = vpack.c.bf16 %v4275_v30, %v4274_v58 }
0x18db   :  { %v3583_v8 = vmul.f32 1.442695, %v3572_v29  ;;  %v3574_v17 = vsub.f32 %v7992_v54, %v3552_v33  ;;  %v3585_v4 = vmul.f32 1.442695, %v3573_v59  ;;  %v3575_v23 = vsub.f32 %v8001_v60, %v3556_v45  ;;  %v4276_v20 = vld [vmem:[%s8450_s10 + $0x10] sm:$0xff]  ;;  %v4277_v35 = vld [vmem:[%s8450_s10 + $0x18] sm:$0xff] }
0x18dc   :  { %6517 = vpow2.f32 %v3577_v24  ;;  %v3576_v19 = vsub.f32 %v7998_v32, %v3560_v56  ;;  %v8106_v48 = vpack.c.bf16 %v4277_v35, %v4276_v20  ;;  %v4271_v29 = vld [vmem:[%s8448_s8 + $0x10] sm:$0xff]  ;;  %v5836_v33 = vld [vmem:[%s8451_s11] ss:$0 sm:$0xff] }
0x18dd   :  { %6519 = vpow2.f32 %v3579_v13  ;;  %v3587_v0 = vmul.f32 1.442695, %v3574_v17  ;;  %v3589_v22 = vmul.f32 1.442695, %v3575_v23  ;;  %v4269_v13 = vld [vmem:[%s8448_s8] sm:$0xff]  ;;  %4499 = vrot.lane.b32.xlu1 %v5836_v33, %s6618_s0 }
0x18de   :  { %6521 = vpow2.f32 %v3581_v55  ;;  %v3591_v18 = vmul.f32 1.442695, %v3576_v19  ;;  %v6340_v62 = vpack.c.bf16 %v4270_v38, %v4269_v13  ;;  %v4272_v55 = vld [vmem:[%s8448_s8 + $0x18] sm:$0xff] }
0x18df   :  { %6523 = vpow2.f32 %v3583_v8  ;;  %v6343_v53 = vpack.c.bf16 %v4272_v55, %v4271_v29 }
0x18e0   :  { %6525 = vpow2.f32 %v3585_v4 }
0x18e1   :  { %6527 = vpow2.f32 %v3587_v0  ;;  %4521 = vrot.lane.b32.xlu1 %v5836_v33, %s6619_s1 }
0x18e2   :  { %6529 = vpow2.f32 %v3589_v22 }
0x18e3   :  { %6531 = vpow2.f32 %v3591_v18 }
0x18e6   :  { %v6518_v44 = vpop.eup %6517 }
0x18e7   :  { %3602 = vperm.xlu0 %6403, %v6518_v44   ;;  %v6520_v52 = vpop.eup %6519 }
0x18e8   :  { %v6522_v26 = vpop.eup %6521 }
0x18e9   :  { %v6524_v1 = vpop.eup %6523 }
0x18ea   :  { %v6526_v54 = vpop.eup %6525 }
0x18eb   :  { %3605 = vperm.xlu0 %6403, %v6520_v52   ;;  %v6528_v41 = vpop.eup %6527 }
0x18ec   :  { %v6530_v28 = vpop.eup %6529 }
0x18ed   :  { %v6532_v60 = vpop.eup %6531 }
0x18ef   :  { %3608 = vperm.xlu0 %6403, %v6522_v26  }
0x18f3   :  { %3611 = vperm.xlu0 %6403, %v6524_v1  }
0x18f7   :  { %3614 = vperm.xlu0 %6403, %v6526_v54  }
0x18fb   :  { %3617 = vperm.xlu0 %6403, %v6528_v41  }
0x18ff   :  { %3620 = vperm.xlu0 %6403, %v6530_v28  }
0x1903   :  { %3623 = vperm.xlu0 %6403, %v6532_v60  }
0x194f   :  { %v8144_v35 = vpop.permute.xlu1 %4499 }
0x1953   :  { %v8149_v29 = vpop.permute.xlu1 %4521 }
0x1966   :  { %v3603_v42 = vpop.permute.xlu0 %3602 }
0x1967   :  { %v3628_v11 = vrot.slane %v3603_v42, %v8006_v47 }
0x1969   :  { %6136 = vmatmul.mubr.msk.f32.vlgmr.msra.gmra.mrb[22].mxu0 %vm3524_vm12, %v3628_v11 }
0x196a   :  { %6139 = vmatpush3.msra.mxu0 %v7919_v12  ;;  %v3606_v32 = vpop.permute.xlu0 %3605  ;;  %6140 = vmatprep.mubr.msk.f32.mxu0 %vm6616_vm1, %v6617_v10 }
0x196b   :  { %v3632_v31 = vrot.slane %v3606_v32, %v8006_v47  ;;  %6148 = vmatprep.subr.mxu0 %v6617_v10 }
0x196d   :  { %6141 = vmatmul.mubr.msk.f32.vlgmr.msra.gmra.mrb[24].mxu0 %vm3524_vm12, %v3632_v31  ;;  %v3657_v57 = vsel %vm3509_vm5, %v3632_v31, %v3628_v11 }
0x196e   :  { %6149 = vmatpush3.msra.mxu0 %v7931_v49  ;;  %v3609_v39 = vpop.permute.xlu0 %3608  ;;  %6150 = vmatprep.mubr.msk.f32.mxu0 %vm6616_vm1, %v6617_v10 }
0x196f   :  { %v3636_v40 = vrot.slane %v3609_v39, %v8006_v47  ;;  %6158 = vmatprep.subr.mxu0 %v6617_v10 }
0x1971   :  { %6146 = vmatmul.mubr.msk.f32.vlgmr.msra.gmra.mrb[18].mxu1 %vm3524_vm12, %v3636_v40 }
0x1972   :  { %6154 = vmatpush3.msra.mxu1 %v7937_v15  ;;  %v3612_v12 = vpop.permute.xlu0 %3611  ;;  %6155 = vmatprep.mubr.msk.f32.mxu1 %vm6616_vm1, %v6617_v10 }
0x1973   :  { %v3640_v34 = vrot.slane %v3612_v12, %v8006_v47  ;;  %6163 = vmatprep.subr.mxu1 %v6617_v10 }
0x1975   :  { %6151 = vmatmul.mubr.msk.f32.vlgmr.msra.gmra.mrb[26].mxu0 %vm3524_vm12, %v3640_v34 }
0x1976   :  { %6159 = vmatpush3.msra.mxu0 %v7941_v14  ;;  %v3615_v49 = vpop.permute.xlu0 %3614  ;;  %6160 = vmatprep.mubr.msk.f32.mxu0 %vm6616_vm1, %v6617_v10 }
0x1977   :  { %v3644_v61 = vrot.slane %v3615_v49, %v8006_v47  ;;  %6168 = vmatprep.subr.mxu0 %v6617_v10 }
0x1979   :  { %6156 = vmatmul.mubr.msk.f32.vlgmr.msra.gmra.mrb[20].mxu1 %vm3524_vm12, %v3644_v61 }
0x197a   :  { %6164 = vmatpush3.msra.mxu1 %v7946_v7  ;;  %v3618_v15 = vpop.permute.xlu0 %3617  ;;  %6165 = vmatprep.mubr.msk.f32.mxu1 %vm6616_vm1, %v6617_v10 }
0x197b   :  { %v3648_v37 = vrot.slane %v3618_v15, %v8006_v47  ;;  %6339 = vmatprep.subr.bf16.mxu1 %v6615_v3 }
0x197d   :  { %6161 = vmatmul.mubr.msk.f32.vlgmr.msra.gmra.mrb[28].mxu0 %vm3524_vm12, %v3648_v37 }
0x197e   :  { %6169 = vmatpush3.msra.mxu0 %v7950_v43  ;;  %v3621_v14 = vpop.permute.xlu0 %3620  ;;  %6170 = vmatprep.mubr.msk.f32.mxu0 %vm6616_vm1, %v6617_v10  ;;  %v3658_v43 = vsel %vm3511_vm6, %v3636_v40, %v3657_v57 }
0x197f   :  { %v3652_v7 = vrot.slane %v3621_v14, %v8006_v47  ;;  %6345 = vmatprep.subr.bf16.mxu0 %v6615_v3  ;;  %v3659_v50 = vsel %vm3513_vm7, %v3640_v34, %v3658_v43 }
0x1980   :  { %v3660_v27 = vsel %vm3515_vm8, %v3644_v61, %v3659_v50 }
0x1981   :  { %6166 = vmatmul.mubr.msk.f32.vlgmr.msra.gmra.mrb[22].mxu1 %vm3524_vm12, %v3652_v7  ;;  %v3661_v63 = vsel %vm3517_vm9, %v3648_v37, %v3660_v27 }
0x1982   :  { %v3624_v2 = vpop.permute.xlu0 %3623  ;;  %6181 = vmatprep.mubr.msk.f32.mxu1 %vm6616_vm1, %v6617_v10  ;;  %v3662_v24 = vsel %vm3519_vm10, %v3652_v7, %v3661_v63  ;;  %6341 = vmatpush3.bf16.msra.mxu1 %v6340_v62  ;;  %v6627_v63 = vmov 1983009808  }
0x1983   :  { %v3656_v21 = vrot.slane %v3624_v2, %v8006_v47  ;;  %6342 = vmatprep.subr.bf16.mxu1 %v6615_v3 }
0x1985   :  { %6171 = vmatmul.mubr.msk.f32.vlgmr.msra.gmra.mrb[30].mxu0 %vm3524_vm12, %v3656_v21  ;;  %v3663_v46 = vsel %vm3521_vm11, %v3656_v21, %v3662_v24  ;;  %v4391_v21 = vunpack.c.l.s4 %v6627_v63 }
0x1986   :  { %v3665_v9 = vsel %vm3524_vm12, %v3663_v46, 0.0  ;;  %6347 = vmatpush3.bf16.msra.mxu0 %v8089_v36  ;;  %6192 = vmatprep.mubr.msk.f32.mxu0 %vm6616_vm1, %v6617_v10 }
0x1987   :  { %3666 = vadd.xlane.f32.xlu0 %v3665_v9  ;;  %6348 = vmatprep.subr.bf16.mxu0 %v6615_v3  ;;  %v4392_v38 = vunpack.c.0.s8 %v4391_v21 }
0x1988   :  { %6344 = vmatpush3.bf16.msra.mxu1 %v6343_v53 }
0x1989   :  { %6351 = vmatprep.subr.bf16.mxu1 %v6615_v3  ;;  %v8152_v55 = vsub.s32 %v4392_v38, %v7008_v5 }
0x198a   :  { %6350 = vmatpush3.bf16.msra.mxu0 %v8106_v48 }
0x198b   :  { %6357 = vmatprep.subr.bf16.mxu0 %v6615_v3 }
0x198d   :  { %6193 = vmatmul.mubr.f32.vlgmr.msra.gmra.mrb[32].mxu0 %v6617_v10 }
0x198e   :  { %6359 = vmatpush3.bf16.msra.mxu0 %v8089_v36  ;;  %6214 = vmatprep.mubr.msk.f32.mxu0 %vm6616_vm1, %v6617_v10 }
0x198f   :  { %6360 = vmatprep.subr.bf16.mxu0 %v6615_v3 }
0x1992   :  { %6362 = vmatpush3.bf16.msra.mxu0 %v8106_v48 }
0x1993   :  { %6369 = vmatprep.subr.bf16.mxu0 %v6615_v3 }
0x1a14   :  { %v3667_v59 = vpop.xlane.xlu0 %3666 }
0x1a15   :  { %6533 = vrcp.f32 %v3667_v59 }
0x1a1f   :  { %v6534_v8 = vpop.eup %6533 }
0x1a20   :  { %v4246_v45 = vrot.slane %v6534_v8, 1  ;;  %v4247_v0 = vrot.slane %v6534_v8, 2  ;;  %v4248_v54 = vrot.slane %v6534_v8, 3  ;;  %v4249_v32 = vrot.slane %v6534_v8, 4 }
0x1a21   :  { %v4250_v49 = vrot.slane %v6534_v8, 5  ;;  %v4251_v7 = vrot.slane %v6534_v8, 6  ;;  %v4252_v2 = vrot.slane %v6534_v8, 7 }
0x1a3c   :  { %v3737_v44 = vpop.f32.mrb[22].mxu0 }
0x1a3d   :  { %v6137_v51 = vpop.f32.mrb[23].mxu0  ;;  %v4261_v56 = vmul.f32 %v6534_v8, %v3737_v44 }
0x1a40   :  { %v3809_v17 = vpop.f32.mrb[24].mxu0 }
0x1a41   :  { %v4262_v4 = vmul.f32 %v4246_v45, %v3809_v17  ;;  %v6142_v52 = vpop.f32.mrb[25].mxu0  ;;  %v5832_v45 = vld [vmem:[%s8449_s9] ss:$0 sm:$0xff] }
0x1a43   :  { %v4302_v23 = vrot.slane %v4262_v4, 7 }
0x1a44   :  { %v3881_v26 = vpop.f32.mrb[18].mxu1 }
0x1a45   :  { %v4303_v19 = vsel %vm3509_vm5, %v4302_v23, %v4261_v56  ;;  %v4263_v22 = vmul.f32 %v4247_v0, %v3881_v26  ;;  %v6147_v1 = vpop.f32.mrb[19].mxu1 }
0x1a47   :  { %v4304_v18 = vrot.slane %v4263_v22, 6 }
0x1a48   :  { %v3953_v41 = vpop.f32.mrb[26].mxu0 }
0x1a49   :  { %v4305_v28 = vsel %vm3511_vm6, %v4304_v18, %v4303_v19  ;;  %v4264_v60 = vmul.f32 %v4248_v54, %v3953_v41  ;;  %v6152_v42 = vpop.f32.mrb[27].mxu0 }
0x1a4b   :  { %v4306_v11 = vrot.slane %v4264_v60, 5 }
0x1a4c   :  { %v4025_v31 = vpop.f32.mrb[20].mxu1 }
0x1a4d   :  { %v4307_v39 = vsel %vm3513_vm7, %v4306_v11, %v4305_v28  ;;  %v4265_v40 = vmul.f32 %v4249_v32, %v4025_v31  ;;  %v6157_v12 = vpop.f32.mrb[21].mxu1 }
0x1a4f   :  { %v4308_v34 = vrot.slane %v4265_v40, 4 }
0x1a50   :  { %v4097_v61 = vpop.f32.mrb[28].mxu0 }
0x1a51   :  { %v4309_v15 = vsel %vm3515_vm8, %v4308_v34, %v4307_v39  ;;  %v4266_v37 = vmul.f32 %v4250_v49, %v4097_v61  ;;  %v6162_v14 = vpop.f32.mrb[29].mxu0 }
0x1a53   :  { %v4310_v57 = vrot.slane %v4266_v37, 3 }
0x1a54   :  { %v4169_v58 = vpop.f32.mrb[22].mxu1 }
0x1a55   :  { %v4311_v30 = vsel %vm3517_vm9, %v4310_v57, %v4309_v15  ;;  %v4267_v43 = vmul.f32 %v4251_v7, %v4169_v58  ;;  %v6167_v50 = vpop.f32.mrb[23].mxu1 }
0x1a57   :  { %v4312_v27 = vrot.slane %v4267_v43, 2 }
0x1a58   :  { %v4241_v20 = vpop.f32.mrb[30].mxu0 }
0x1a59   :  { %v4313_v24 = vsel %vm3519_vm10, %v4312_v27, %v4311_v30  ;;  %v4268_v46 = vmul.f32 %v4252_v2, %v4241_v20  ;;  %v6172_v9 = vpop.f32.mrb[31].mxu0 }
0x1a5b   :  { %v4314_v13 = vrot.slane %v4268_v46, 1 }
0x1a5d   :  { %v4315_v62 = vsel %vm3521_vm11, %v4314_v13, %v4313_v24 }
0x1a5e   :  { %6182 = vmatmul.mubr.msk.f32.vlgmr.msra.gmra.mrb[24].mxu1 %vm218_vm2, %v4315_v62 }
0x1a5f   :  { %6353 = vmatpush3.bf16.msra.mxu1 %v8089_v36  ;;  %6203 = vmatprep.mubr.msk.f32.mxu1 %vm6616_vm1, %v6617_v10 }
0x1a60   :  { %v4476_v53 = vpop.f32.mrb[32].mxu0  ;;  %6354 = vmatprep.subr.bf16.mxu1 %v6615_v3 }
0x1a61   :  { %v4502_v33 = vadd.f32 %v8144_v35, %v4476_v53  ;;  %v6194_v59 = vpop.f32.mrb[33].mxu0  ;;  %v4524_v8 = vadd.f32 %v8149_v29, %v4476_v53 }
0x1a63   :  { %v4510_v44 = vrot.slane %v4502_v33, %v8152_v55  ;;  %6356 = vmatpush3.bf16.msra.mxu1 %v8106_v48  ;;  %v4532_v51 = vrot.slane %v4524_v8, %v8152_v55 }
0x1a64   :  { %6363 = vmatprep.subr.bf16.mxu1 %v6615_v3 }
0x1a65   :  { %4511 = vrot.lane.b32.xlu1 %v4510_v44, %s6620_s20 }
0x1a69   :  { %4533 = vrot.lane.b32.xlu1 %v4532_v51, %s6620_s20 }
0x1ad7   :  { %v4512_v42 = vpop.permute.xlu1 %4511 }
0x1adb   :  { %v4534_v39 = vpop.permute.xlu1 %4533 }
0x1b31   :  { %v4384_v17 = vpop.f32.mrb[24].mxu1 }
0x1b32   :  { %v4385_v4 = vadd.f32 %v5832_v45, %v4384_v17  ;;  %v6183_v52 = vpop.f32.mrb[25].mxu1 }
0x1b34   :  { %v4389_v56 = vcombine.high %v4385_v4, %v4385_v4  ;;  %v8170_v23 = vrot.slane %v4385_v4, %v8152_v55 }
0x1b36   :  { %v8173_v0 = vrot.slane %v4389_v56, %v8152_v55  ;;  %v4480_v26 = vadd.f32 %v4476_v53, %v8170_v23 }
0x1b38   :  { %v8178_v19 = vcombine.high %v8173_v0, %v8173_v0  ;;  %v5834_v22 = vmul.f32 -1.442695, %v4480_v26 }
0x1b3a   :  { %6535 = vpow2.f32 %v5834_v22  ;;  %v4487_v1 = vadd.f32 %v4476_v53, %v8178_v19 }
0x1b3c   :  { %v5835_v18 = vmul.f32 -1.442695, %v4487_v1 }
0x1b3e   :  { %6537 = vpow2.f32 %v5835_v18 }
0x1b44   :  { %v6536_v54 = vpop.eup %6535 }
0x1b45   :  { %v4484_v41 = vadd.f32 1.0, %v6536_v54 }
0x1b47   :  { %6539 = vrcp.f32 %v4484_v41 }
0x1b48   :  { %v6538_v28 = vpop.eup %6537 }
0x1b49   :  { %v4491_v60 = vadd.f32 1.0, %v6538_v28 }
0x1b4b   :  { %6541 = vrcp.f32 %v4491_v60 }
0x1b51   :  { %v6540_v11 = vpop.eup %6539 }
0x1b52   :  { %v4514_v32 = vmul.f32 %v6540_v11, %v4512_v42  ;;  %v4543_v14 = vsub.f32 1.0, %v6540_v11  ;;  %v4549_v7 = vmul.f32 0.0, %v6540_v11 }
0x1b54   :  { %4516 = vrot.lane.b32.xlu1 %v4514_v32, %s6618_s0 }
0x1b55   :  { %v6542_v31 = vpop.eup %6541 }
0x1b56   :  { %v4536_v40 = vmul.f32 %v6542_v31, %v4534_v39  ;;  %v4551_v43 = vsub.f32 1.0, %v6542_v31  ;;  %v4557_v2 = vmul.f32 0.0, %v6542_v31 }
0x1b58   :  { %4538 = vrot.lane.b32.xlu0 %v4536_v40, %s6618_s0 }
0x1bc6   :  { %v4517_v12 = vpop.permute.xlu1 %4516 }
0x1bc7   :  { %v4519_v34 = vadd.f32 %v4517_v12, %v8170_v23 }
0x1bc9   :  { %6543 = vtanh.f32 %v4519_v34 }
0x1bca   :  { %v4539_v49 = vpop.permute.xlu0 %4538 }
0x1bcb   :  { %v4541_v61 = vadd.f32 %v4539_v49, %v8178_v19 }
0x1bcd   :  { %6545 = vtanh.f32 %v4541_v61 }
0x1bd3   :  { %v6544_v15 = vpop.eup %6543 }
0x1bd4   :  { %4545 = vrot.lane.b32.xlu1 %v6544_v15, %s6621_s2 }
0x1bd7   :  { %v6546_v37 = vpop.eup %6545 }
0x1bd8   :  { %4553 = vrot.lane.b32.xlu1 %v6546_v37, %s6621_s2 }
0x1c46   :  { %v4546_v57 = vpop.permute.xlu1 %4545 }
0x1c47   :  { %v4548_v58 = vmul.f32 %v4546_v57, %v4543_v14 }
0x1c49   :  { %v8187_v30 = vadd.f32 %v4549_v7, %v4548_v58 }
0x1c4a   :  { %v4554_v50 = vpop.permute.xlu1 %4553 }
0x1c4b   :  { %v4615_v27 = vrot.slane %v8187_v30, %v8152_v55  ;;  %v4556_v63 = vmul.f32 %v4554_v50, %v4551_v43 }
0x1c4d   :  { %v8191_v21 = vadd.f32 %v4557_v2, %v4556_v63  ;;  %4616 = vrot.lane.b32.xlu1 %v4615_v27, %s6621_s2 }
0x1c4f   :  { %v4625_v20 = vrot.slane %v8191_v21, %v8152_v55 }
0x1c51   :  { %4626 = vrot.lane.b32.xlu1 %v4625_v20, %s6622_s3 }
0x1cbf   :  { %v4617_v24 = vpop.permute.xlu1 %4616 }
0x1cc3   :  { %v4627_v46 = vpop.permute.xlu1 %4626 }
0x1cc4   :  { %v4629_v9 = vsel %vm88_vm0, %v4617_v24, %v4627_v46 }
0x1cc5   :  { %6204 = vmatmul.mubr.msk.f32.vlgmr.msra.gmra.mrb[26].mxu1 %vm218_vm2, %v4629_v9  ;;  %v4767_v41 = vrot.slane %v4629_v9, %v8152_v55 }
0x1cc6   :  { %6365 = vmatpush3.bf16.msra.mxu1 %v8089_v36  ;;  %6225 = vmatprep.mubr.msk.f32.mxu1 %vm6616_vm1, %v6617_v10  ;;  %v8213_v36 = vcombine.high %v8170_v23, %v8170_v23 }
0x1cc7   :  { %6366 = vmatprep.subr.bf16.mxu1 %v6615_v3 }
0x1cca   :  { %6368 = vmatpush3.bf16.msra.mxu1 %v8106_v48 }
0x1ccb   :  { %6375 = vmatprep.subr.bf16.mxu1 %v6615_v3 }
0x1d98   :  { %v4699_v13 = vpop.f32.mrb[26].mxu1 }
0x1d99   :  { %v4717_v38 = vadd.f32 %v4699_v13, %v8144_v35  ;;  %v4736_v62 = vadd.f32 %v4699_v13, %v8149_v29  ;;  %v6205_v53 = vpop.f32.mrb[27].mxu1  ;;  %v4703_v48 = vadd.f32 %v4699_v13, %v8213_v36  ;;  %v4710_v8 = vadd.f32 %v4699_v13, %v8173_v0 }
0x1d9b   :  { %v4744_v33 = vrot.slane %v4736_v62, %v8152_v55  ;;  %v4725_v59 = vrot.slane %v4717_v38, %v8152_v55  ;;  %v5838_v44 = vmul.f32 -1.442695, %v4703_v48  ;;  %v5839_v51 = vmul.f32 -1.442695, %v4710_v8 }
0x1d9d   :  { %4745 = vrot.lane.b32.xlu0 %v4744_v33, %s6620_s20  ;;  %4726 = vrot.lane.b32.xlu1 %v4725_v59, %s6620_s20  ;;  %6547 = vpow2.f32 %v5838_v44 }
0x1d9e   :  { %6549 = vpow2.f32 %v5839_v51 }
0x1da7   :  { %v6548_v45 = vpop.eup %6547 }
0x1da8   :  { %v6550_v17 = vpop.eup %6549  ;;  %v4707_v4 = vadd.f32 1.0, %v6548_v45 }
0x1da9   :  { %v4714_v52 = vadd.f32 1.0, %v6550_v17 }
0x1daa   :  { %6551 = vrcp.f32 %v4707_v4 }
0x1dab   :  { %6553 = vrcp.f32 %v4714_v52 }
0x1db4   :  { %v6552_v56 = vpop.eup %6551 }
0x1db5   :  { %v6554_v26 = vpop.eup %6553  ;;  %v4755_v40 = vsub.f32 1.0, %v6552_v56 }
0x1db6   :  { %v4773_v37 = vsub.f32 1.0, %v6554_v26 }
0x1e0f   :  { %v4746_v22 = vpop.permute.xlu0 %4745  ;;  %v4727_v1 = vpop.permute.xlu1 %4726 }
0x1e10   :  { %v4748_v18 = vmul.f32 %v6554_v26, %v4746_v22  ;;  %v4729_v54 = vmul.f32 %v6552_v56, %v4727_v1 }
0x1e12   :  { %4750 = vrot.lane.b32.xlu0 %v4748_v18, %s6618_s0  ;;  %4731 = vrot.lane.b32.xlu1 %v4729_v54, %s6618_s0 }
0x1e16   :  { %4768 = vrot.lane.b32.xlu0 %v4767_v41, %s6623_s29 }
0x1e1a   :  { %4779 = vrot.lane.b32.xlu0 %v4767_v41, %s6624_s30 }
0x1e84   :  { %v4732_v28 = vpop.permute.xlu1 %4731  ;;  %v4751_v60 = vpop.permute.xlu0 %4750 }
0x1e85   :  { %v4734_v42 = vadd.f32 %v4732_v28, %v8213_v36  ;;  %v4753_v11 = vadd.f32 %v4751_v60, %v8173_v0 }
0x1e87   :  { %6555 = vtanh.f32 %v4734_v42 }
0x1e88   :  { %6557 = vtanh.f32 %v4753_v11  ;;  %v4769_v39 = vpop.permute.xlu0 %4768 }
0x1e89   :  { %v4771_v34 = vmul.f32 %v6552_v56, %v4769_v39 }
0x1e8c   :  { %v4780_v61 = vpop.permute.xlu0 %4779 }
0x1e8d   :  { %v4782_v57 = vmul.f32 %v6554_v26, %v4780_v61 }
0x1e91   :  { %v6556_v32 = vpop.eup %6555 }
0x1e92   :  { %4757 = vrot.lane.b32.xlu1 %v6556_v32, %s6621_s2  ;;  %v6558_v31 = vpop.eup %6557 }
0x1e96   :  { %4775 = vrot.lane.b32.xlu1 %v6558_v31, %s6621_s2 }
0x1f04   :  { %v4758_v12 = vpop.permute.xlu1 %4757 }
0x1f05   :  { %v4760_v49 = vmul.f32 %v4758_v12, %v4755_v40 }
0x1f07   :  { %v8226_v15 = vadd.f32 %v4771_v34, %v4760_v49 }
0x1f08   :  { %v4776_v14 = vpop.permute.xlu1 %4775 }
0x1f09   :  { %v4840_v7 = vrot.slane %v8226_v15, %v8152_v55  ;;  %v4778_v58 = vmul.f32 %v4776_v14, %v4773_v37 }
0x1f0b   :  { %v8230_v43 = vadd.f32 %v4782_v57, %v4778_v58  ;;  %4841 = vrot.lane.b32.xlu1 %v4840_v7, %s6621_s2 }
0x1f0d   :  { %v4850_v50 = vrot.slane %v8230_v43, %v8152_v55 }
0x1f0f   :  { %4851 = vrot.lane.b32.xlu0 %v4850_v50, %s6622_s3 }
0x1f7d   :  { %v4842_v27 = vpop.permute.xlu1 %4841 }
0x1f81   :  { %v4852_v2 = vpop.permute.xlu0 %4851 }
0x1f82   :  { %v4854_v63 = vsel %vm88_vm0, %v4842_v27, %v4852_v2 }
0x1f83   :  { %6215 = vmatmul.mubr.msk.f32.vlgmr.msra.gmra.mrb[34].mxu0 %vm218_vm2, %v4854_v63  ;;  %v4992_v22 = vrot.slane %v4854_v63, %v8152_v55 }
0x1f84   :  { %6236 = vmatprep.mubr.msk.f32.mxu0 %vm6616_vm1, %v6617_v10 }
0x2056   :  { %v4924_v20 = vpop.f32.mrb[34].mxu0 }
0x2057   :  { %v4942_v24 = vadd.f32 %v4924_v20, %v8144_v35  ;;  %v4961_v46 = vadd.f32 %v4924_v20, %v8149_v29  ;;  %v6216_v9 = vpop.f32.mrb[35].mxu0  ;;  %v4928_v62 = vadd.f32 %v4924_v20, %v8173_v0  ;;  %v4935_v53 = vadd.f32 %v4924_v20, %v8213_v36 }
0x2059   :  { %v4969_v13 = vrot.slane %v4961_v46, %v8152_v55  ;;  %v4950_v38 = vrot.slane %v4942_v24, %v8152_v55  ;;  %v5841_v33 = vmul.f32 -1.442695, %v4928_v62  ;;  %v5842_v59 = vmul.f32 -1.442695, %v4935_v53 }
0x205b   :  { %4970 = vrot.lane.b32.xlu0 %v4969_v13, %s6620_s20  ;;  %4951 = vrot.lane.b32.xlu1 %v4950_v38, %s6620_s20  ;;  %6559 = vpow2.f32 %v5841_v33 }
0x205c   :  { %6561 = vpow2.f32 %v5842_v59 }
0x2065   :  { %v6560_v48 = vpop.eup %6559 }
0x2066   :  { %v6562_v8 = vpop.eup %6561  ;;  %v4932_v44 = vadd.f32 1.0, %v6560_v48 }
0x2067   :  { %v4939_v51 = vadd.f32 1.0, %v6562_v8 }
0x2068   :  { %6563 = vrcp.f32 %v4932_v44 }
0x2069   :  { %6565 = vrcp.f32 %v4939_v51 }
0x2072   :  { %v6564_v45 = vpop.eup %6563 }
0x2073   :  { %v6566_v17 = vpop.eup %6565  ;;  %v4980_v11 = vsub.f32 1.0, %v6564_v45 }
0x2074   :  { %v4998_v34 = vsub.f32 1.0, %v6566_v17 }
0x20cd   :  { %v4971_v4 = vpop.permute.xlu0 %4970  ;;  %v4952_v52 = vpop.permute.xlu1 %4951 }
0x20ce   :  { %v4973_v56 = vmul.f32 %v6566_v17, %v4971_v4  ;;  %v4954_v26 = vmul.f32 %v6564_v45, %v4952_v52  ;;  %v4591_v52 = vrot.slane %v8191_v21, %v7011_v6 }
0x20d0   :  { %4975 = vrot.lane.b32.xlu0 %v4973_v56, %s6618_s0  ;;  %4956 = vrot.lane.b32.xlu1 %v4954_v26, %s6618_s0  ;;  %v4592_v56 = vcombine.high %v4591_v52, %v4591_v52  ;;  %v4791_v26 = vrot.slane %v8226_v15, %v7011_v6 }
0x20d4   :  { %4993 = vrot.lane.b32.xlu0 %v4992_v22, %s6623_s29 }
0x20d8   :  { %5004 = vrot.lane.b32.xlu0 %v4992_v22, %s6624_s30 }
0x2142   :  { %v4957_v1 = vpop.permute.xlu1 %4956  ;;  %v4976_v18 = vpop.permute.xlu0 %4975 }
0x2143   :  { %v4959_v54 = vadd.f32 %v4957_v1, %v8173_v0  ;;  %v4978_v41 = vadd.f32 %v4976_v18, %v8213_v36  ;;  %v4792_v1 = vcombine.high %v4791_v26, %v4791_v26 }
0x2145   :  { %6567 = vtanh.f32 %v4959_v54  ;;  %v4800_v54 = vrot.slane %v4792_v1, %v7016_v16 }
0x2146   :  { %6569 = vtanh.f32 %v4978_v41  ;;  %v4994_v42 = vpop.permute.xlu0 %4993 }
0x2147   :  { %v4996_v31 = vmul.f32 %v6564_v45, %v4994_v42  ;;  %v4566_v45 = vrot.slane %v8187_v30, %v7011_v6  ;;  %v4600_v30 = vrot.slane %v4592_v56, %v7016_v16 }
0x2149   :  { %v4567_v4 = vcombine.high %v4566_v45, %v4566_v45 }
0x214a   :  { %v5005_v40 = vpop.permute.xlu0 %5004 }
0x214b   :  { %v5007_v0 = vmul.f32 %v6566_v17, %v5005_v40  ;;  %v4575_v22 = vrot.slane %v4567_v4, %v7016_v16 }
0x214f   :  { %v6568_v28 = vpop.eup %6567 }
0x2150   :  { %4982 = vrot.lane.b32.xlu1 %v6568_v28, %s6621_s2  ;;  %v6570_v60 = vpop.eup %6569 }
0x2154   :  { %5000 = vrot.lane.b32.xlu1 %v6570_v60, %s6621_s2 }
0x21c2   :  { %v4983_v32 = vpop.permute.xlu1 %4982 }
0x21c3   :  { %v4985_v39 = vmul.f32 %v4983_v32, %v4980_v11 }
0x21c5   :  { %v4997_v12 = vadd.f32 %v4996_v31, %v4985_v39 }
0x21c6   :  { %v5001_v49 = vpop.permute.xlu1 %5000 }
0x21c7   :  { %v5065_v36 = vrot.slane %v4997_v12, %v8152_v55  ;;  %v5003_v61 = vmul.f32 %v5001_v49, %v4998_v34  ;;  %v5016_v21 = vrot.slane %v4997_v12, %v7011_v6 }
0x21c9   :  { %v5008_v37 = vadd.f32 %v5007_v0, %v5003_v61  ;;  %5066 = vrot.lane.b32.xlu1 %v5065_v36, %s6621_s2  ;;  %v5017_v15 = vcombine.high %v5016_v21, %v5016_v21 }
0x21cb   :  { %v5075_v14 = vrot.slane %v5008_v37, %v8152_v55  ;;  %v5041_v41 = vrot.slane %v5008_v37, %v7011_v6  ;;  %v4596_v37 = vrot.slane %v4591_v52, %v7016_v16 }
0x21cd   :  { %5076 = vrot.lane.b32.xlu0 %v5075_v14, %s6622_s3  ;;  %v5042_v60 = vcombine.high %v5041_v41, %v5041_v41 }
0x21cf   :  { %v5050_v42 = vrot.slane %v5042_v60, %v7016_v16 }
0x223b   :  { %v5067_v57 = vpop.permute.xlu1 %5066 }
0x223f   :  { %v5077_v7 = vpop.permute.xlu0 %5076 }
0x2240   :  { %v5079_v58 = vsel %vm88_vm0, %v5067_v57, %v5077_v7  ;;  %v4796_v57 = vrot.slane %v4791_v26, %v7016_v16 }
0x2241   :  { %6226 = vmatmul.mubr.msk.f32.vlgmr.msra.gmra.mrb[28].mxu1 %vm218_vm2, %v5079_v58  ;;  %v5217_v17 = vrot.slane %v5079_v58, %v8152_v55 }
0x2242   :  { %6247 = vmatprep.mubr.msk.f32.mxu1 %vm6616_vm1, %v6617_v10 }
0x2314   :  { %v5149_v50 = vpop.f32.mrb[28].mxu1 }
0x2315   :  { %v5167_v27 = vadd.f32 %v5149_v50, %v8144_v35  ;;  %v5186_v2 = vadd.f32 %v5149_v50, %v8149_v29  ;;  %v6227_v63 = vpop.f32.mrb[29].mxu1  ;;  %v5153_v46 = vadd.f32 %v5149_v50, %v8178_v19  ;;  %v5160_v9 = vadd.f32 %v5149_v50, %v8170_v23 }
0x2316   :  { %v5021_v50 = vrot.slane %v5016_v21, %v7016_v16 }
0x2317   :  { %v5194_v20 = vrot.slane %v5186_v2, %v8152_v55  ;;  %v5175_v24 = vrot.slane %v5167_v27, %v8152_v55  ;;  %v5844_v13 = vmul.f32 -1.442695, %v5153_v46  ;;  %v5845_v38 = vmul.f32 -1.442695, %v5160_v9  ;;  %v4279_v46 = vld [vmem:[%s8452_s12] sm:$0xff]  ;;  %v4280_v9 = vld [vmem:[%s8452_s12 + $0x8] sm:$0xff] }
0x2318   :  { %v4816_v55 = vrot.slane %v8230_v43, %v7011_v6  ;;  %v5025_v43 = vrot.slane %v5017_v15, %v7016_v16  ;;  %v5046_v27 = vrot.slane %v5041_v41, %v7016_v16 }
0x2319   :  { %5195 = vrot.lane.b32.xlu0 %v5194_v20, %s6620_s20  ;;  %5176 = vrot.lane.b32.xlu1 %v5175_v24, %s6620_s20  ;;  %6571 = vpow2.f32 %v5844_v13  ;;  %v4281_v13 = vld [vmem:[%s8452_s12 + $0x10] sm:$0xff] }
0x231a   :  { %6573 = vpow2.f32 %v5845_v38  ;;  %v4817_v18 = vcombine.high %v4816_v55, %v4816_v55  ;;  %v4821_v58 = vrot.slane %v4816_v55, %v7016_v16 }
0x231c   :  { %v4825_v28 = vrot.slane %v4817_v18, %v7016_v16 }
0x2323   :  { %v6572_v35 = vpop.eup %6571 }
0x2324   :  { %v6574_v62 = vpop.eup %6573  ;;  %v5157_v29 = vadd.f32 1.0, %v6572_v35 }
0x2325   :  { %v5164_v53 = vadd.f32 1.0, %v6574_v62  ;;  %v6370_v62 = vpack.c.bf16 %v4280_v9, %v4279_v46 }
0x2326   :  { %6575 = vrcp.f32 %v5157_v29  ;;  %v4282_v29 = vld [vmem:[%s8452_s12 + $0x18] sm:$0xff] }
0x2327   :  { %6577 = vrcp.f32 %v5164_v53  ;;  %6371 = vmatpush3.bf16.msra.mxu0 %v6370_v62 }
0x2328   :  { %6372 = vmatprep.subr.bf16.mxu0 %v6615_v3 }
0x2330   :  { %v8273_v33 = vpop.eup %6575 }
0x2331   :  { %v8275_v59 = vpop.eup %6577  ;;  %v5205_v2 = vsub.f32 1.0, %v8273_v33 }
0x2332   :  { %v5223_v35 = vsub.f32 1.0, %v8275_v59 }
0x238b   :  { %v5196_v48 = vpop.permute.xlu0 %5195  ;;  %v5177_v8 = vpop.permute.xlu1 %5176 }
0x238c   :  { %v5198_v44 = vmul.f32 %v8275_v59, %v5196_v48  ;;  %v5179_v51 = vmul.f32 %v8273_v33, %v5177_v8 }
0x238e   :  { %5200 = vrot.lane.b32.xlu0 %v5198_v44, %s6618_s0  ;;  %5181 = vrot.lane.b32.xlu1 %v5179_v51, %s6618_s0  ;;  %v6373_v44 = vpack.c.bf16 %v4282_v29, %v4281_v13 }
0x2390   :  { %6374 = vmatpush3.bf16.msra.mxu0 %v6373_v44 }
0x2391   :  { %6250 = vmatprep.subr.mxu0 %v6617_v10 }
0x2392   :  { %5218 = vrot.lane.b32.xlu0 %v5217_v17, %s6623_s29 }
0x2396   :  { %5229 = vrot.lane.b32.xlu0 %v5217_v17, %s6624_s30 }
0x239a   :  { %4578 = vrot.lane.b32.xlu0 %v4575_v22, %s6621_s2 }
0x239e   :  { %4603 = vrot.lane.b32.xlu0 %v4600_v30, %s6622_s3 }
0x23a2   :  { %4803 = vrot.lane.b32.xlu0 %v4800_v54, %s6621_s2 }
0x23a6   :  { %4828 = vrot.lane.b32.xlu0 %v4825_v28, %s6622_s3 }
0x23aa   :  { %5028 = vrot.lane.b32.xlu0 %v5025_v43, %s6621_s2 }
0x23ae   :  { %5053 = vrot.lane.b32.xlu0 %v5050_v42, %s6622_s3  ;;  %v4284_v42 = vld [vmem:[%s8454_s14] sm:$0xff] }
0x2400   :  { %v5201_v11 = vpop.permute.xlu0 %5200  ;;  %v5182_v32 = vpop.permute.xlu1 %5181 }
0x2401   :  { %v5184_v31 = vadd.f32 %v5182_v32, %v8178_v19  ;;  %v5203_v39 = vadd.f32 %v5201_v11, %v8170_v23  ;;  %v4571_v19 = vrot.slane %v4566_v45, %v7016_v16  ;;  %v4285_v11 = vld [vmem:[%s8454_s14 + $0x8] sm:$0xff]  ;;  %v4286_v32 = vld [vmem:[%s8454_s14 + $0x10] sm:$0xff] }
0x2403   :  { %6579 = vtanh.f32 %v5184_v31  ;;  %v6376_v31 = vpack.c.bf16 %v4285_v11, %v4284_v42 }
0x2404   :  { %v5219_v40 = vpop.permute.xlu0 %5218  ;;  %6581 = vtanh.f32 %v5203_v39  ;;  %v4287_v39 = vld [vmem:[%s8454_s14 + $0x18] sm:$0xff] }
0x2405   :  { %v5221_v20 = vmul.f32 %v8273_v33, %v5219_v40  ;;  %6377 = vmatpush3.bf16.msra.mxu1 %v6376_v31  ;;  %v6379_v40 = vpack.c.bf16 %v4287_v39, %v4286_v32 }
0x2406   :  { %6378 = vmatprep.subr.bf16.mxu1 %v6615_v3 }
0x2408   :  { %v5230_v12 = vpop.permute.xlu0 %5229 }
0x2409   :  { %v5232_v33 = vmul.f32 %v8275_v59, %v5230_v12  ;;  %6380 = vmatpush3.bf16.msra.mxu1 %v6379_v40  ;;  %v5846_v12 = vld [vmem:[%s8453_s13] ss:$0 sm:$0xff] }
0x240a   :  { %6381 = vmatprep.subr.bf16.mxu1 %v6615_v3 }
0x240c   :  { %v4579_v34 = vpop.permute.xlu0 %4578 }
0x240d   :  { %4583 = vst.msk [vmem:[#allocation3 + $0x4] sm:$0x1] %vm463_vm3, %v4579_v34  ;;  %v6580_v49 = vpop.eup %6579 }
0x240e   :  { %5207 = vrot.lane.b32.xlu1 %v6580_v49, %s6621_s2  ;;  %v6582_v36 = vpop.eup %6581 }
0x2410   :  { %v4604_v0 = vpop.permute.xlu0 %4603 }
0x2411   :  { %4608 = vst.msk [vmem:[#allocation3 + $0x7] sm:$0x1] %vm578_vm4, %v4604_v0 }
0x2412   :  { %5225 = vrot.lane.b32.xlu1 %v6582_v36, %s6621_s2 }
0x2414   :  { %v4804_v61 = vpop.permute.xlu0 %4803 }
0x2415   :  { %4808 = vst.msk [vmem:[#allocation3 + $0x5] sm:$0x1] %vm463_vm3, %v4804_v61 }
0x2416   :  { %4576 = vrot.lane.b32.xlu1 %v4571_v19, %s6621_s2 }
0x2418   :  { %v4829_v23 = vpop.permute.xlu0 %4828 }
0x2419   :  { %4833 = vst.msk [vmem:[#allocation3 + $0x6] sm:$0x1] %vm578_vm4, %v4829_v23 }
0x241a   :  { %4601 = vrot.lane.b32.xlu1 %v4596_v37, %s6622_s3 }
0x241c   :  { %v5029_v14 = vpop.permute.xlu0 %5028 }
0x241d   :  { %5033 = vst.msk [vmem:[#allocation3 + $0x6] sm:$0x1] %vm463_vm3, %v5029_v14 }
0x241e   :  { %4801 = vrot.lane.b32.xlu1 %v4796_v57, %s6621_s2 }
0x2420   :  { %v5054_v7 = vpop.permute.xlu0 %5053 }
0x2421   :  { %5058 = vst.msk [vmem:[#allocation3 + $0x5] sm:$0x1] %vm578_vm4, %v5054_v7 }
0x2422   :  { %4826 = vrot.lane.b32.xlu1 %v4821_v58, %s6622_s3 }
0x2426   :  { %5026 = vrot.lane.b32.xlu1 %v5021_v50, %s6621_s2 }
0x242a   :  { %5051 = vrot.lane.b32.xlu1 %v5046_v27, %s6622_s3  ;;  %v6628_v27 = vmov 839922192  }
0x2480   :  { %v5208_v63 = vpop.permute.xlu1 %5207 }
0x2481   :  { %v5210_v24 = vmul.f32 %v5208_v63, %v5205_v2  ;;  %v5466_v2 = vunpack.c.l.s4 %v6628_v27 }
0x2483   :  { %v5222_v38 = vadd.f32 %v5221_v20, %v5210_v24  ;;  %v5467_v63 = vunpack.c.0.s8 %v5466_v2 }
0x2484   :  { %v5226_v53 = vpop.permute.xlu1 %5225 }
0x2485   :  { %v5241_v48 = vrot.slane %v5222_v38, %v7011_v6  ;;  %v5228_v8 = vmul.f32 %v5226_v53, %v5223_v35  ;;  %v5470_v20 = vsub.s32 %v5467_v63, %v7008_v5 }
0x2487   :  { %v5242_v51 = vcombine.high %v5241_v48, %v5241_v48  ;;  %v5246_v45 = vrot.slane %v5241_v48, %v7016_v16  ;;  %v5233_v17 = vadd.f32 %v5232_v33, %v5228_v8 }
0x2488   :  { %v4577_v4 = vpop.permute.xlu1 %4576 }
0x2489   :  { %v5266_v52 = vrot.slane %v5233_v17, %v7011_v6  ;;  %4582 = vst.msk [vmem:[#allocation3] sm:$0x1] %vm463_vm3, %v4577_v4  ;;  %5251 = vrot.lane.b32.xlu1 %v5246_v45, %s6621_s2  ;;  %v5250_v59 = vrot.slane %v5242_v51, %v7016_v16  ;;  %v5672_v17 = vld [vmem:[%s8455_s15] sm:$0xff]  ;;  %v5673_v4 = vld [vmem:[%s8455_s15 + $0x8] sm:$0xff] }
0x248b   :  { %v5267_v56 = vcombine.high %v5266_v52, %v5266_v52  ;;  %v5271_v26 = vrot.slane %v5266_v52, %v7016_v16  ;;  %5253 = vrot.lane.b32.xlu0 %v5250_v59, %s6621_s2  ;;  %v6382_v52 = vpack.c.bf16 %v5673_v4, %v5672_v17 }
0x248c   :  { %v4602_v22 = vpop.permute.xlu1 %4601 }
0x248d   :  { %4607 = vst.msk [vmem:[#allocation3 + $0x3] sm:$0x1] %vm578_vm4, %v4602_v22  ;;  %5276 = vrot.lane.b32.xlu1 %v5271_v26, %s6622_s3  ;;  %v5275_v6 = vrot.slane %v5267_v56, %v7016_v16 }
0x248f   :  { %5278 = vrot.lane.b32.xlu0 %v5275_v6, %s6622_s3 }
0x2490   :  { %v4802_v1 = vpop.permute.xlu1 %4801 }
0x2491   :  { %4807 = vst.msk [vmem:[#allocation3 + $0x1] sm:$0x1] %vm463_vm3, %v4802_v1 }
0x2494   :  { %v4827_v55 = vpop.permute.xlu1 %4826 }
0x2495   :  { %4832 = vst.msk [vmem:[#allocation3 + $0x2] sm:$0x1] %vm578_vm4, %v4827_v55 }
0x2498   :  { %v5027_v30 = vpop.permute.xlu1 %5026 }
0x2499   :  { %5032 = vst.msk [vmem:[#allocation3 + $0x2] sm:$0x1] %vm463_vm3, %v5027_v30 }
0x249c   :  { %v5052_v18 = vpop.permute.xlu1 %5051 }
0x249d   :  { %5057 = vst.msk [vmem:[#allocation3 + $0x1] sm:$0x1] %vm578_vm4, %v5052_v18 }
0x24fb   :  { %v5252_v21 = vpop.permute.xlu1 %5251 }
0x24fc   :  { %5257 = vst.msk [vmem:[#allocation3 + $0x3] sm:$0x1] %vm463_vm3, %v5252_v21 }
0x24fd   :  { %v5254_v54 = vpop.permute.xlu0 %5253 }
0x24fe   :  { %5258 = vst.msk [vmem:[#allocation3 + $0x7] sm:$0x1] %vm463_vm3, %v5254_v54 }
0x24ff   :  { %v5277_v15 = vpop.permute.xlu1 %5276 }
0x2500   :  { %5282 = vst.msk [vmem:[#allocation3] sm:$0x1] %vm578_vm4, %v5277_v15  ;;  %v5853_v15 = vld [vmem:[%s8456_s16] ss:$0 sm:$0xff] }
0x2501   :  { %v5279_v41 = vpop.permute.xlu0 %5278 }
0x2502   :  { %5283 = vst.msk [vmem:[#allocation3 + $0x4] sm:$0x1] %vm578_vm4, %v5279_v41 }
0x2507   :  { %v5284_v28 = vld [vmem:[#allocation3] sm:$0xf] }
0x2509   :  { %v8366_v60 = vld [vmem:[#allocation3 + $0x4] sm:$0xf] }
0x250a   :  { %v5294_v43 = vcombine.low %v5284_v28, %v8366_v60 }
0x250c   :  { %6237 = vmatmul.mubr.msk.f32.vlgmr.msra.gmra.mrb[36].mxu0 %vm218_vm2, %v5294_v43 }
0x250d   :  { %6251 = vmatpush3.msk.msra.mxu0 %vm5519_vm13, %v5284_v28  ;;  %6252 = vmatprep.mubr.msk.f32.mxu0 %vm6616_vm1, %v6617_v10 }
0x250e   :  { %6255 = vmatprep.subr.mxu0 %v6617_v10 }
0x25df   :  { %v5363_v34 = vpop.f32.mrb[36].mxu0 }
0x25e0   :  { %v5364_v49 = vadd.f32 %v5846_v12, %v5363_v34  ;;  %v6238_v0 = vpop.f32.mrb[37].mxu0 }
0x25e2   :  { %6583 = vtanh.f32 %v5364_v49 }
0x25ec   :  { %v6584_v36 = vpop.eup %6583 }
0x25ed   :  { %6248 = vmatmul.mubr.msk.f32.vlgmr.msra.gmra.mrb[30].mxu1 %vm218_vm2, %v6584_v36 }
0x25ee   :  { %6268 = vmatprep.mubr.msk.f32.mxu1 %vm6616_vm1, %v6617_v10  ;;  %6383 = vmatpush3.bf16.msra.mxu1 %v6382_v52 }
0x25ef   :  { %6384 = vmatprep.subr.bf16.mxu1 %v6615_v3 }
0x26c0   :  { %v5437_v61 = vpop.f32.mrb[30].mxu1 }
0x26c1   :  { %v5442_v19 = vcombine.high %v5437_v61, %v5437_v61  ;;  %5445 = vperm.xlu1 %6402, %v5437_v61   ;;  %v6249_v23 = vpop.f32.mrb[31].mxu1 }
0x26c3   :  { %5448 = vperm.xlu0 %6403, %v5442_v19  }
0x2740   :  { %v5446_v37 = vpop.permute.xlu1 %5445 }
0x2741   :  { %v5453_v57 = vrot.slane %v5446_v37, %v8006_v47 }
0x2742   :  { %v5449_v14 = vpop.permute.xlu0 %5448 }
0x2743   :  { %v5457_v7 = vrot.slane %v5449_v14, %v8006_v47 }
0x2745   :  { %v5458_v58 = vsel %vm3509_vm5, %v5457_v7, %v5453_v57 }
0x2746   :  { %v5461_v50 = vsel %vm5460_vm14, %v5458_v58, -inf }
0x2747   :  { %5462 = vmax.xlane.f32.xlu1 %v5461_v50 }
0x27d4   :  { %v5463_v24 = vpop.xlane.xlu1 %5462 }
0x27d5   :  { %v5471_v46 = vrot.slane %v5463_v24, %v5470_v20 }
0x27d7   :  { %v5475_v9 = vrot.slane %v5471_v46, %v7016_v16  ;;  %v5482_v13 = vrot.slane %v5471_v46, %v3535_v25 }
0x27d9   :  { %5477 = vbcast.lane.b32.xlu0 %v5475_v9, 256 }
0x27dd   :  { %5484 = vbcast.lane.b32.xlu0 %v5482_v13, 256 }
0x284b   :  { %v5478_v38 = vpop.permute.xlu0 %5477 }
0x284c   :  { %v5488_v35 = vsub.f32 %v5437_v61, %v5478_v38 }
0x284e   :  { %v5490_v62 = vmul.f32 1.442695, %v5488_v35 }
0x284f   :  { %v5485_v29 = vpop.permute.xlu0 %5484 }
0x2850   :  { %6585 = vpow2.f32 %v5490_v62  ;;  %v5489_v53 = vsub.f32 %v5442_v19, %v5485_v29 }
0x2852   :  { %v5492_v33 = vmul.f32 1.442695, %v5489_v53 }
0x2854   :  { %6587 = vpow2.f32 %v5492_v33 }
0x285a   :  { %v6586_v48 = vpop.eup %6585 }
0x285b   :  { %5497 = vperm.xlu0 %6403, %v6586_v48  }
0x285e   :  { %v6588_v8 = vpop.eup %6587 }
0x285f   :  { %5500 = vperm.xlu0 %6403, %v6588_v8  }
0x28da   :  { %v5498_v44 = vpop.permute.xlu0 %5497 }
0x28db   :  { %v5505_v16 = vrot.slane %v5498_v44, %v8006_v47 }
0x28dd   :  { %6253 = vmatmul.mubr.msk.f32.vlgmr.msra.gmra.mrb[38].mxu0 %vm5516_vm15, %v5505_v16 }
0x28de   :  { %6256 = vmatpush3.msk.msra.mxu0 %vm5519_vm13, %v8366_v60  ;;  %v5501_v5 = vpop.permute.xlu0 %5500  ;;  %6257 = vmatprep.mubr.msk.f32.mxu0 %vm6616_vm1, %v6617_v10  ;;  %v5674_v10 = vld [vmem:[%s8455_s15 + $0x10] sm:$0xff] }
0x28df   :  { %v5509_v25 = vrot.slane %v5501_v5, %v8006_v47  ;;  %v5675_v47 = vld [vmem:[%s8455_s15 + $0x18] sm:$0xff]  ;;  %s6629_s15 = smov [#allocation4]  }
0x28e0   :  { %v6385_v59 = vpack.c.bf16 %v5675_v47, %v5674_v10  ;;  %s5766_s9 = sshll.u32 %s6629_s15, 4  ;;  %s5767_s9 = int_to_ptr.vmem [resolvable:$true] %s5766_s9 }
0x28e1   :  { %6258 = vmatmul.mubr.msk.f32.vlgmr.msra.gmra.mrb[40].mxu0 %vm5516_vm15, %v5509_v25  ;;  %v5510_v51 = vsel %vm3509_vm5, %v5509_v25, %v5505_v16  ;;  %s6591_s0 = scalar_lea.vmem %s5767_s9, 32  ;;  %p6596_p1 = scmp.lt.s32.totalorder %s5767_s9, %s5767_s9 }
0x28e2   :  { %v5512_v45 = vsel %vm5460_vm14, %v5510_v51, 0.0  ;;  %6386 = vmatpush3.bf16.msra.mxu1 %v6385_v59  ;;  %p6592_p0 = scmp.ne.s32.totalorder %s5767_s9, %s6591_s0  ;;  %p6597_p2 = scmp.lt.s32.totalorder %s6591_s0, %s6591_s0 }
0x28e3   :  { %5513 = vadd.xlane.f32.xlu0 %v5512_v45 }
0x28e4   :  { %p6598_p3 = por %p6597_p2, %p6596_p1 }
0x28e6   :  { %p6599_p4 = pnand %p6598_p3, %p6592_p0 }
0x2970   :  { %v5514_v56 = vpop.xlane.xlu0 %5513 }
0x2971   :  { %6589 = vrcp.f32 %v5514_v56 }
0x297b   :  { %v6590_v26 = vpop.eup %6589 }
0x297c   :  { %v5667_v1 = vrot.slane %v6590_v26, 1 }
0x29b0   :  { %v5588_v22 = vpop.f32.mrb[38].mxu0 }
0x29b1   :  { %v6254_v6 = vpop.f32.mrb[39].mxu0  ;;  %v5670_v3 = vmul.f32 %v6590_v26, %v5588_v22 }
0x29b4   :  { %v5662_v55 = vpop.f32.mrb[40].mxu0 }
0x29b5   :  { %v5671_v30 = vmul.f32 %v5667_v1, %v5662_v55  ;;  %v6259_v18 = vpop.f32.mrb[41].mxu0 }
0x29b7   :  { %v5685_v21 = vrot.slane %v5671_v30, 7 }
0x29b9   :  { %v5686_v54 = vsel %vm3509_vm5, %v5685_v21, %v5670_v3 }
0x29ba   :  { %6269 = vmatmul.mubr.msk.f32.vlgmr.msra.gmra.mrb[32].mxu1 %vm218_vm2, %v5686_v54 }
0x2a8d   :  { %v5755_v41 = vpop.f32.mrb[32].mxu1 }
0x2a8e   :  { %v5756_v28 = vadd.f32 %v5853_v15, %v5755_v41  ;;  %v6270_v60 = vpop.f32.mrb[33].mxu1 }
0x2a90   :  { %5759 = vst [vmem:[#allocation4] sm:$0x3] %v5756_v28 }
0x2a91   :  { %6602 = shalt.err (!%p6599_p4)
}
0x2a92   :  { %s6603_s29 = scalar_lea.hbm %s8457_s17, 32 }
0x2a93   :  { %p6604_p5 = scmp.ne.s32.totalorder %s8457_s17, %s6603_s29  ;;  %p6607_p6 = scmp.lt.u32.totalorder %s6603_s29, %s8457_s17 }
0x2a95   :  { %p6609_p7 = pnand %p6607_p6, %p6604_p5 }
0x2a97   :  { %6612 = shalt.err (!%p6609_p7)
}
0x2a98   :  { %5769 = dma.vmem_to_hbm [thread:$0]  %s5767_s9, 32, %s8457_s17, [#allocation5]  }
0x2a99   :  { %6613 = dma.done.wait [#allocation5], 32  }
0x2a9a   :  { %6614 = vsyncadd [#allocation5], 4294967264 }
0x2a9b   :  { %5773 = vsyncpa [#allocation5], 1 }

</bundles_post_ra>
